<compile_context>
chip_gen: v6e
topology: v6e:2x2x1
jax: 0.10.0
libtpu: 0.0.40
codegen_flags: <defaults>
</compile_context>

<pallas_src>
import functools
import math

import jax
import jax.numpy as jnp
from jax.experimental import pallas as pl
from jax.experimental.pallas import tpu as pltpu


# ----------------------------- Pallas kernel ------------------------------

def simple_splitnet_kernel(x_ref, w_ref, b_ref, w3t_ref, b3t_ref, o_ref, *,
                           compute_dtype, eup_dtype):
    """Fused SimpleSplitNet forward on one (TB, 128) batch tile.

    Weight slab layout (built host-side in fold_params), lanes of w_ref:
      [  0,128): W1_ts -> layer-1 [tanh | sigmoid] pre-activations (64+64)
      [128,256): W1_sc -> layer-1 [sin  | cos    ] pre-activations (64+64)
      [256,384): W2_all -> layer-2 [tanh | sig | sin | cos] (4x32), rows
                 [64,128) zero (input arrives duplicated as [h1 | h1]).
    omegas, the layer scalars m, the 0.5 of the sigmoid->tanh rewrite and the
    pi/2 of cos->sin are all folded into the packed weights/biases, so each
    SplitLayer costs exactly one tanh push + one sin push on lane-dense
    [TB,128] tiles.
    """
    lane = jax.lax.broadcasted_iota(jnp.int32, (1, 128), 1)
    # +1 on the sigmoid lanes (sigmoid(z) = 0.5*(tanh(z/2)+1); the 0.5 is
    # folded into the next layer's weights, the z/2 into this layer's).
    offs1 = jnp.where(lane >= 64, 1.0, 0.0).astype(jnp.float32)               # layer 1
    offs2 = jnp.where((lane >= 32) & (lane < 64), 1.0, 0.0).astype(jnp.float32)  # layer 2
    lower_half = lane < 64

    # Cast inside the kernel (x stays f32 in HBM; no wrapper-side astype pass).
    x = x_ref[...].astype(compute_dtype)

    # ---- Layer 1: 128 -> 64, gates packed as [tanh|sig] and [sin|cos] ----
    t1 = jnp.dot(x, w_ref[:, 0:128], preferred_element_type=jnp.float32) + b_ref[:, 0:128]
    s1 = jnp.dot(x, w_ref[:, 128:256], preferred_element_type=jnp.float32) + b_ref[:, 128:256]
    a1 = jnp.tanh(t1.astype(eup_dtype)).astype(jnp.float32) + offs1   # [tanh | 2*sigmoid]
    c1 = jnp.sin(s1.astype(eup_dtype)).astype(jnp.float32)            # [sin  | cos      ]
    p1 = a1 * c1
    # XLU lane-rotate by 64 + multiply: every lane holds the full 4-gate
    # product (duplicated across halves); 0.5*m1 is folded into W2.
    h1 = (p1 * pltpu.roll(p1, shift=64, axis=1)).astype(compute_dtype)

    # ---- Layer 2: 64 -> 32, all four 32-wide gates in ONE matmul ----
    z2 = jnp.dot(h1, w_ref[:, 256:384], preferred_element_type=jnp.float32) + b_ref[:, 256:384]
    a2 = jnp.tanh(z2.astype(eup_dtype)).astype(jnp.float32) + offs2
    c2 = jnp.sin(z2.astype(eup_dtype)).astype(jnp.float32)
    act2 = jnp.where(lower_half, a2, c2)        # [tanh | 2*sig | sin | cos] quarters
    g = act2 * pltpu.roll(act2, shift=32, axis=1)
    h2 = g * pltpu.roll(g, shift=64, axis=1)    # full 4-gate product in every lane (f32)

    # ---- Final linear (32 -> 3), emitted lane-dense as [3, TB] ----
    # 0.5*m2 folded into w3t; lanes [32,128) of w3t are zero.
    out_t = jnp.einsum('ok,bk->ob', w3t_ref[...], h2,
                       preferred_element_type=jnp.float32) + b3t_ref[...]
    o_ref[...] = out_t.astype(o_ref.dtype)


# ------------------------------ JAX wrapper -------------------------------

def _cdiv(a, b):
    return -(-a // b)


def _round_up(n, m):
    return ((n + m - 1) // m) * m


def _auto_eup_bf16():
    """Enable bf16 transcendentals only on chips with a bf16 EUP (v6e/v7x)."""
    try:
        kind = jax.devices()[0].device_kind.lower()
    except Exception:
        return False
    return ("v6" in kind) or ("v7" in kind) or ("7x" in kind)


def _choose_tile(B, max_tile):
    # Multiple of 128 (keeps the transposed [3,B] output block lane-aligned
    # and the x block sublane-aligned); big enough to amortize per-step
    # overhead, capped at ceil(B/2) so the "parallel" batch grid keeps >= 2
    # steps for v7x's two TensorCores.
    half = _round_up(_cdiv(B, 2), 128)
    return max(128, min(max_tile, half))


def simple_splitnet_forward(x, kernel_params, *, max_tile=1024,
                            compute_dtype=jnp.bfloat16, eup_bf16=None):
    """x: [B, 128] f32. Returns [B, 3] f32."""
    w_slab, b_slab, w3t, b3t = kernel_params
    B, in_dim = x.shape
    assert in_dim == 128

    if eup_bf16 is None:
        eup_bf16 = _auto_eup_bf16()
    eup_dtype = jnp.bfloat16 if eup_bf16 else jnp.float32

    TB = _choose_tile(B, _round_up(max_tile, 128))
    grid = (_cdiv(B, TB),)   # ragged last block handled by Pallas (no jnp.pad)

    kernel = functools.partial(simple_splitnet_kernel,
                               compute_dtype=compute_dtype, eup_dtype=eup_dtype)
    const = lambda i: (0, 0)   # weights/biases: VMEM-resident, never re-DMA'd

    out_t = pl.pallas_call(
        kernel,
        out_shape=jax.ShapeDtypeStruct((3, B), jnp.float32),   # transposed, lane-dense
        grid_spec=pltpu.PrefetchScalarGridSpec(
            num_scalar_prefetch=0,
            grid=grid,
            in_specs=[
                pl.BlockSpec((TB, 128), lambda i: (i, 0)),      # x tile (f32)
                pl.BlockSpec((128, 384), const),                # weight slab
                pl.BlockSpec((1, 384), const),                  # bias slab (f32)
                pl.BlockSpec((3, 128), const),                  # W3^T (f32)
                pl.BlockSpec((3, 1), const),                    # b3 (f32)
            ],
            out_specs=pl.BlockSpec((3, TB), lambda i: (0, i)),
        ),
        compiler_params=pltpu.CompilerParams(
            dimension_semantics=("parallel",),
            vmem_limit_bytes=32 * 1024 * 1024),
    )(x, w_slab.astype(compute_dtype), b_slab, w3t, b3t)

    return out_t.T   # back to [B, 3]


# --------------------------- Parameter handling ----------------------------

def init_params(key, cs):
    """Raw (PyTorch-equivalent) parameters. Weights stored transposed
    ([in, out]) per gate chunk; SplitLayer biases are zero (as in the spec)."""
    k1, k2, k3, kb3 = jax.random.split(key, 4)

    def split_layer(k, in_dim, out_dim, c4):
        ks = jax.random.split(k, 4)
        Wc = [jax.random.uniform(ks[i], (in_dim, out_dim), jnp.float32,
                                 minval=-c4[i], maxval=c4[i]) for i in range(4)]
        b = jnp.zeros((4 * out_dim,), jnp.float32)
        return Wc, b

    W1c, b1 = split_layer(k1, 128, 64, cs[0])
    W2c, b2 = split_layer(k2, 64, 32, cs[1])
    W3 = jax.random.uniform(k3, (32, 3), jnp.float32, minval=-cs[2], maxval=cs[2])
    bound = 1.0 / math.sqrt(32)
    b3 = jax.random.uniform(kb3, (3,), jnp.float32, minval=-bound, maxval=bound)
    return (W1c, b1), (W2c, b2), (W3, b3)


def fold_params(raw, omegas, ms):
    """Fold omegas, the layer scalars m, the 0.5 of the sigmoid->tanh rewrite
    and the pi/2 of cos->sin into packed weight/bias slabs."""
    (W1c, b1), (W2c, b2), (W3, b3) = raw
    om1, om2 = omegas

    # Layer 1 (128 -> 64): two [128, 128] packed weights.
    d1 = 64
    b1c = [b1[i * d1:(i + 1) * d1] for i in range(4)]
    w1ts = jnp.concatenate([om1[0] * W1c[0], 0.5 * om1[1] * W1c[1]], axis=1)
    w1sc = jnp.concatenate([om1[2] * W1c[2], om1[3] * W1c[3]], axis=1)
    b1ts = jnp.concatenate([om1[0] * b1c[0], 0.5 * om1[1] * b1c[1]])
    b1sc = jnp.concatenate([om1[2] * b1c[2], om1[3] * b1c[3] + math.pi / 2])

    # Layer 2 (64 -> 32): ONE [128, 128] weight holding all four 32-wide
    # gates; rows [64,128) are zero (input arrives duplicated as [h1 | h1]);
    # 0.5 (layer-1 sigmoid) * m1 folded into the weight columns.
    d2 = 32
    g1 = 0.5 * ms[0]
    b2c = [b2[i * d2:(i + 1) * d2] for i in range(4)]
    col_scales = (om2[0], 0.5 * om2[1], om2[2], om2[3])
    w2_real = jnp.concatenate([g1 * col_scales[i] * W2c[i] for i in range(4)], axis=1)
    w2all = jnp.concatenate([w2_real, jnp.zeros_like(w2_real)], axis=0)
    b2all = jnp.concatenate([col_scales[0] * b2c[0],
                             col_scales[1] * b2c[1],
                             col_scales[2] * b2c[2],
                             col_scales[3] * b2c[3] + math.pi / 2])

    # Final linear: 0.5 (layer-2 sigmoid) * m2 folded in; stored transposed
    # [3, 128] with zero columns [32, 128) (h2 duplicates the product 4x).
    w3t = jnp.concatenate([(0.5 * ms[1]) * W3.T, jnp.zeros((3, 96), jnp.float32)], axis=1)
    b3t = b3[:, None]

    w_slab = jnp.concatenate([w1ts, w1sc, w2all], axis=1)        # [128, 384]
    b_slab = jnp.concatenate([b1ts, b1sc, b2all])[None, :]       # [1, 384] f32
    return w_slab, b_slab, w3t, b3t


# ------------------------------- Reference ---------------------------------

def reference_forward(x, raw, omegas, ms):
    """Pure-JAX f32 reference with the original (unfolded) math."""
    (W1c, b1), (W2c, b2), (W3, b3) = raw
    hi = jax.lax.Precision.HIGHEST

    def split(h, Wc, b, om, m):
        d = Wc[0].shape[1]
        pre = jnp.dot(h, jnp.concatenate(Wc, axis=1), precision=hi) + b
        t = jnp.tanh(om[0] * pre[:, :d])
        sg = jax.nn.sigmoid(om[1] * pre[:, d:2 * d])
        sn = jnp.sin(om[2] * pre[:, 2 * d:3 * d])
        cs = jnp.cos(om[3] * pre[:, 3 * d:])
        return t * sg * sn * cs * m

    h = split(x, W1c, b1, omegas[0], ms[0])
    h = split(h, W2c, b2, omegas[1], ms[1])
    return jnp.dot(h, W3, precision=hi) + b3[None, :]


# --------------------------------- main ------------------------------------

if __name__ == "__main__":
    # Deterministic synthetic config (non-trivial cs/omegas/ms to exercise the
    # weight folding).
    cs = ((0.07, 0.07, 0.10, 0.10), (0.10, 0.10, 0.15, 0.15), 0.25)
    omegas = ((1.0, 1.2, 1.5, 0.8), (0.9, 1.1, 1.3, 0.7))
    ms = (1.1, 0.9)

    root = jax.random.PRNGKey(0)
    k_x, k_p = jax.random.split(root)

    # B=200 -> TB=128, grid of 2 "parallel" steps with a ragged last block
    # (exercises the no-pad path and both-TensorCore sharding on v7x).
    B, IN = 200, 128
    x = jax.random.normal(k_x, (B, IN), jnp.float32)

    raw = init_params(k_p, cs)
    kparams = fold_params(raw, omegas, ms)
    ref = reference_forward(x, raw, omegas, ms)

    # 1) f32 compute path, f32 transcendentals: verifies the fused / folded /
    #    packed kernel algebra against the unfolded reference.
    out_f32 = jax.block_until_ready(
        simple_splitnet_forward(x, kparams, compute_dtype=jnp.float32, eup_bf16=False))
    assert out_f32.shape == (B, 3)
    err_f32 = float(jnp.max(jnp.abs(out_f32 - ref)))
    assert err_f32 < 5e-3, f"f32 kernel mismatch: max abs err {err_f32}"

    # 2) Performance configuration: bf16 MXU operands, f32 accumulation, and
    #    (on v6e/v7x only) bf16 transcendentals. Looser tolerance per bf16.
    out_perf = jax.block_until_ready(
        simple_splitnet_forward(x, kparams, compute_dtype=jnp.bfloat16, eup_bf16=None))
    assert out_perf.shape == (B, 3)
    err_perf = float(jnp.max(jnp.abs(out_perf - ref)))
    assert err_perf < 1e-1, f"bf16 kernel mismatch: max abs err {err_perf}"

    print("KERNEL_OK")
</pallas_src>

<mosaic_0001>
module attributes {stable_mosaic.version = 11 : i64} {
  func.func @simple_splitnet_kernel(%arg0: i32, %arg1: memref<128x128xf32, #tpu.memory_space<vmem>>, %arg2: memref<128x384xf32, #tpu.memory_space<vmem>>, %arg3: memref<1x384xf32, #tpu.memory_space<vmem>>, %arg4: memref<3x128xf32, #tpu.memory_space<vmem>>, %arg5: memref<3x1xf32, #tpu.memory_space<vmem>>, %arg6: memref<3x128xf32, #tpu.memory_space<vmem>>) attributes {dimension_semantics = [#tpu.dimension_semantics<parallel>], iteration_bounds = array<i64: 2>, scalar_prefetch = 0 : i64, scratch_operands = 0 : i64, tpu.core_type = #tpu.core_type<tc>, window_params = [{transform_indices = @transform_0, window_bounds = array<i64: 128, 128>}, {pipeline_mode = #tpu.pipeline_mode<synchronous>, transform_indices = @transform_1, window_bounds = array<i64: 128, 384>}, {pipeline_mode = #tpu.pipeline_mode<synchronous>, transform_indices = @transform_2, window_bounds = array<i64: 1, 384>}, {pipeline_mode = #tpu.pipeline_mode<synchronous>, transform_indices = @transform_3, window_bounds = array<i64: 3, 128>}, {pipeline_mode = #tpu.pipeline_mode<synchronous>, transform_indices = @transform_4, window_bounds = array<i64: 3, 1>}, {transform_indices = @transform_5, window_bounds = array<i64: 3, 128>}]} {
    %0 = tpu.iota {dimensions = array<i32: 1>} : vector<1x128xi32>
    %c64_i32 = arith.constant 64 : i32
    %1 = vector.broadcast %c64_i32 : i32 to vector<1x128xi32>
    %2 = arith.cmpi sge, %0, %1 : vector<1x128xi32>
    %cst = arith.constant 1.000000e+00 : f32
    %cst_0 = arith.constant 0.000000e+00 : f32
    %3 = vector.broadcast %cst : f32 to vector<1x128xf32>
    %4 = vector.broadcast %cst_0 : f32 to vector<1x128xf32>
    %5 = arith.select %2, %3, %4 : vector<1x128xi1>, vector<1x128xf32>
    %c32_i32 = arith.constant 32 : i32
    %6 = vector.broadcast %c32_i32 : i32 to vector<1x128xi32>
    %7 = arith.cmpi sge, %0, %6 : vector<1x128xi32>
    %c64_i32_1 = arith.constant 64 : i32
    %8 = vector.broadcast %c64_i32_1 : i32 to vector<1x128xi32>
    %9 = arith.cmpi slt, %0, %8 : vector<1x128xi32>
    %10 = arith.andi %7, %9 : vector<1x128xi1>
    %cst_2 = arith.constant 1.000000e+00 : f32
    %cst_3 = arith.constant 0.000000e+00 : f32
    %11 = vector.broadcast %cst_2 : f32 to vector<1x128xf32>
    %12 = vector.broadcast %cst_3 : f32 to vector<1x128xf32>
    %13 = arith.select %10, %11, %12 : vector<1x128xi1>, vector<1x128xf32>
    %c64_i32_4 = arith.constant 64 : i32
    %14 = vector.broadcast %c64_i32_4 : i32 to vector<1x128xi32>
    %15 = arith.cmpi slt, %0, %14 : vector<1x128xi32>
    %c0 = arith.constant 0 : index
    %c0_5 = arith.constant 0 : index
    %16 = vector.load %arg1[%c0, %c0_5] : memref<128x128xf32, #tpu.memory_space<vmem>>, vector<128x128xf32>
    %c0_6 = arith.constant 0 : index
    %c0_7 = arith.constant 0 : index
    %17 = vector.load %arg2[%c0_6, %c0_7] : memref<128x384xf32, #tpu.memory_space<vmem>>, vector<128x128xf32>
    %cst_8 = arith.constant dense<0.000000e+00> : vector<128x128xf32>
    %18 = tpu.matmul %16, %17, %cst_8 {dimension_numbers = #tpu.dot_dimension_numbers<[1], [0], [0], [1], [0, 0, 1, 1], [], []>} : vector<128x128xf32>, vector<128x128xf32>, vector<128x128xf32> -> vector<128x128xf32>
    %c0_9 = arith.constant 0 : index
    %c0_10 = arith.constant 0 : index
    %19 = vector.load %arg3[%c0_9, %c0_10] : memref<1x384xf32, #tpu.memory_space<vmem>>, vector<1x128xf32>
    %20 = vector.broadcast %19 : vector<1x128xf32> to vector<128x128xf32>
    %21 = arith.addf %18, %20 : vector<128x128xf32>
    %c0_11 = arith.constant 0 : index
    %c128 = arith.constant 128 : index
    %22 = vector.load %arg2[%c0_11, %c128] : memref<128x384xf32, #tpu.memory_space<vmem>>, vector<128x128xf32>
    %cst_12 = arith.constant dense<0.000000e+00> : vector<128x128xf32>
    %23 = tpu.matmul %16, %22, %cst_12 {dimension_numbers = #tpu.dot_dimension_numbers<[1], [0], [0], [1], [0, 0, 1, 1], [], []>} : vector<128x128xf32>, vector<128x128xf32>, vector<128x128xf32> -> vector<128x128xf32>
    %c0_13 = arith.constant 0 : index
    %c128_14 = arith.constant 128 : index
    %24 = vector.load %arg3[%c0_13, %c128_14] : memref<1x384xf32, #tpu.memory_space<vmem>>, vector<1x128xf32>
    %25 = vector.broadcast %24 : vector<1x128xf32> to vector<128x128xf32>
    %26 = arith.addf %23, %25 : vector<128x128xf32>
    %27 = math.tanh %21 : vector<128x128xf32>
    %28 = vector.broadcast %5 : vector<1x128xf32> to vector<128x128xf32>
    %29 = arith.addf %27, %28 : vector<128x128xf32>
    %30 = math.sin %26 : vector<128x128xf32>
    %31 = arith.mulf %29, %30 : vector<128x128xf32>
    %c64_i32_15 = arith.constant 64 : i32
    %32 = tpu.dynamic_rotate %31 by %c64_i32_15 dim 1 : vector<128x128xf32>, i32 -> vector<128x128xf32>
    %33 = arith.mulf %31, %32 : vector<128x128xf32>
    %c0_16 = arith.constant 0 : index
    %c256 = arith.constant 256 : index
    %34 = vector.load %arg2[%c0_16, %c256] : memref<128x384xf32, #tpu.memory_space<vmem>>, vector<128x128xf32>
    %cst_17 = arith.constant dense<0.000000e+00> : vector<128x128xf32>
    %35 = tpu.matmul %33, %34, %cst_17 {dimension_numbers = #tpu.dot_dimension_numbers<[1], [0], [0], [1], [0, 0, 1, 1], [], []>} : vector<128x128xf32>, vector<128x128xf32>, vector<128x128xf32> -> vector<128x128xf32>
    %c0_18 = arith.constant 0 : index
    %c256_19 = arith.constant 256 : index
    %36 = vector.load %arg3[%c0_18, %c256_19] : memref<1x384xf32, #tpu.memory_space<vmem>>, vector<1x128xf32>
    %37 = vector.broadcast %36 : vector<1x128xf32> to vector<128x128xf32>
    %38 = arith.addf %35, %37 : vector<128x128xf32>
    %39 = math.tanh %38 : vector<128x128xf32>
    %40 = vector.broadcast %13 : vector<1x128xf32> to vector<128x128xf32>
    %41 = arith.addf %39, %40 : vector<128x128xf32>
    %42 = math.sin %38 : vector<128x128xf32>
    %43 = vector.shape_cast %15 : vector<1x128xi1> to vector<1x128xi1>
    %44 = vector.broadcast %43 : vector<1x128xi1> to vector<128x128xi1>
    %45 = arith.select %44, %41, %42 : vector<128x128xi1>, vector<128x128xf32>
    %c32_i32_20 = arith.constant 32 : i32
    %46 = tpu.dynamic_rotate %45 by %c32_i32_20 dim 1 : vector<128x128xf32>, i32 -> vector<128x128xf32>
    %47 = arith.mulf %45, %46 : vector<128x128xf32>
    %c64_i32_21 = arith.constant 64 : i32
    %48 = tpu.dynamic_rotate %47 by %c64_i32_21 dim 1 : vector<128x128xf32>, i32 -> vector<128x128xf32>
    %49 = arith.mulf %47, %48 : vector<128x128xf32>
    %c0_22 = arith.constant 0 : index
    %c0_23 = arith.constant 0 : index
    %50 = vector.load %arg4[%c0_22, %c0_23] : memref<3x128xf32, #tpu.memory_space<vmem>>, vector<3x128xf32>
    "tpu.trace_start"() <{level = 10 : i32, message = "ok,bk->ob"}> : () -> ()
    %cst_24 = arith.constant dense<0.000000e+00> : vector<3x128xf32>
    %51 = tpu.matmul %50, %49, %cst_24 {dimension_numbers = #tpu.dot_dimension_numbers<[1], [1], [0], [0], [0, 0, 1, 0], [], []>} : vector<3x128xf32>, vector<128x128xf32>, vector<3x128xf32> -> vector<3x128xf32>
    "tpu.trace_stop"() : () -> ()
    %c0_25 = arith.constant 0 : index
    %c0_26 = arith.constant 0 : index
    %52 = vector.load %arg5[%c0_25, %c0_26] : memref<3x1xf32, #tpu.memory_space<vmem>>, vector<3x1xf32>
    %53 = vector.broadcast %52 : vector<3x1xf32> to vector<3x128xf32>
    %54 = arith.addf %51, %53 : vector<3x128xf32>
    %c0_27 = arith.constant 0 : index
    %c0_28 = arith.constant 0 : index
    %55 = vector.load %arg6[%c0_27, %c0_28] : memref<3x128xf32, #tpu.memory_space<vmem>>, vector<3x128xf32>
    tpu.vector_store %arg6[%c0_27, %c0_28], %54 {strides = array<i32>} : memref<3x128xf32, #tpu.memory_space<vmem>>, vector<3x128xf32>,
    return
  }
  func.func @transform_0(%arg0: i32) -> (i32, i32) {
    %c0_i32 = arith.constant 0 : i32
    %c0_i32_0 = arith.constant 0 : i32
    return %arg0, %c0_i32 : i32, i32
  }
  func.func @transform_1(%arg0: i32) -> (i32, i32) {
    %c0_i32 = arith.constant 0 : i32
    %c0_i32_0 = arith.constant 0 : i32
    %c0_i32_1 = arith.constant 0 : i32
    return %c0_i32, %c0_i32_0 : i32, i32
  }
  func.func @transform_2(%arg0: i32) -> (i32, i32) {
    %c0_i32 = arith.constant 0 : i32
    %c0_i32_0 = arith.constant 0 : i32
    %c0_i32_1 = arith.constant 0 : i32
    return %c0_i32, %c0_i32_0 : i32, i32
  }
  func.func @transform_3(%arg0: i32) -> (i32, i32) {
    %c0_i32 = arith.constant 0 : i32
    %c0_i32_0 = arith.constant 0 : i32
    %c0_i32_1 = arith.constant 0 : i32
    return %c0_i32, %c0_i32_0 : i32, i32
  }
  func.func @transform_4(%arg0: i32) -> (i32, i32) {
    %c0_i32 = arith.constant 0 : i32
    %c0_i32_0 = arith.constant 0 : i32
    %c0_i32_1 = arith.constant 0 : i32
    return %c0_i32, %c0_i32_0 : i32, i32
  }
  func.func @transform_5(%arg0: i32) -> (i32, i32) {
    %c0_i32 = arith.constant 0 : i32
    %c0_i32_0 = arith.constant 0 : i32
    return %c0_i32, %arg0 : i32, i32
  }
}

</mosaic_0001>

<bundles_post_ra>
// kernel: tpu_custom_call.1
= control target key start
LH: loop header
LB: loop body
LE: loop exit
PB: predicated region body
PF: predicated region fallthrough
CT: control target
= control target key end

     0   :  { %10 = vsyncpa [#allocation3], 0  ;;  %s9402_s0 = inlined_call_operand.hbm [shape: f32[200,128], index: 0, kind: input, shape index: {}]   ;;  %s9403_s1 = inlined_call_operand.hbm [shape: f32[128,384], index: 1, kind: input, shape index: {}]   ;;  %s9404_s2 = inlined_call_operand.vmem [shape: f32[1,384], index: 2, kind: input, shape index: {}]   ;;  %s9405_s3 = inlined_call_operand.vmem [shape: f32[3,128], index: 3, kind: input, shape index: {}]   ;;  %s9406_s4 = inlined_call_operand.vmem [shape: f32[3,1], index: 4, kind: input, shape index: {}]   ;;  %s9407_s5 = inlined_call_operand.hbm [shape: f32[3,200], index: 5, kind: output, shape index: {}]  }
   0x1   :  { %12 = vsyncpa [#allocation3 + $0x1], 0 }
   0x2   :  { %13 = vsyncpa [#allocation6], 0 }
   0x3   :  { %14 = vsyncpa [#allocation4], 0 }
   0x4   :  { %16 = vsyncpa [#allocation4 + $0x1], 0  ;;  %s5565_s18 = smov 0   ;;  %s5567_s19 = smov 0  }
   0x5   :  { %s5569_s20 = smov 0   ;;  %s5571_s21 = smov 0  }
   0x6 LB: > { %s5586_s22 = sadd.s32 4294967295, %s5515_s21   ;;  %s4539_s23 = sadd.s32 4294967294, %s5515_s21   ;;  %s5515_s21 = sphi %s5571_s21, %s9826_s21   ;;  %s5511_s20 = sphi %s5569_s20, %s9825_s20   ;;  %s5507_s19 = sphi %s5567_s19, %s9824_s19   ;;  %s5503_s18 = sphi %s5565_s18, %s9823_s18  }
   0x7   : > { %s5590_s24 = sadd.s32 1, %s5515_s21   ;;  %s29_s25 = sadd.s32 1, %s5511_s20 }
   0x8   : > { %s26_s26 = ssub.s32 %s5515_s21, %s5590_s24  ;;  %p36_p0 = scmp.ne.s32.totalorder %s5511_s20, %s5507_s19 }
   0x9   : > { %p27_p1 = scmp.eq.s32.totalorder %s26_s26, 0  ;;  %p37_p2 = scmp.eq.s32.totalorder %s5515_s21, 0 }
   0xa   : > { %p42_p3 = scmp.ne.s32.totalorder %s5507_s19, %s5503_s18  ;;  %p43_p4 = scmp.eq.s32.totalorder %s5586_s22, 0 }
   0xb   : > { %s5602_s27 = scalar_select %p27_p1, %s5511_s20, %s29_s25  }
   0xc   : > { %p5604_p5 = por %p37_p2, %p36_p0  ;;  %p5610_p6 = por %p43_p4, %p42_p3 }
   0xd   : > { %p150_p7 = scmp.eq.s32.totalorder %s5586_s22, 1  ;;  %p156_p8 = scmp.eq.s32.totalorder %s4539_s23, 1 }
   0xe   : > { %s9550_s29 = scalar_select %p5610_p6, 1, 0 }
   0xf   : > { %p4540_p9 = scmp.ge.s32.totalorder %s5515_s21, 1  ;;  %p163_p10 = scmp.lt.s32.totalorder %s5515_s21, 3 }
  0x10   : > { %p5617_p11 = por %p150_p7, %p36_p0  ;;  %p5621_p12 = por %p156_p8, %p42_p3 }
  0x11   : > { %p5625_p13 = pnand %p4540_p9, %p163_p10  ;;  %s5517_s8 = smov [#allocation5]  }
  0x12   : > { %s9551_s30 = scalar_select %p5617_p11, 1, 0 }
  0x13   : > { %s9552_s6 = scalar_select %p5621_p12, 1, 0 }
  0x14   : > { %p5141_p1 = pneg %p5625_p13  ;;  %s175_s9 = sshll.u32 %s5517_s8, 4  ;;  %s176_s9 = int_to_ptr.vmem [resolvable:$true] %s175_s9 }
  0x15   : > { %s5406_s10 = scalar_lea.vmem %s176_s9, 6144  ;;  %p5414_p8 = scmp.lt.s32.totalorder %s176_s9, %s176_s9 }
  0x16   : > { %p5142_p2 = pnand %p5141_p1, %p43_p4  ;;  %p5407_p7 = scmp.ne.s32.totalorder %s176_s9, %s5406_s10 }
  0x17   : > { %p5415_p6 = scmp.lt.s32.totalorder %s5406_s10, %s5406_s10 }
  0x18   : > { %p5397_p0 = pneg %p5142_p2 }
  0x19   : > { %p5416_p12 = por %p5415_p6, %p5414_p8 }
  0x1a   : > { %p5409_p11 = pnand %p5407_p7, %p5397_p0 }
  0x1c   : > { %p5410_p3 = pneg %p5409_p11 }
  0x1e   : > { %p5417_p9 = pnand %p5416_p12, %p5410_p3 }
  0x20   : > { %5420 = shalt.err (!%p5417_p9)
}
  0x21   : > { %s5518_s11 = smov 384   ;;  %s5519_s12 = smov 24  }
  0x22   : > { %5144 = dma.hbm_to_vmem [thread:$0]  (!%p5142_p2), %s9403_s1, 6144, %s176_s9, [#allocation6], %s5518_s11, %s5518_s11, %s5519_s12  }
  0x23   : > { %p9410_p10 = scmp.ge.s32.totalorder %s5515_s21, 2 }
  0x25   : > { %194 = sbr.rel (%p9410_p10) target bundleno = 74 (0x4a), region = 32 }
  0x2a   : > { %197 = sbr.rel (!%p5604_p5) target bundleno = 74 (0x4a), region = 36  ;;  %s198_s15 = sand.u32 (%p5604_p5), 1, %s5511_s20  }
  0x2b   : > { %s4544_s16 = sshll.u32 (%p5604_p5), %s5515_s21, 4  ;;  %s4543_s17 = sshll.u32 (%p5604_p5), %s198_s15, 7 }
  0x2c   : > { %s204_s23 = ssub.s32 (%p5604_p5), 25, %s4544_s16  ;;  %s5646_s8 = scalar_lea.sflag (%p5604_p5), [#allocation3], %s198_s15 }
  0x2d   : > { %p205_p6 = scmp.lt.s32.totalorder (%p5604_p5), %s204_s23, 16  ;;  %s202_s9 = scalar_lea.vmem (%p5604_p5), [#allocation2], %s4543_s17 }
  0x2f   : > { %s9828_s23 = smov (!%p205_p6, %s204_s23), 16 }
  0x30   : > { %s5643_s25 = sshll.u32 %s9828_s23, 7 }
  0x31   : > { %s209_s26 = ssub.s32 2048, %s5643_s25 }
  0x32   : > { %210 = vsyncadd %s5646_s8, %s209_s26  ;;  %p4546_p5 = scmp.ne.s32.totalorder %s5643_s25, 0  ;;  %s4689_s28 = sshll.u32 %s5515_s21, 11 }
  0x33   : > { %s5654_s12 = scalar_lea.hbm %s9402_s0, %s4689_s28  ;;  %s215_s13 = sshll.u32 %s202_s9, 4  ;;  %s5656_s13 = int_to_ptr.vmem [resolvable:$true] %s215_s13 }
  0x34   : > { %s5421_s14 = scalar_lea.hbm %s5654_s12, %s5643_s25  ;;  %s5425_s17 = scalar_lea.hbm %s9402_s0, 3200 }
  0x35   : > { %p5422_p11 = scmp.ne.s32.totalorder %s5654_s12, %s5421_s14  ;;  %p5426_p2 = scmp.lt.s32.totalorder %s5654_s12, %s9402_s0 }
  0x36   : > { %p5427_p0 = scmp.lt.s32.totalorder %s5425_s17, %s5421_s14 }
  0x37   : > { %p5423_p12 = pnand %p5422_p11, %p4546_p5 }
  0x38   : > { %p5428_p7 = por %p5427_p0, %p5426_p2 }
  0x39   : > { %p5424_p1 = pneg %p5423_p12 }
  0x3b   : > { %p5429_p3 = pnand %p5428_p7, %p5424_p1 }
  0x3d   : > { %5432 = shalt.err (!%p5429_p3)
}
  0x3e   : > { %s5433_s9 = scalar_lea.vmem %s5656_s13, %s5643_s25  ;;  %s5520_s28 = smov [#allocation2]  }
  0x3f   : > { %p5434_p8 = scmp.ne.s32.totalorder %s5656_s13, %s5433_s9  ;;  %s5437_s10 = sshll.u32 %s5520_s28, 4  ;;  %s5438_s10 = int_to_ptr.vmem [resolvable:$false] %s5437_s10 }
  0x40   : > { %s5439_s11 = scalar_lea.vmem %s5438_s10, 4096  ;;  %p5440_p11 = scmp.lt.s32.totalorder %s5656_s13, %s5438_s10 }
  0x41   : > { %p5435_p9 = pnand %p5434_p8, %p4546_p5  ;;  %p5441_p12 = scmp.lt.s32.totalorder %s5439_s11, %s5433_s9 }
  0x43   : > { %p5436_p6 = pneg %p5435_p9  ;;  %p5442_p10 = por %p5441_p12, %p5440_p11 }
  0x45   : > { %p5443_p2 = pnand %p5442_p10, %p5436_p6 }
  0x47   : > { %5446 = shalt.err (!%p5443_p2)
}
  0x48   : > { %s5521_s14 = smov 128   ;;  %s5522_s15 = smov 8  }
  0x49   : > { %221 = dma.hbm_to_vmem [thread:$0]  (%p4546_p5), %s5654_s12, %s5643_s25, %s5656_s13, %s5646_s8, %s5521_s14, %s5521_s14, %s5522_s15  }
  0x4a PF: > { %227 = sbr.rel (%p5625_p13) target bundleno = 1928 (0x788), region = 40 }
  0x4f   : > { %s5685_s16 = sand.u32 1, %s5507_s19   ;;  %p9554_p10 = scmp.ne.s32.totalorder %s9550_s29, 0 }
  0x50   : > { %s4551_s17 = sshll.u32 %s5685_s16, 7  ;;  %s230_s23 = scalar_lea.sflag [#allocation3], %s5685_s16 }
  0x51   : > { %s5689_s26 = scalar_lea.vmem [#allocation2], %s4551_s17 }
  0x52   : > { %5490 = dma.done.wait (%p9554_p10), %s230_s23, 2048  }
  0x53   : > { %5492 = vsyncadd (%p9554_p10), %s230_s23, 4294965248 }
  0x54   : > { %5494 = dma.done.wait (%p43_p4), [#allocation6], 6144  }
  0x55   : > { %5496 = vsyncadd (%p43_p4), [#allocation6], 4294961152  ;;  %v476_v0 = vld [vmem:[#allocation5 + $0x170] sm:$0xff]  ;;  %v475_v1 = vld [vmem:[#allocation5 + $0x158] sm:$0xff]  ;;  %s5530_s10 = smov 64   ;;  %s5531_s15 = smov 32  }
  0x56   : > { %4859 = vmatprep.subr.mxu1 %v476_v0  ;;  %v474_v2 = vld [vmem:[#allocation5 + $0x140] sm:$0xff]  ;;  %v473_v3 = vld [vmem:[#allocation5 + $0x128] sm:$0xff]  ;;  %v472_v5 = vld [vmem:[#allocation5 + $0x110] sm:$0xff]  ;;  %s4553_s7 = sshll.u32 %s5685_s16, 2  ;;  %s4686_s25 = sshll.u32 %s5586_s22, 6 }
  0x57   : > { %4860 = vmatpush3.msra.mxu1 %v476_v0  ;;  %v277_v4 = vld [vmem:[%s5689_s26] sm:$0xff]  ;;  %v471_v6 = vld [vmem:[#allocation5 + $0xf8] sm:$0xff]  ;;  %v308_v8 = vld [vmem:[#allocation5 + $0x168] sm:$0xff]  ;;  %s263_s8 = scalar_lea.vmem [#allocation7], %s4553_s7  ;;  %s9365_s28 = scalar_lea.hbm %s9407_s5, %s4686_s25 }
  0x58   : > { %4861 = vmatprep.subr.mxu1 %v475_v1  ;;  %4891 = vmatprep.mubr.f32.mxu1 %v277_v4  ;;  %v470_v7 = vld [vmem:[#allocation5 + $0xe0] sm:$0xff]  ;;  %v307_v9 = vld [vmem:[#allocation5 + $0x150] sm:$0xff]  ;;  %v469_v10 = vld [vmem:[#allocation5 + $0xc8] sm:$0xff]  ;;  %s4459_s12 = sshll.u32 %s263_s8, 4  ;;  %p9820_p13 = scmp.ne.s32.totalorder %s9551_s30, 0  ;;  %s4460_s12 = int_to_ptr.vmem [resolvable:$true] %s4459_s12 }
  0x59   : > { %4862 = vmatpush3.msra.mxu1 %v475_v1  ;;  %4835 = vmatprep.mubr.f32.mxu0 %v277_v4  ;;  %v306_v11 = vld [vmem:[#allocation5 + $0x138] sm:$0xff]  ;;  %v468_v12 = vld [vmem:[#allocation5 + $0xb0] sm:$0xff]  ;;  %v305_v13 = vld [vmem:[#allocation5 + $0x120] sm:$0xff]  ;;  %s5447_s11 = scalar_lea.vmem %s4460_s12, 64  ;;  %s5534_s14 = smov [#allocation7]  }
  0x5a   : > { %4863 = vmatprep.subr.mxu1 %v474_v2  ;;  %4803 = vmatprep.subr.mxu0 %v308_v8  ;;  %v467_v14 = vld [vmem:[#allocation5 + $0x98] sm:$0xff]  ;;  %v304_v15 = vld [vmem:[#allocation5 + $0x108] sm:$0xff]  ;;  %v466_v16 = vld [vmem:[#allocation5 + $0x80] sm:$0xff]  ;;  %p5448_p4 = scmp.ne.s32.totalorder %s4460_s12, %s5447_s11  ;;  %s5451_s22 = sshll.u32 %s5534_s14, 4  ;;  %s5452_s22 = int_to_ptr.vmem [resolvable:$false] %s5451_s22 }
  0x5b   : > { %4864 = vmatpush3.msra.mxu1 %v474_v2  ;;  %4804 = vmatpush3.msra.mxu0 %v308_v8  ;;  %v303_v17 = vld [vmem:[#allocation5 + $0xf0] sm:$0xff]  ;;  %v465_v18 = vld [vmem:[#allocation5 + $0x68] sm:$0xff]  ;;  %v302_v19 = vld [vmem:[#allocation5 + $0xd8] sm:$0xff]  ;;  %p5454_p0 = scmp.lt.s32.totalorder %s4460_s12, %s5452_s22 }
  0x5c   : > { %4865 = vmatprep.subr.mxu1 %v473_v3  ;;  %4805 = vmatprep.subr.mxu0 %v307_v9  ;;  %v464_v20 = vld [vmem:[#allocation5 + $0x50] sm:$0xff]  ;;  %v301_v21 = vld [vmem:[#allocation5 + $0xc0] sm:$0xff]  ;;  %v463_v22 = vld [vmem:[#allocation5 + $0x38] sm:$0xff]  ;;  %p5449_p5 = pnand %p5448_p4, %p9820_p13 }
  0x5d   : > { %4866 = vmatpush3.msra.mxu1 %v473_v3  ;;  %4806 = vmatpush3.msra.mxu0 %v307_v9  ;;  %v300_v23 = vld [vmem:[#allocation5 + $0xa8] sm:$0xff]  ;;  %v462_v24 = vld [vmem:[#allocation5 + $0x20] sm:$0xff]  ;;  %v299_v25 = vld [vmem:[#allocation5 + $0x90] sm:$0xff] }
  0x5e   : > { %4867 = vmatprep.subr.mxu1 %v472_v5  ;;  %4807 = vmatprep.subr.mxu0 %v306_v11  ;;  %v461_v26 = vld [vmem:[#allocation5 + $0x8] sm:$0xff]  ;;  %v298_v27 = vld [vmem:[#allocation5 + $0x78] sm:$0xff]  ;;  %v297_v29 = vld [vmem:[#allocation5 + $0x60] sm:$0xff]  ;;  %p5450_p1 = pneg %p5449_p5 }
  0x5f   : > { %4868 = vmatpush3.msra.mxu1 %v472_v5  ;;  %4808 = vmatpush3.msra.mxu0 %v306_v11  ;;  %v278_v28 = vld [vmem:[%s5689_s26 + $0x8] sm:$0xff]  ;;  %v279_v30 = vld [vmem:[%s5689_s26 + $0x10] sm:$0xff]  ;;  %v280_v32 = vld [vmem:[%s5689_s26 + $0x18] sm:$0xff] }
  0x60   : > { %4869 = vmatprep.subr.mxu1 %v471_v6  ;;  %4809 = vmatprep.subr.mxu0 %v305_v13  ;;  %v296_v31 = vld [vmem:[#allocation5 + $0x48] sm:$0xff]  ;;  %v295_v33 = vld [vmem:[#allocation5 + $0x30] sm:$0xff]  ;;  %v281_v34 = vld [vmem:[%s5689_s26 + $0x20] sm:$0xff] }
  0x61   : > { %4870 = vmatpush3.msra.mxu1 %v471_v6  ;;  %4810 = vmatpush3.msra.mxu0 %v305_v13  ;;  %v294_v35 = vld [vmem:[#allocation5 + $0x18] sm:$0xff]  ;;  %v282_v36 = vld [vmem:[%s5689_s26 + $0x28] sm:$0xff]  ;;  %v293_v37 = vld [vmem:[#allocation5] sm:$0xff] }
  0x62   : > { %4871 = vmatprep.subr.mxu1 %v470_v7  ;;  %4811 = vmatprep.subr.mxu0 %v304_v15  ;;  %v283_v38 = vld [vmem:[%s5689_s26 + $0x30] sm:$0xff]  ;;  %v284_v39 = vld [vmem:[%s5689_s26 + $0x38] sm:$0xff]  ;;  %v285_v40 = vld [vmem:[%s5689_s26 + $0x40] sm:$0xff] }
  0x63   : > { %4872 = vmatpush3.msra.mxu1 %v470_v7  ;;  %4812 = vmatpush3.msra.mxu0 %v304_v15  ;;  %v286_v41 = vld [vmem:[%s5689_s26 + $0x48] sm:$0xff]  ;;  %v287_v42 = vld [vmem:[%s5689_s26 + $0x50] sm:$0xff]  ;;  %v288_v43 = vld [vmem:[%s5689_s26 + $0x58] sm:$0xff] }
  0x64   : > { %4873 = vmatprep.subr.mxu1 %v469_v10  ;;  %4813 = vmatprep.subr.mxu0 %v303_v17  ;;  %v289_v44 = vld [vmem:[%s5689_s26 + $0x60] sm:$0xff]  ;;  %v290_v45 = vld [vmem:[%s5689_s26 + $0x68] sm:$0xff]  ;;  %v291_v46 = vld [vmem:[%s5689_s26 + $0x70] sm:$0xff] }
  0x65   : > { %4874 = vmatpush3.msra.mxu1 %v469_v10  ;;  %4814 = vmatpush3.msra.mxu0 %v303_v17  ;;  %v292_v47 = vld [vmem:[%s5689_s26 + $0x78] sm:$0xff]  ;;  %v5718_v48 = vld [vmem:[%s9404_s2 + $0x1] ss:$0 sm:$0xff] }
  0x66   : > { %4875 = vmatprep.subr.mxu1 %v468_v12  ;;  %4815 = vmatprep.subr.mxu0 %v302_v19 }
  0x67   : > { %4876 = vmatpush3.msra.mxu1 %v468_v12  ;;  %4816 = vmatpush3.msra.mxu0 %v302_v19 }
  0x68   : > { %4877 = vmatprep.subr.mxu1 %v467_v14  ;;  %4817 = vmatprep.subr.mxu0 %v301_v21 }
  0x69   : > { %4878 = vmatpush3.msra.mxu1 %v467_v14  ;;  %4818 = vmatpush3.msra.mxu0 %v301_v21 }
  0x6a   : > { %4879 = vmatprep.subr.mxu1 %v466_v16  ;;  %4819 = vmatprep.subr.mxu0 %v300_v23 }
  0x6b   : > { %4880 = vmatpush3.msra.mxu1 %v466_v16  ;;  %4820 = vmatpush3.msra.mxu0 %v300_v23 }
  0x6c   : > { %4881 = vmatprep.subr.mxu1 %v465_v18  ;;  %4821 = vmatprep.subr.mxu0 %v299_v25 }
  0x6d   : > { %4882 = vmatpush3.msra.mxu1 %v465_v18  ;;  %4822 = vmatpush3.msra.mxu0 %v299_v25 }
  0x6e   : > { %4883 = vmatprep.subr.mxu1 %v464_v20  ;;  %4823 = vmatprep.subr.mxu0 %v298_v27 }
  0x6f   : > { %4884 = vmatpush3.msra.mxu1 %v464_v20  ;;  %4824 = vmatpush3.msra.mxu0 %v298_v27  ;;  %v9428_v20 = vmov 683565275  }
  0x70   : > { %4885 = vmatprep.subr.mxu1 %v463_v22  ;;  %4825 = vmatprep.subr.mxu0 %v297_v29 }
  0x71   : > { %4886 = vmatpush3.msra.mxu1 %v463_v22  ;;  %4826 = vmatpush3.msra.mxu0 %v297_v29  ;;  %v9424_v22 = vmov 2475754826  }
  0x72   : > { %4887 = vmatprep.subr.mxu1 %v462_v24  ;;  %4827 = vmatprep.subr.mxu0 %v296_v31 }
  0x73   : > { %4888 = vmatpush3.msra.mxu1 %v462_v24  ;;  %4828 = vmatpush3.msra.mxu0 %v296_v31  ;;  %v9422_v24 = vmov 2131351028  }
  0x74   : > { %4889 = vmatprep.subr.mxu1 %v461_v26  ;;  %4829 = vmatprep.subr.mxu0 %v295_v33 }
  0x75   : > { %4890 = vmatpush3.msra.mxu1 %v461_v26  ;;  %4830 = vmatpush3.msra.mxu0 %v295_v33  ;;  %v9419_v26 = vmov 2102212464  }
  0x76   : > { %4892 = vmatmul.mubr.f32.vlgmr.msra.gmra.mxu1 %v278_v28  ;;  %4831 = vmatprep.subr.mxu0 %v294_v35 }
  0x77   : > { %4894 = vmatprep.mubr.f32.mxu1 %v279_v30  ;;  %4832 = vmatpush3.msra.mxu0 %v294_v35  ;;  %v9426_v35 = vmov 1326507024  }
  0x78   : > { %4833 = vmatprep.subr.mxu0 %v293_v37 }
  0x79   : > { %4834 = vmatpush3.msra.mxu0 %v293_v37 }
  0x7a   : > { %4895 = vmatmul.mubr.f32.gmra.mxu1 %v280_v32  ;;  %4836 = vmatmul.mubr.f32.vlgmr.msra.gmra.mxu0 %v278_v28  ;;  %v9417_v28 = vmov 920167782  }
  0x7b   : > { %4897 = vmatprep.mubr.f32.mxu1 %v281_v34  ;;  %4838 = vmatprep.mubr.f32.mxu0 %v279_v30 }
  0x7e   : > { %4898 = vmatmul.mubr.f32.gmra.mxu1 %v282_v36  ;;  %4839 = vmatmul.mubr.f32.gmra.mxu0 %v280_v32 }
  0x7f   : > { %4900 = vmatprep.mubr.f32.mxu1 %v283_v38  ;;  %4841 = vmatprep.mubr.f32.mxu0 %v281_v34 }
  0x82   : > { %4901 = vmatmul.mubr.f32.gmra.mxu1 %v284_v39  ;;  %4842 = vmatmul.mubr.f32.gmra.mxu0 %v282_v36 }
  0x83   : > { %4903 = vmatprep.mubr.f32.mxu1 %v285_v40  ;;  %4844 = vmatprep.mubr.f32.mxu0 %v283_v38 }
  0x86   : > { %4904 = vmatmul.mubr.f32.gmra.mxu1 %v286_v41  ;;  %4845 = vmatmul.mubr.f32.gmra.mxu0 %v284_v39 }
  0x87   : > { %4906 = vmatprep.mubr.f32.mxu1 %v287_v42  ;;  %4847 = vmatprep.mubr.f32.mxu0 %v285_v40 }
  0x8a   : > { %4907 = vmatmul.mubr.f32.gmra.mxu1 %v288_v43  ;;  %4848 = vmatmul.mubr.f32.gmra.mxu0 %v286_v41 }
  0x8b   : > { %4909 = vmatprep.mubr.f32.mxu1 %v289_v44  ;;  %4850 = vmatprep.mubr.f32.mxu0 %v287_v42 }
  0x8e   : > { %4910 = vmatmul.mubr.f32.gmra.mxu1 %v290_v45  ;;  %4851 = vmatmul.mubr.f32.gmra.mxu0 %v288_v43 }
  0x8f   : > { %4912 = vmatprep.mubr.f32.mxu1 %v291_v46  ;;  %4853 = vmatprep.mubr.f32.mxu0 %v289_v44 }
  0x92   : > { %4913 = vmatmul.mubr.f32.gmra.mxu1 %v292_v47  ;;  %4854 = vmatmul.mubr.f32.gmra.mxu0 %v290_v45 }
  0x93   : > { %4856 = vmatprep.mubr.f32.mxu0 %v291_v46 }
  0x96   : > { %4857 = vmatmul.mubr.f32.gmra.mxu0 %v292_v47 }
 0x136   : > { %v4893_v49 = vpop.f32.mrf.mxu1 }
 0x137   : > { %v5721_v50 = vadd.f32 %v4893_v49, %v5718_v48 }
 0x138   : > { %v550_v51 = vpop.f32.mrf.mxu1 }
 0x139   : > { %v765_v52 = vand.u32 2147483647, %v5721_v50  ;;  %v768_v53 = vand.u32 2139095040, %v5721_v50  ;;  %v5726_v54 = vadd.f32 %v5718_v48, %v550_v51 }
 0x13a   : > { %v4896_v55 = vpop.f32.mrf.mxu1 }
 0x13b   : > { %v769_v56 = vshrl.u32 %v768_v53, 23  ;;  %v772_v57 = vand.u32 8388607, %v765_v52  ;;  %v9412_v58 = vand.u32 2147483647, %v5726_v54  ;;  %v664_v59 = vand.u32 2139095040, %v5726_v54 }
 0x13c   : > { %v5733_v60 = vadd.f32 %v4896_v55, %v5718_v48  ;;  %v560_v62 = vpop.f32.mrf.mxu1 }
 0x13d   : > { %v4560_v61 = vadd.s32 4294967169, %v769_v56  ;;  %v665_v63 = vshrl.u32 %v664_v59, 23  ;;  %v668_v0 = vand.u32 8388607, %v9412_v58  ;;  %v773_v2 = vor.u32 8388608, %v772_v57 }
 0x13e   : > { %v973_v1 = vand.u32 2147483647, %v5733_v60  ;;  %v976_v4 = vand.u32 2139095040, %v5733_v60  ;;  %v5744_v8 = vadd.f32 %v5718_v48, %v560_v62 }
 0x13f   : > { %v775_v3 = vadd.s32 1, %v4560_v61  ;;  %v4556_v5 = vadd.s32 4294967169, %v665_v63  ;;  %v669_v6 = vor.u32 8388608, %v668_v0  ;;  %v5746_v14 = vshll.u32 %v773_v2, 8 }
 0x140   : > { %v5741_v7 = vand.u32 8388607, %v973_v1  ;;  %v977_v9 = vshrl.u32 %v976_v4, 23  ;;  %v872_v18 = vand.u32 2139095040, %v5744_v8 }
 0x141   : > { %vm776_vm0 = vcmp.gt.s32.totalorder %v775_v3, 0  ;;  %v671_v11 = vadd.s32 1, %v4556_v5  ;;  %v5748_v15 = vshll.u32 %v669_v6, 8 }
 0x142   : > { %v777_v10 = vsel %vm776_vm0, %v775_v3, 0  ;;  %v5750_v16 = vadd.s32 4294967169, %v977_v9  ;;  %v981_v17 = vor.u32 8388608, %v5741_v7 }
 0x143   : > { %v778_v12 = vshrl.u32 %v777_v10, 5  ;;  %v779_v13 = vand.u32 31, %v777_v10  ;;  %vm672_vm1 = vcmp.gt.s32.totalorder %v671_v11, 0 }
 0x144   : > { %v673_v40 = vsel %vm672_vm1, %v671_v11, 0 }
 0x145   : > { %v780_v19 = vsub.s32 32, %v779_v13  ;;  %v782_v21 = vshll.u32 %v9428_v20, %v779_v13  ;;  %v785_v23 = vshll.u32 %v9424_v22, %v779_v13  ;;  %v788_v25 = vshll.u32 %v9422_v24, %v779_v13 }
 0x146   : > { %v791_v27 = vshll.u32 %v9419_v26, %v779_v13  ;;  %v794_v29 = vshll.u32 %v9417_v28, %v779_v13  ;;  %vm797_vm2 = vcmp.lt.s32.totalorder %v778_v12, 1  ;;  %vm798_vm3 = vcmp.lt.s32.totalorder %v778_v12, 2 }
 0x147   : > { %v783_v30 = vshrl.u32 %v9424_v22, %v780_v19  ;;  %v786_v31 = vshrl.u32 %v9422_v24, %v780_v19  ;;  %v789_v32 = vshrl.u32 %v9419_v26, %v780_v19  ;;  %v781_v33 = vshrl.u32 %v9428_v20, %v780_v19 }
 0x148   : > { %v792_v34 = vshrl.u32 %v9417_v28, %v780_v19  ;;  %v795_v36 = vshrl.u32 %v9426_v35, %v780_v19  ;;  %vm799_vm4 = vcmp.lt.s32.totalorder %v778_v12, 3  ;;  %vm800_vm5 = vcmp.lt.s32.totalorder %v778_v12, 4 }
 0x149   : > { %v784_v37 = vor.u32 %v783_v30, %v782_v21  ;;  %v787_v38 = vor.u32 %v786_v31, %v785_v23  ;;  %v790_v39 = vor.u32 %v789_v32, %v788_v25  ;;  %v675_v43 = vand.u32 31, %v673_v40 }
 0x14a   : > { %v793_v41 = vor.u32 %v792_v34, %v791_v27  ;;  %v796_v42 = vor.u32 %v795_v36, %v794_v29  ;;  %v674_v61 = vshrl.u32 %v673_v40, 5 }
 0x14b   : > { %v801_v44 = vsel %vm797_vm2, %v781_v33, %v784_v37  ;;  %v802_v45 = vsel %vm800_vm5, %v790_v39, 2102212464  ;;  %v805_v46 = vsel %vm797_vm2, %v784_v37, %v787_v38  ;;  %v809_v47 = vsel %vm797_vm2, %v787_v38, %v790_v39 }
 0x14c   : > { %v803_v49 = vsel %vm799_vm4, %v787_v38, %v802_v45  ;;  %v806_v51 = vsel %vm800_vm5, %v793_v41, 920167782  ;;  %v810_v53 = vsel %vm800_vm5, %v796_v42, 1326507024  ;;  %v676_v55 = vsub.s32 32, %v675_v43 }
 0x14d   : > { %v804_v56 = vsel %vm798_vm3, %v801_v44, %v803_v49  ;;  %v807_v57 = vsel %vm799_vm4, %v790_v39, %v806_v51  ;;  %v811_v59 = vsel %vm799_vm4, %v793_v41, %v810_v53  ;;  %v678_v2 = vshll.u32 %v9428_v20, %v675_v43 }
 0x14e   : > { %v808_v62 = vsel %vm798_vm3, %v805_v46, %v807_v57  ;;  %v812_v63 = vsel %vm798_vm3, %v809_v47, %v811_v59  ;;  %v820_v0 = vmul.u32 %v5746_v14, %v804_v56  ;;  %v677_v9 = vshrl.u32 %v9428_v20, %v676_v55 }
 0x14f   : > { %v5778_v3 = vmul.u32.u64.low %v5746_v14, %v812_v63  ;;  %v5779_v4 = vmul.u32.u64.high %v5746_v14, %v812_v63, %v5778_v3  ;;  %v5782_v5 = vmul.u32.u64.low %v5746_v14, %v808_v62  ;;  %v5783_v6 = vmul.u32.u64.high %v5746_v14, %v808_v62, %v5782_v5 }
 0x150   : > { %v679_v10 = vshrl.u32 %v9424_v22, %v676_v55  ;;  %v681_v11 = vshll.u32 %v9424_v22, %v675_v43  ;;  %v682_v12 = vshrl.u32 %v9422_v24, %v676_v55  ;;  %v684_v13 = vshll.u32 %v9422_v24, %v675_v43 }
 0x151   : > { %v685_v19 = vshrl.u32 %v9419_v26, %v676_v55  ;;  %v687_v21 = vshll.u32 %v9419_v26, %v675_v43  ;;  %v688_v23 = vshrl.u32 %v9417_v28, %v676_v55  ;;  %v690_v27 = vshll.u32 %v9417_v28, %v675_v43 }
 0x152   : > { %v680_v25 = vor.u32 %v679_v10, %v678_v2  ;;  %v683_v14 = vor.u32 %v682_v12, %v681_v11  ;;  %v691_v29 = vshrl.u32 %v9426_v35, %v676_v55  ;;  %vm822_vm6 = vc.u32 %v5779_v4, %v5782_v5 }
 0x153   : > { %v823_v30 = vadd.s32 1, %v5783_v6  ;;  %v686_v31 = vor.u32 %v685_v19, %v684_v13  ;;  %vm693_vm7 = vcmp.lt.s32.totalorder %v674_v61, 1  ;;  %v689_v32 = vor.u32 %v688_v23, %v687_v21 }
 0x154   : > { %v692_v33 = vor.u32 %v691_v29, %v690_v27  ;;  %vm694_vm8 = vcmp.lt.s32.totalorder %v674_v61, 2  ;;  %vm695_vm9 = vcmp.lt.s32.totalorder %v674_v61, 3  ;;  %vm696_vm10 = vcmp.lt.s32.totalorder %v674_v61, 4 }
 0x155   : > { %v824_v34 = vsel %vm822_vm6, %v823_v30, %v5783_v6  ;;  %v697_v36 = vsel %vm693_vm7, %v677_v9, %v680_v25  ;;  %v701_v37 = vsel %vm693_vm7, %v680_v25, %v683_v14  ;;  %v698_v39 = vsel %vm696_vm10, %v686_v31, 2102212464 }
 0x156   : > { %v825_v38 = vadd.s32 %v824_v34, %v820_v0  ;;  %v702_v40 = vsel %vm696_vm10, %v689_v32, 920167782  ;;  %v705_v41 = vsel %vm693_vm7, %v683_v14, %v686_v31  ;;  %v699_v42 = vsel %vm695_vm9, %v683_v14, %v698_v39 }
 0x157   : > { %v703_v43 = vsel %vm695_vm9, %v686_v31, %v702_v40  ;;  %v706_v44 = vsel %vm696_vm10, %v692_v33, 1326507024  ;;  %v983_v45 = vadd.s32 1, %v5750_v16  ;;  %v873_v51 = vshrl.u32 %v872_v18, 23 }
 0x158   : > { %v826_v46 = vadd.s32 536870912, %v825_v38  ;;  %v704_v47 = vsel %vm694_vm8, %v701_v37, %v703_v43  ;;  %v707_v49 = vsel %vm695_vm9, %v689_v32, %v706_v44  ;;  %v700_v53 = vsel %vm694_vm8, %v697_v36, %v699_v42 }
 0x159   : > { %v708_v55 = vsel %vm694_vm8, %v705_v41, %v707_v49  ;;  %v5807_v56 = vmul.u32.u64.low %v5748_v15, %v704_v47  ;;  %v5808_v57 = vmul.u32.u64.high %v5748_v15, %v704_v47, %v5807_v56  ;;  %vm984_vm11 = vcmp.gt.s32.totalorder %v983_v45, 0 }
 0x15a   : > { %v5811_v59 = vshrl.u32 %v826_v46, 30  ;;  %v5814_v16 = vmul.u32.u64.low %v5748_v15, %v708_v55  ;;  %v5815_v62 = vmul.u32.u64.high %v5748_v15, %v708_v55, %v5814_v16  ;;  %v985_v63 = vsel %vm984_vm11, %v983_v45, 0 }
 0x15b   : > { %v987_v18 = vand.u32 31, %v985_v63  ;;  %v716_v2 = vmul.u32 %v5748_v15, %v700_v53  ;;  %v719_v61 = vadd.s32 1, %v5808_v57  ;;  %v5822_v3 = vshll.u32 %v981_v17, 8 }
 0x15c   : > { %v828_v0 = vshll.u32 %v5811_v59, 30  ;;  %v9411_v6 = vand.u32 2147483647, %v5744_v8  ;;  %vm718_vm12 = vc.u32 %v5815_v62, %v5807_v56  ;;  %v4564_v11 = vadd.s32 4294967169, %v873_v51 }
 0x15d   : > { %v988_v10 = vsub.s32 32, %v987_v18  ;;  %v720_v12 = vsel %vm718_vm12, %v719_v61, %v5808_v57  ;;  %v986_v13 = vshrl.u32 %v985_v63, 5  ;;  %v990_v15 = vshll.u32 %v9428_v20, %v987_v18 }
 0x15e   : > { %v5825_v9 = vsub.s32 %v825_v38, %v828_v0  ;;  %v993_v19 = vshll.u32 %v9424_v22, %v987_v18  ;;  %v721_v17 = vadd.s32 %v720_v12, %v716_v2  ;;  %v996_v23 = vshll.u32 %v9422_v24, %v987_v18 }
 0x15f   : > { %v991_v21 = vshrl.u32 %v9424_v22, %v988_v10  ;;  %v994_v25 = vshrl.u32 %v9422_v24, %v988_v10  ;;  %v997_v14 = vshrl.u32 %v9419_v26, %v988_v10  ;;  %v999_v27 = vshll.u32 %v9419_v26, %v987_v18 }
 0x160   : > { %v831_v7 = vsub.s32 0, %v5825_v9  ;;  %v1000_v29 = vshrl.u32 %v9417_v28, %v988_v10  ;;  %v722_v31 = vadd.s32 536870912, %v721_v17  ;;  %v1002_v33 = vshll.u32 %v9417_v28, %v987_v18 }
 0x161   : > { %v992_v32 = vor.u32 %v991_v21, %v990_v15  ;;  %v995_v34 = vor.u32 %v994_v25, %v993_v19  ;;  %v998_v36 = vor.u32 %v997_v14, %v996_v23  ;;  %v1003_v38 = vshrl.u32 %v9426_v35, %v988_v10 }
 0x162   : > { %v4561_v30 = vmin.u32 %v831_v7, %v5825_v9  ;;  %v1001_v37 = vor.u32 %v1000_v29, %v999_v27  ;;  %v821_v39 = vadd.s32 %v5782_v5, %v5779_v4  ;;  %v5844_v41 = vshrl.u32 %v722_v31, 30 }
 0x163   : > { %v879_v42 = vadd.s32 1, %v4564_v11  ;;  %v1004_v43 = vor.u32 %v1003_v38, %v1002_v33  ;;  %vm1005_vm13 = vcmp.lt.s32.totalorder %v986_v13, 1  ;;  %vm1006_vm14 = vcmp.lt.s32.totalorder %v986_v13, 2 }
 0x164   : > { %v833_v40 = vclz %v4561_v30  ;;  %vm1007_vm15 = vcmp.lt.s32.totalorder %v986_v13, 3  ;;  %v724_v45 = vshll.u32 %v5844_v41, 30  ;;  %vm1008_vm0 = vcmp.lt.s32.totalorder %v986_v13, 4 }
 0x165   : > { %v1013_v46 = vsel %vm1005_vm13, %v992_v32, %v995_v34  ;;  %v989_v47 = vshrl.u32 %v9428_v20, %v988_v10  ;;  %v1010_v49 = vsel %vm1008_vm0, %v998_v36, 2102212464  ;;  %v1014_v51 = vsel %vm1008_vm0, %v1001_v37, 920167782 }
 0x166   : > { %v4562_v44 = vadd.s32 4294967294, %v833_v40  ;;  %v1018_v53 = vsel %vm1008_vm0, %v1004_v43, 1326507024  ;;  %v5849_v4 = vsub.s32 %v721_v17, %v724_v45  ;;  %v1015_v5 = vsel %vm1007_vm15, %v998_v36, %v1014_v51 }
 0x167   : > { %v1017_v55 = vsel %vm1005_vm13, %v995_v34, %v998_v36  ;;  %v1009_v16 = vsel %vm1005_vm13, %v989_v47, %v992_v32  ;;  %v1016_v63 = vsel %vm1006_vm14, %v1013_v46, %v1015_v5  ;;  %v1019_v0 = vsel %vm1007_vm15, %v1001_v37, %v1018_v53  ;;  %v4899_v37 = vpop.f32.mrf.mxu1 }
 0x168   : > { %vm4563_vm1 = vcmp.lt.s32.totalorder %v4562_v44, 0  ;;  %v727_v61 = vsub.s32 0, %v5849_v4  ;;  %v1011_v10 = vsel %vm1007_vm15, %v995_v34, %v1010_v49  ;;  %v1020_v11 = vsel %vm1006_vm14, %v1017_v55, %v1019_v0 }
 0x169   : > { %v836_v57 = vsel %vm4563_vm1, 0, %v4562_v44  ;;  %v5860_v12 = vmul.u32.u64.low %v5822_v3, %v1016_v63  ;;  %v5861_v15 = vmul.u32.u64.high %v5822_v3, %v1016_v63, %v5860_v12  ;;  %vm880_vm2 = vcmp.gt.s32.totalorder %v879_v42, 0 }
 0x16a   : > { %v837_v18 = vsub.s32 32, %v836_v57  ;;  %v841_v2 = vsub.s32 4294967266, %v836_v57  ;;  %v4557_v7 = vmin.u32 %v727_v61, %v5849_v4  ;;  %v881_v17 = vsel %vm880_vm2, %v879_v42, 0 }
 0x16b   : > { %v5866_v23 = vmul.u32.u64.low %v5822_v3, %v1020_v11  ;;  %v5867_v25 = vmul.u32.u64.high %v5822_v3, %v1020_v11, %v5866_v23  ;;  %v883_v14 = vand.u32 31, %v881_v17  ;;  %v1012_v30 = vsel %vm1006_vm14, %v1009_v16, %v1011_v10 }
 0x16c   : > { %v842_v19 = vadd.s32 127, %v841_v2  ;;  %v839_v21 = vshrl.u32 %v821_v39, %v837_v18  ;;  %v729_v29 = vclz %v4557_v7  ;;  %v838_v31 = vshll.u32 %v5825_v9, %v836_v57 }
 0x16d   : > { %v1031_v32 = vadd.s32 1, %v5861_v15  ;;  %v876_v33 = vand.u32 8388607, %v9411_v6  ;;  %v884_v34 = vsub.s32 32, %v883_v14  ;;  %v1028_v39 = vmul.u32 %v5822_v3, %v1012_v30 }
 0x16e   : > { %v843_v27 = vshll.u32 %v842_v19, 23  ;;  %v4558_v36 = vadd.s32 4294967294, %v729_v29  ;;  %v840_v38 = vor.u32 %v839_v21, %v838_v31  ;;  %vm1030_vm3 = vc.u32 %v5867_v25, %v5860_v12 }
 0x16f   : > { %v1032_v13 = vsel %vm1030_vm3, %v1031_v32, %v5861_v15  ;;  %v877_v43 = vor.u32 8388608, %v876_v33  ;;  %v887_v9 = vshrl.u32 %v9424_v22, %v884_v34  ;;  %v5880_v44 = vadd.f32 %v4899_v37, %v5718_v48 }
 0x170   : > { %v844_v40 = vor.u32 4788187, %v843_v27  ;;  %v1033_v42 = vadd.s32 %v1032_v13, %v1028_v39  ;;  %vm4559_vm4 = vcmp.lt.s32.totalorder %v4558_v36, 0  ;;  %v882_v45 = vshrl.u32 %v881_v17, 5 }
 0x171   : > { %9555 = vst [vmem:[#allocation11_spill] sm:$0xff] %v5880_v44  ;;  %v890_v46 = vshrl.u32 %v9422_v24, %v884_v34  ;;  %v893_v47 = vshrl.u32 %v9419_v26, %v884_v34  ;;  %v847_v3 = vcvt.s32.f32 %v840_v38  ;;  %v886_v51 = vshll.u32 %v9428_v20, %v883_v14 }
 0x172   : > { %v1034_v49 = vadd.s32 536870912, %v1033_v42  ;;  %v889_v53 = vshll.u32 %v9424_v22, %v883_v14  ;;  %v845_v5 = vand.u32 2147483647, %v844_v40  ;;  %v892_v55 = vshll.u32 %v9422_v24, %v883_v14 }
 0x173   : > { %v895_v57 = vshll.u32 %v9419_v26, %v883_v14  ;;  %v896_v16 = vshrl.u32 %v9417_v28, %v884_v34  ;;  %v5889_v63 = vsel %vm4559_vm4, 0, %v4558_v36  ;;  %v888_v18 = vor.u32 %v887_v9, %v886_v51 }
 0x174   : > { %v5891_v0 = vshrl.u32 %v1034_v49, 30  ;;  %v899_v2 = vshrl.u32 %v9426_v35, %v884_v34  ;;  %v891_v61 = vor.u32 %v890_v46, %v889_v53  ;;  %v894_v10 = vor.u32 %v893_v47, %v892_v55 }
 0x175   : > { %v897_v11 = vor.u32 %v896_v16, %v895_v57  ;;  %v898_v15 = vshll.u32 %v9417_v28, %v883_v14  ;;  %v917_v7 = vshll.u32 %v877_v43, 8  ;;  %v848_v17 = vmul.f32 %v847_v3, %v845_v5  ;;  %v570_v57 = vpop.f32.mrf.mxu1 }
 0x176   : > { %v1036_v19 = vshll.u32 %v5891_v0, 30  ;;  %v885_v21 = vshrl.u32 %v9428_v20, %v884_v34  ;;  %v1184_v27 = vand.u32 2139095040, %v5880_v44  ;;  %v737_v29 = vsub.s32 4294967266, %v5889_v63 }
 0x177   : > { %v900_v23 = vor.u32 %v899_v2, %v898_v15  ;;  %vm901_vm5 = vcmp.lt.s32.totalorder %v882_v45, 1  ;;  %vm904_vm6 = vcmp.lt.s32.totalorder %v882_v45, 4  ;;  %vm903_vm7 = vcmp.lt.s32.totalorder %v882_v45, 3 }
 0x178   : > { %v5899_v30 = vsub.s32 %v1033_v42, %v1036_v19  ;;  %v906_v31 = vsel %vm904_vm6, %v894_v10, 2102212464  ;;  %v909_v32 = vsel %vm901_vm5, %v888_v18, %v891_v61  ;;  %v910_v33 = vsel %vm904_vm6, %v897_v11, 920167782 }
 0x179   : > { %vm902_vm8 = vcmp.lt.s32.totalorder %v882_v45, 2  ;;  %v911_v36 = vsel %vm903_vm7, %v894_v10, %v910_v33  ;;  %v913_v37 = vsel %vm901_vm5, %v891_v61, %v894_v10  ;;  %v905_v38 = vsel %vm901_vm5, %v885_v21, %v888_v18 }
 0x17a   : > { %v1039_v14 = vsub.s32 0, %v5899_v30  ;;  %v907_v34 = vsel %vm903_vm7, %v891_v61, %v906_v31  ;;  %v912_v39 = vsel %vm902_vm8, %v909_v32, %v911_v36  ;;  %v914_v40 = vsel %vm904_vm6, %v900_v23, 1326507024 }
 0x17b   : > { %v915_v42 = vsel %vm903_vm7, %v897_v11, %v914_v40  ;;  %v5904_v43 = vmul.u32.u64.low %v917_v7, %v912_v39  ;;  %v5905_v9 = vmul.u32.u64.high %v917_v7, %v912_v39, %v5904_v43  ;;  %v1185_v47 = vshrl.u32 %v1184_v27, 23 }
 0x17c   : > { %v4569_v13 = vmin.u32 %v1039_v14, %v5899_v30  ;;  %v916_v46 = vsel %vm902_vm8, %v913_v37, %v915_v42  ;;  %v733_v53 = vsub.s32 32, %v5889_v63  ;;  %v908_v5 = vsel %vm902_vm8, %v905_v38, %v907_v34 }
 0x17d   : > { %v5909_v49 = vmul.u32.u64.low %v917_v7, %v916_v46  ;;  %v5910_v51 = vmul.u32.u64.high %v917_v7, %v916_v46, %v5909_v49  ;;  %v4576_v55 = vadd.s32 4294967169, %v1185_v47  ;;  %v849_v16 = vxor.u32 2147483648, %v848_v17 }
 0x17e   : > { %v1041_v3 = vclz %v4569_v13  ;;  %v738_v18 = vadd.s32 127, %v737_v29  ;;  %v927_v61 = vadd.s32 1, %v5905_v9  ;;  %vm9508_vm9 = vcmp.lt.s32.totalorder %v5721_v50, 0 }
 0x17f   : > { %v717_v10 = vadd.s32 %v5807_v56, %v5815_v62  ;;  %v9416_v11 = vand.u32 2147483647, %v5880_v44  ;;  %v1191_v15 = vadd.s32 1, %v4576_v55  ;;  %v924_v19 = vmul.u32 %v917_v7, %v908_v5 }
 0x180   : > { %v4570_v2 = vadd.s32 4294967294, %v1041_v3  ;;  %vm926_vm11 = vc.u32 %v5910_v51, %v5904_v43  ;;  %v5922_v45 = vadd.f32 %v5718_v48, %v570_v57  ;;  %v850_v29 = vsel %vm9508_vm9, %v849_v16, %v848_v17 }
 0x181   : > { %v735_v21 = vshrl.u32 %v717_v10, %v733_v53  ;;  %v928_v27 = vsel %vm926_vm11, %v927_v61, %v5905_v9  ;;  %vm1192_vm12 = vcmp.gt.s32.totalorder %v1191_v15, 0  ;;  %v739_v56 = vshll.u32 %v738_v18, 23 }
 0x182   : > { %vm4571_vm10 = vcmp.lt.s32.totalorder %v4570_v2, 0  ;;  %9556 = vst [vmem:[#allocation12_spill] sm:$0xff] %v5922_v45  ;;  %v929_v31 = vadd.s32 %v928_v27, %v924_v19  ;;  %v734_v7 = vshll.u32 %v5849_v4, %v5889_v63  ;;  %v1193_v32 = vsel %vm1192_vm12, %v1191_v15, 0 }
 0x183   : > { %v1044_v23 = vsel %vm4571_vm10, 0, %v4570_v2  ;;  %vm5931_vm13 = vcmp.le.f32.partialorder %v765_v52, 0.7853982  ;;  %v1080_v37 = vand.u32 2139095040, %v5922_v45  ;;  %v1029_v4 = vadd.s32 %v5860_v12, %v5867_v25 }
 0x184   : > { %v1049_v62 = vsub.s32 4294967266, %v1044_v23  ;;  %v930_v36 = vadd.s32 536870912, %v929_v31  ;;  %v5939_v17 = vsel %vm5931_vm13, %v5721_v50, %v850_v29  ;;  %v5941_v38 = vor.u32 %v735_v21, %v734_v7 }
 0x185   : > { %v1195_v63 = vand.u32 31, %v1193_v32  ;;  %v5945_v34 = vor.u32 4788187, %v739_v56  ;;  %v1045_v52 = vsub.s32 32, %v1044_v23  ;;  %v1188_v40 = vand.u32 8388607, %v9416_v11 }
 0x186   : > { %v1050_v14 = vadd.s32 127, %v1049_v62  ;;  %v5947_v39 = vshrl.u32 %v930_v36, 30  ;;  %v1194_v3 = vshrl.u32 %v1193_v32, 5  ;;  %v1081_v25 = vshrl.u32 %v1080_v37, 23 }
 0x187   : > { %v1196_v13 = vsub.s32 32, %v1195_v63  ;;  %v1198_v42 = vshll.u32 %v9428_v20, %v1195_v63  ;;  %v1201_v9 = vshll.u32 %v9424_v22, %v1195_v63  ;;  %v1204_v46 = vshll.u32 %v9422_v24, %v1195_v63 }
 0x188   : > { %v1051_v47 = vshll.u32 %v1050_v14, 23  ;;  %v1207_v12 = vshll.u32 %v9419_v26, %v1195_v63  ;;  %v932_v49 = vshll.u32 %v5947_v39, 30  ;;  %v1047_v57 = vshrl.u32 %v1029_v4, %v1045_v52 }
 0x189   : > { %v1199_v53 = vshrl.u32 %v9424_v22, %v1196_v13  ;;  %v1202_v5 = vshrl.u32 %v9422_v24, %v1196_v13  ;;  %v1205_v55 = vshrl.u32 %v9419_v26, %v1196_v13  ;;  %v1189_v16 = vor.u32 8388608, %v1188_v40 }
 0x18a   : > { %v1208_v18 = vshrl.u32 %v9417_v28, %v1196_v13  ;;  %v1210_v2 = vshll.u32 %v9417_v28, %v1195_v63  ;;  %v1211_v19 = vshrl.u32 %v9426_v35, %v1196_v13  ;;  %v1046_v21 = vshll.u32 %v5899_v30, %v1044_v23 }
 0x18b   : > { %v1200_v61 = vor.u32 %v1199_v53, %v1198_v42  ;;  %v1203_v10 = vor.u32 %v1202_v5, %v1201_v9  ;;  %v1206_v15 = vor.u32 %v1205_v55, %v1204_v46  ;;  %v9415_v29 = vand.u32 2147483647, %v5922_v45  ;;  %v4902_v46 = vpop.f32.mrf.mxu1 }
 0x18c   : > { %v1209_v27 = vor.u32 %v1208_v18, %v1207_v12  ;;  %v4572_v56 = vadd.s32 4294967169, %v1081_v25  ;;  %v1052_v62 = vor.u32 4788187, %v1051_v47  ;;  %v5964_v7 = vsub.s32 %v929_v31, %v932_v49 }
 0x18d   : > { %v1212_v32 = vor.u32 %v1211_v19, %v1210_v2  ;;  %vm1213_vm14 = vcmp.lt.s32.totalorder %v1194_v3, 1  ;;  %v1048_v14 = vor.u32 %v1047_v57, %v1046_v21  ;;  %v1197_v36 = vshrl.u32 %v9428_v20, %v1196_v13 }
 0x18e   : > { %vm1216_vm15 = vcmp.lt.s32.totalorder %v1194_v3, 4  ;;  %v1221_v37 = vsel %vm1213_vm14, %v1200_v61, %v1203_v10  ;;  %vm1215_vm0 = vcmp.lt.s32.totalorder %v1194_v3, 3  ;;  %v1225_v63 = vsel %vm1213_vm14, %v1203_v10, %v1206_v15 }
 0x18f   : > { %v1222_v4 = vsel %vm1216_vm15, %v1209_v27, 920167782  ;;  %v1226_v30 = vsel %vm1216_vm15, %v1212_v32, 1326507024  ;;  %vm1214_vm1 = vcmp.lt.s32.totalorder %v1194_v3, 2  ;;  %v1229_v40 = vshll.u32 %v1189_v16, 8 }
 0x190   : > { %v1218_v23 = vsel %vm1216_vm15, %v1206_v15, 2102212464  ;;  %v1223_v52 = vsel %vm1215_vm0, %v1206_v15, %v1222_v4  ;;  %v1053_v31 = vand.u32 2147483647, %v1052_v62  ;;  %v935_v42 = vsub.s32 0, %v5964_v7 }
 0x191   : > { %v1224_v9 = vsel %vm1214_vm1, %v1221_v37, %v1223_v52  ;;  %v1227_v13 = vsel %vm1215_vm0, %v1209_v27, %v1226_v30  ;;  %v741_v47 = vand.u32 2147483647, %v5945_v34  ;;  %v1055_v12 = vcvt.s32.f32 %v1048_v14 }
 0x192   : > { %v1228_v25 = vsel %vm1214_vm1, %v1225_v63, %v1227_v13  ;;  %v1087_v49 = vadd.s32 1, %v4572_v56  ;;  %v1217_v53 = vsel %vm1213_vm14, %v1197_v36, %v1200_v61  ;;  %v1219_v5 = vsel %vm1215_vm0, %v1203_v10, %v1218_v23  ;;  %v580_v61 = vpop.f32.mrf.mxu1 }
 0x193   : > { %v5977_v55 = vmul.u32.u64.low %v1229_v40, %v1228_v25  ;;  %v5978_v57 = vmul.u32.u64.high %v1229_v40, %v1228_v25, %v5977_v55  ;;  %v5980_v16 = vmul.u32.u64.low %v1229_v40, %v1224_v9  ;;  %v5981_v18 = vmul.u32.u64.high %v1229_v40, %v1224_v9, %v5980_v16 }
 0x194   : > { %v1084_v2 = vand.u32 8388607, %v9415_v29  ;;  %vm1088_vm2 = vcmp.gt.s32.totalorder %v1087_v49, 0  ;;  %v743_v34 = vcvt.s32.f32 %v5941_v38  ;;  %v1056_v15 = vmul.f32 %v1055_v12, %v1053_v31 }
 0x195   : > { %v4565_v19 = vmin.u32 %v935_v42, %v5964_v7  ;;  %v1089_v21 = vsel %vm1088_vm2, %v1087_v49, 0  ;;  %vm9477_vm3 = vcmp.lt.s32.totalorder %v5733_v60, 0  ;;  %v1220_v10 = vsel %vm1214_vm1, %v1217_v53, %v1219_v5 }
 0x196   : > { %v5991_v27 = vadd.f32 %v4902_v46, %v5718_v48  ;;  %5201 = vcosq.f32 %v5939_v17  ;;  %v5994_v56 = vmul.f32 %v743_v34, %v741_v47  ;;  %vm1238_vm4 = vc.u32 %v5978_v57, %v5980_v16 }
 0x197   : > { %v1091_v38 = vand.u32 31, %v1089_v21  ;;  %v1239_v62 = vadd.s32 1, %v5981_v18  ;;  %v1085_v32 = vor.u32 8388608, %v1084_v2  ;;  %v6001_v36 = vadd.f32 %v5718_v48, %v580_v61 }
 0x198   : > { %9559 = vst [vmem:[#allocation13_spill] sm:$0xff] %v5991_v27  ;;  %v9414_v14 = vand.u32 2147483647, %v5991_v27  ;;  %v1057_v3 = vxor.u32 2147483648, %v1056_v15  ;;  %v937_v37 = vclz %v4565_v19  ;;  %v1236_v4 = vmul.u32 %v1229_v40, %v1220_v10 }
 0x199   : > { %9560 = vst [vmem:[#allocation14_spill] sm:$0xff] %v6001_v36  ;;  %v1092_v63 = vsub.s32 32, %v1091_v38  ;;  %v1240_v30 = vsel %vm1238_vm4, %v1239_v62, %v5981_v18  ;;  %v1090_v23 = vshrl.u32 %v1089_v21, 5  ;;  %v1094_v52 = vshll.u32 %v9428_v20, %v1091_v38 }
 0x19a   : > { %v1392_v31 = vand.u32 2139095040, %v5991_v27  ;;  %v1241_v42 = vadd.s32 %v1240_v30, %v1236_v4  ;;  %v1097_v13 = vshll.u32 %v9424_v22, %v1091_v38  ;;  %v1100_v47 = vshll.u32 %v9422_v24, %v1091_v38 }
 0x19b   : > { %v1095_v9 = vshrl.u32 %v9424_v22, %v1092_v63  ;;  %v1098_v46 = vshrl.u32 %v9422_v24, %v1092_v63  ;;  %v1101_v12 = vshrl.u32 %v9419_v26, %v1092_v63  ;;  %v1103_v40 = vshll.u32 %v9419_v26, %v1091_v38 }
 0x19c   : > { %v1104_v25 = vshrl.u32 %v9417_v28, %v1092_v63  ;;  %vm6015_vm5 = vcmp.le.f32.partialorder %v973_v1, 0.7853982  ;;  %v1058_v53 = vsel %vm9477_vm3, %v1057_v3, %v1056_v15  ;;  %v1242_v5 = vadd.s32 536870912, %v1241_v42 }
 0x19d   : > { %v1096_v55 = vor.u32 %v1095_v9, %v1094_v52  ;;  %v1099_v18 = vor.u32 %v1098_v46, %v1097_v13  ;;  %v1102_v2 = vor.u32 %v1101_v12, %v1100_v47  ;;  %v1106_v19 = vshll.u32 %v9417_v28, %v1091_v38 }
 0x19e   : > { %v1105_v34 = vor.u32 %v1104_v25, %v1103_v40  ;;  %v1107_v21 = vshrl.u32 %v9426_v35, %v1092_v63  ;;  %v4566_v61 = vadd.s32 4294967294, %v937_v37  ;;  %v6023_v10 = vshrl.u32 %v1242_v5, 30 }
 0x19f   : > { %vm1109_vm6 = vcmp.lt.s32.totalorder %v1090_v23, 1  ;;  %v1393_v1 = vshrl.u32 %v1392_v31, 23  ;;  %v1093_v62 = vshrl.u32 %v9428_v20, %v1092_v63  ;;  %vm1111_vm7 = vcmp.lt.s32.totalorder %v1090_v23, 3 }
 0x1a0   : > { %9563 = vst [vmem:[#allocation15_spill] sm:$0xff] %v6023_v10  ;;  %v1108_v4 = vor.u32 %v1107_v21, %v1106_v19  ;;  %vm1112_vm8 = vcmp.lt.s32.totalorder %v1090_v23, 4  ;;  %v1244_v15 = vshll.u32 %v6023_v10, 30  ;;  %v1117_v30 = vsel %vm1109_vm6, %v1096_v55, %v1099_v18 }
 0x1a1   : > { %v1114_v3 = vsel %vm1112_vm8, %v1102_v2, 2102212464  ;;  %v1118_v52 = vsel %vm1112_vm8, %v1105_v34, 920167782  ;;  %vm1110_vm10 = vcmp.lt.s32.totalorder %v1090_v23, 2  ;;  %v1121_v9 = vsel %vm1109_vm6, %v1099_v18, %v1102_v2  ;;  %v4905_v23 = vpop.f32.mrf.mxu1 }
 0x1a2   : > { %v1119_v38 = vsel %vm1111_vm7, %v1102_v2, %v1118_v52  ;;  %v1125_v13 = vshll.u32 %v1085_v32, 8  ;;  %v6028_v37 = vsub.s32 %v1241_v42, %v1244_v15  ;;  %v1113_v46 = vsel %vm1109_vm6, %v1093_v62, %v1096_v55 }
 0x1a3   : > { %v1120_v31 = vsel %vm1110_vm10, %v1117_v30, %v1119_v38  ;;  %v1122_v47 = vsel %vm1112_vm8, %v1108_v4, 1326507024  ;;  %v6031_v63 = vpop.eup %5201  ;;  %v1115_v12 = vsel %vm1111_vm7, %v1099_v18, %v1114_v3  ;;  %5203 = vsinq.f32 %v5939_v17 }
 0x1a4   : > { %v1123_v40 = vsel %vm1111_vm7, %v1105_v34, %v1122_v47  ;;  %v6035_v25 = vmul.u32.u64.low %v1125_v13, %v1120_v31  ;;  %v6036_v5 = vmul.u32.u64.high %v1125_v13, %v1120_v31, %v6035_v25  ;;  %v1247_v32 = vsub.s32 0, %v6028_v37 }
 0x1a5   : > { %v1124_v42 = vsel %vm1110_vm10, %v1121_v9, %v1123_v40  ;;  %v4584_v55 = vadd.s32 4294967169, %v1393_v1  ;;  %v6046_v19 = vsel %vm6015_vm5, %v5733_v60, %v1058_v53  ;;  %vm4567_vm11 = vcmp.lt.s32.totalorder %v4566_v61, 0 }
 0x1a6   : > { %v6048_v18 = vmul.u32.u64.low %v1125_v13, %v1124_v42  ;;  %v6049_v34 = vmul.u32.u64.high %v1125_v13, %v1124_v42, %v6048_v18  ;;  %v4577_v21 = vmin.u32 %v1247_v32, %v6028_v37  ;;  %v1116_v17 = vsel %vm1110_vm10, %v1113_v46, %v1115_v12 }
 0x1a7   : > { %v1399_v62 = vadd.s32 1, %v4584_v55  ;;  %v6055_v4 = vadd.s32 %v5904_v43, %v5910_v51  ;;  %v1135_v1 = vadd.s32 1, %v6036_v5  ;;  %v1396_v15 = vand.u32 8388607, %v9414_v14 }
 0x1a8   : > { %v9413_v53 = vand.u32 2147483647, %v6001_v36  ;;  %5205 = vcosq.f32 %v6046_v19  ;;  %v1249_v3 = vclz %v4577_v21  ;;  %v1288_v30 = vand.u32 2139095040, %v6001_v36 }
 0x1a9   : > { %vm1400_vm12 = vcmp.gt.s32.totalorder %v1399_v62, 0  ;;  %v6063_v52 = vsel %vm4567_vm11, 0, %v4566_v61  ;;  %v1132_v38 = vmul.u32 %v1125_v13, %v1116_v17  ;;  %vm1134_vm14 = vc.u32 %v6049_v34, %v6035_v25 }
 0x1aa   : > { %v1401_v43 = vsel %vm1400_vm12, %v1399_v62, 0  ;;  %v1237_v51 = vadd.s32 %v5980_v16, %v5978_v57  ;;  %v4578_v9 = vadd.s32 4294967294, %v1249_v3  ;;  %v1136_v46 = vsel %vm1134_vm14, %v1135_v1, %v6036_v5 }
 0x1ab   : > { %v1403_v31 = vand.u32 31, %v1401_v43  ;;  %v1137_v47 = vadd.s32 %v1136_v46, %v1132_v38  ;;  %v1397_v12 = vor.u32 8388608, %v1396_v15  ;;  %v6072_v40 = vand.u32 8388607, %v9413_v53 }
 0x1ac   : > { %v6075_v61 = vadd.f32 %v4905_v23, %v5718_v48  ;;  %vm4579_vm15 = vcmp.lt.s32.totalorder %v4578_v9, 0  ;;  %v1289_v42 = vshrl.u32 %v1288_v30, 23  ;;  %v1402_v17 = vshrl.u32 %v1401_v43, 5 }
 0x1ad   : > { %v1404_v13 = vsub.s32 32, %v1403_v31  ;;  %v1406_v32 = vshll.u32 %v9428_v20, %v1403_v31  ;;  %v1252_v55 = vsel %vm4579_vm15, 0, %v4578_v9  ;;  %v1138_v57 = vadd.s32 536870912, %v1137_v47 }
 0x1ae   : > { %9564 = vst [vmem:[#allocation16_spill] sm:$0xff] %v6075_v61  ;;  %v1409_v16 = vshll.u32 %v9424_v22, %v1403_v31  ;;  %v1412_v5 = vshll.u32 %v9422_v24, %v1403_v31  ;;  %v1253_v18 = vsub.s32 32, %v1252_v55  ;;  %v1257_v21 = vsub.s32 4294967266, %v1252_v55 }
 0x1af   : > { %v1415_v62 = vshll.u32 %v9419_v26, %v1403_v31  ;;  %v6081_v1 = vshrl.u32 %v1138_v57, 30  ;;  %v1407_v48 = vshrl.u32 %v9424_v22, %v1404_v13  ;;  %v1410_v15 = vshrl.u32 %v9422_v24, %v1404_v13 }
 0x1b0   : > { %v1413_v3 = vshrl.u32 %v9419_v26, %v1404_v13  ;;  %v1255_v30 = vshrl.u32 %v1237_v51, %v1253_v18  ;;  %v1258_v23 = vadd.s32 127, %v1257_v21  ;;  %v1416_v38 = vshrl.u32 %v9417_v28, %v1404_v13  ;;  %v6088_v46 = vpop.eup %5203 }
 0x1b1   : > { %9565 = vst [vmem:[#allocation17_spill] sm:$0xff] %v6081_v1  ;;  %v1418_v9 = vshll.u32 %v9417_v28, %v1403_v31  ;;  %v1140_v43 = vshll.u32 %v6081_v1, 30  ;;  %v1408_v6 = vor.u32 %v1407_v48, %v1406_v32  ;;  %v1411_v58 = vor.u32 %v1410_v15, %v1409_v16 }
 0x1b2   : > { %v1414_v57 = vor.u32 %v1413_v3, %v1412_v5  ;;  %v1259_v2 = vshll.u32 %v1258_v23, 23  ;;  %v1417_v53 = vor.u32 %v1416_v38, %v1415_v62  ;;  %v1419_v14 = vshrl.u32 %v9426_v35, %v1404_v13 }
 0x1b3   : > { %v1437_v29 = vshll.u32 %v1397_v12, 8  ;;  %v1254_v11 = vshll.u32 %v6028_v37, %v1252_v55  ;;  %v6093_v51 = vsub.s32 %v1137_v47, %v1140_v43  ;;  %v1405_v18 = vshrl.u32 %v9428_v20, %v1404_v13 }
 0x1b4   : > { %v4580_v21 = vadd.s32 4294967169, %v1289_v42  ;;  %v1260_v31 = vor.u32 4788187, %v1259_v2  ;;  %v1420_v28 = vor.u32 %v1419_v14, %v1418_v9  ;;  %vm1421_vm0 = vcmp.lt.s32.totalorder %v1402_v17, 1 }
 0x1b5   : > { %vm1424_vm1 = vcmp.lt.s32.totalorder %v1402_v17, 4  ;;  %v6096_v26 = vpop.eup %5205  ;;  %v1256_v32 = vor.u32 %v1255_v30, %v1254_v11  ;;  %v1143_v16 = vsub.s32 0, %v6093_v51  ;;  %v1429_v62 = vsel %vm1421_vm0, %v1408_v6, %v1411_v58 }
 0x1b6   : > { %9566 = vst [vmem:[#allocation18_spill] sm:$0xff] %v6096_v26  ;;  %v1426_v5 = vsel %vm1424_vm1, %v1414_v57, 2102212464  ;;  %vm1422_vm2 = vcmp.lt.s32.totalorder %v1402_v17, 2  ;;  %vm1423_vm4 = vcmp.lt.s32.totalorder %v1402_v17, 3  ;;  %v1433_v37 = vsel %vm1421_vm0, %v1411_v58, %v1414_v57 }
 0x1b7   : > { %v1430_v12 = vsel %vm1424_vm1, %v1417_v53, 920167782  ;;  %v4573_v47 = vmin.u32 %v1143_v16, %v6093_v51  ;;  %v1425_v55 = vsel %vm1421_vm0, %v1405_v18, %v1408_v6  ;;  %v1434_v42 = vsel %vm1424_vm1, %v1420_v28, 1326507024 }
 0x1b8   : > { %v1431_v13 = vsel %vm1423_vm4, %v1414_v57, %v1430_v12  ;;  %v1261_v2 = vand.u32 2147483647, %v1260_v31  ;;  %v1427_v14 = vsel %vm1423_vm4, %v1411_v58, %v1426_v5  ;;  %v1435_v15 = vsel %vm1423_vm4, %v1417_v53, %v1434_v42 }
 0x1b9   : > { %v1432_v48 = vsel %vm1422_vm2, %v1429_v62, %v1431_v13  ;;  %v1145_v3 = vclz %v4573_v47  ;;  %v1436_v11 = vsel %vm1422_vm2, %v1433_v37, %v1435_v15  ;;  %v1263_v38 = vcvt.s32.f32 %v1256_v32 }
 0x1ba   : > { %v6102_v30 = vmul.u32.u64.low %v1437_v29, %v1432_v48  ;;  %v6103_v23 = vmul.u32.u64.high %v1437_v29, %v1432_v48, %v6102_v30  ;;  %v6106_v9 = vmul.u32.u64.low %v1437_v29, %v1436_v11  ;;  %v6107_v43 = vmul.u32.u64.high %v1437_v29, %v1436_v11, %v6106_v9 }
 0x1bb   : > { %v1295_v16 = vadd.s32 1, %v4580_v21  ;;  %5207 = vsinq.f32 %v6046_v19  ;;  %v941_v28 = vsub.s32 32, %v6063_v52  ;;  %v4574_v58 = vadd.s32 4294967294, %v1145_v3 }
 0x1bc   : > { %v1293_v6 = vor.u32 8388608, %v6072_v40  ;;  %v6112_v53 = vmul.f32 %v1263_v38, %v1261_v2  ;;  %v1428_v57 = vsel %vm1422_vm2, %v1425_v55, %v1427_v14  ;;  %v9421_v18 = vand.u32 2147483647, %v6075_v61 }
 0x1bd   : > { %vm1296_vm6 = vcmp.gt.s32.totalorder %v1295_v16, 0  ;;  %v945_v31 = vsub.s32 4294967266, %v6063_v52  ;;  %vm4575_vm7 = vcmp.lt.s32.totalorder %v4574_v58, 0  ;;  %v1447_v32 = vadd.s32 1, %v6103_v23 }
 0x1be   : > { %v1297_v21 = vsel %vm1296_vm6, %v1295_v16, 0  ;;  %v1133_v19 = vadd.s32 %v6035_v25, %v6049_v34  ;;  %v1148_v5 = vsel %vm4575_vm7, 0, %v4574_v58  ;;  %vm1446_vm8 = vc.u32 %v6107_v43, %v6102_v30 }
 0x1bf   : > { %v1600_v40 = vand.u32 2139095040, %v6075_v61  ;;  %v1149_v17 = vsub.s32 32, %v1148_v5  ;;  %v1153_v62 = vsub.s32 4294967266, %v1148_v5  ;;  %v1444_v12 = vmul.u32 %v1437_v29, %v1428_v57 }
 0x1c0   : > { %v6123_v37 = vshll.u32 %v1293_v6, 8  ;;  %v1265_v47 = vxor.u32 2147483648, %v6112_v53  ;;  %v1448_v55 = vsel %vm1446_vm8, %v1447_v32, %v6103_v23  ;;  %v1299_v13 = vand.u32 31, %v1297_v21 }
 0x1c1   : > { %v6129_v42 = vand.u32 8388607, %v9421_v18  ;;  %v1150_v25 = vshll.u32 %v6093_v51, %v1148_v5  ;;  %v1151_v34 = vshrl.u32 %v1133_v19, %v1149_v17  ;;  %v1154_v2 = vadd.s32 127, %v1153_v62 }
 0x1c2   : > { %v1449_v14 = vadd.s32 %v1448_v55, %v1444_v12  ;;  %v1298_v48 = vshrl.u32 %v1297_v21, 5  ;;  %v1300_v15 = vsub.s32 32, %v1299_v13  ;;  %v1302_v29 = vshll.u32 %v9428_v20, %v1299_v13 }
 0x1c3   : > { %v1601_v3 = vshrl.u32 %v1600_v40, 23  ;;  %v1155_v11 = vshll.u32 %v1154_v2, 23  ;;  %v1305_v9 = vshll.u32 %v9424_v22, %v1299_v13  ;;  %v1308_v23 = vshll.u32 %v9422_v24, %v1299_v13 }
 0x1c4   : > { %v1450_v38 = vadd.s32 536870912, %v1449_v14  ;;  %vm9464_vm10 = vcmp.lt.s32.totalorder %v5880_v44, 0  ;;  %v1152_v16 = vor.u32 %v1151_v34, %v1150_v25  ;;  %v1303_v58 = vshrl.u32 %v9424_v22, %v1300_v15 }
 0x1c5   : > { %v1306_v51 = vshrl.u32 %v9422_v24, %v1300_v15  ;;  %v9567_v6 = vmov 2102212464   ;;  %v1156_v32 = vor.u32 4788187, %v1155_v11  ;;  %v9569_v5 = vmov 920167782  }
 0x1c6   : > { %v1309_v57 = vshrl.u32 %v9567_v6, %v1300_v15  ;;  %v6139_v21 = vshrl.u32 %v1450_v38, 30  ;;  %v1311_v19 = vshll.u32 %v9567_v6, %v1299_v13  ;;  %v1312_v40 = vshrl.u32 %v9569_v5, %v1300_v15 }
 0x1c7   : > { %v1304_v17 = vor.u32 %v1303_v58, %v1302_v29  ;;  %v1307_v62 = vor.u32 %v1306_v51, %v1305_v9  ;;  %v1314_v55 = vshll.u32 %v9569_v5, %v1299_v13  ;;  %v1157_v2 = vand.u32 2147483647, %v1156_v32 }
 0x1c8   : > { %9568 = vst [vmem:[#allocation19_spill] sm:$0xff] %v6139_v21  ;;  %v1310_v12 = vor.u32 %v1309_v57, %v1308_v23  ;;  %v1452_v25 = vshll.u32 %v6139_v21, 30  ;;  %v1313_v34 = vor.u32 %v1312_v40, %v1311_v19  ;;  %v1315_v18 = vshrl.u32 %v9426_v35, %v1300_v15  ;;  %v6146_v24 = vpop.eup %5207 }
 0x1c9   : > { %9570 = vst [vmem:[#allocation20_spill] sm:$0xff] %v6146_v24  ;;  %v9571_v11 = vand.u32 2147483647, %v5880_v44  ;;  %v9572_v38 = vmov 0  ;;  %v1159_v22 = vcvt.s32.f32 %v1152_v16  ;;  %v1301_v29 = vshrl.u32 %v9428_v20, %v1300_v15 }
 0x1ca   : > { %vm1317_vm12 = vcmp.lt.s32.totalorder %v1298_v48, 1  ;;  %vm1318_vm14 = vcmp.lt.s32.totalorder %v1298_v48, 2  ;;  %vm9470_vm15 = vcmp.lt.s32.totalorder %v5922_v45, 0  ;;  %v6156_v13 = vsub.s32 %v1449_v14, %v1452_v25 }
 0x1cb   : > { %vm6150_vm11 = vcmp.le.f32.partialorder %v9571_v11, 0.7853982  ;;  %v1316_v9 = vor.u32 %v1315_v18, %v1314_v55  ;;  %vm1319_vm0 = vcmp.lt.s32.totalorder %v1298_v48, 3  ;;  %vm1320_vm1 = vcmp.lt.s32.totalorder %v1298_v48, 4 }
 0x1cc   : > { %v9573_v38 = vsel %vm6150_vm11, 4294967295, %v9572_v38  ;;  %v1160_v23 = vmul.f32 %v1159_v22, %v1157_v2  ;;  %v1322_v58 = vsel %vm1320_vm1, %v1310_v12, 2102212464  ;;  %v1325_v51 = vsel %vm1317_vm12, %v1304_v17, %v1307_v62 }
 0x1cd   : > { %9574 = vst [vmem:[#allocation21_spill] sm:$0xff] %v9573_v38  ;;  %v1326_v57 = vsel %vm1320_vm1, %v1313_v34, 920167782  ;;  %v1455_v32 = vsub.s32 0, %v6156_v13  ;;  %v1321_v19 = vsel %vm1317_vm12, %v1301_v29, %v1304_v17  ;;  %v1329_v40 = vsel %vm1317_vm12, %v1307_v62, %v1310_v12  ;;  %v590_v17 = vpop.f32.mrf.mxu1 }
 0x1ce   : > { %v1327_v16 = vsel %vm1319_vm0, %v1310_v12, %v1326_v57  ;;  %v1323_v15 = vsel %vm1319_vm0, %v1307_v62, %v1322_v58  ;;  %v1330_v35 = vsel %vm1320_vm1, %v1316_v9, 1326507024  ;;  %v4592_v14 = vadd.s32 4294967169, %v1601_v3  ;;  %v6189_v58 = vld [vmem:[%s9404_s2 + $0x1] ss:$0 sm:$0xff] }
 0x1cf   : > { %v1328_v11 = vsel %vm1318_vm14, %v1325_v51, %v1327_v16  ;;  %v1266_v18 = vsel %vm9464_vm10, %v1265_v47, %v6112_v53  ;;  %v4585_v22 = vmin.u32 %v1455_v32, %v6156_v13  ;;  %v1331_v55 = vsel %vm1319_vm0, %v1313_v34, %v1330_v35  ;;  %v4908_v21 = vpop.f32.mrf.mxu1 }
 0x1d0   : > { %v1605_v2 = vor.u32 8388608, %v6129_v42  ;;  %v1161_v25 = vxor.u32 2147483648, %v1160_v23  ;;  %v1332_v12 = vsel %vm1318_vm14, %v1329_v40, %v1331_v55  ;;  %v1324_v9 = vsel %vm1318_vm14, %v1321_v19, %v1323_v15 }
 0x1d1   : > { %v6170_v62 = vmul.u32.u64.low %v6123_v37, %v1328_v11  ;;  %v6171_v29 = vmul.u32.u64.high %v6123_v37, %v1328_v11, %v6170_v62  ;;  %v1457_v3 = vclz %v4585_v22  ;;  %v6184_v42 = vshrl.u32 %v6055_v4, %v941_v28 }
 0x1d2   : > { %v6176_v53 = vmul.u32.u64.low %v6123_v37, %v1332_v12  ;;  %v6177_v47 = vmul.u32.u64.high %v6123_v37, %v1332_v12, %v6176_v53  ;;  %v1607_v34 = vadd.s32 1, %v4592_v14  ;;  %v6192_v48 = vadd.f32 %v6189_v58, %v590_v17 }
 0x1d3   : > { %v6196_v51 = vadd.s32 127, %v945_v31  ;;  %v6201_v57 = vsel %vm6150_vm11, %v5880_v44, %v1266_v18  ;;  %v1445_v4 = vadd.s32 %v6102_v30, %v6107_v43  ;;  %v4586_v28 = vadd.s32 4294967294, %v1457_v3 }
 0x1d4   : > { %9575 = vst [vmem:[#allocation22_spill] sm:$0xff] %v6192_v48  ;;  %v6207_v32 = vsel %vm9470_vm15, %v1161_v25, %v1160_v23  ;;  %v1340_v19 = vmul.u32 %v6123_v37, %v1324_v9  ;;  %v1343_v16 = vadd.s32 1, %v6171_v29  ;;  %vm1608_vm2 = vcmp.gt.s32.totalorder %v1607_v34, 0 }
 0x1d5   : > { %vm4587_vm4 = vcmp.lt.s32.totalorder %v4586_v28, 0  ;;  %vm1342_vm6 = vc.u32 %v6177_v47, %v6170_v62  ;;  %v1609_v31 = vsel %vm1608_vm2, %v1607_v34, 0  ;;  %v6213_v40 = vshll.u32 %v1605_v2, 8 }
 0x1d6   : > { %v1460_v15 = vsel %vm4587_vm4, 0, %v4586_v28  ;;  %v1344_v30 = vsel %vm1342_vm6, %v1343_v16, %v6171_v29  ;;  %v1611_v43 = vand.u32 31, %v1609_v31  ;;  %v1496_v37 = vand.u32 2139095040, %v6192_v48 }
 0x1d7   : > { %v1461_v23 = vsub.s32 32, %v1460_v15  ;;  %v1465_v14 = vsub.s32 4294967266, %v1460_v15  ;;  %v1345_v18 = vadd.s32 %v1344_v30, %v1340_v19  ;;  %v9576_v17 = vmov 2475754826  }
 0x1d8   : > { %v1612_v22 = vsub.s32 32, %v1611_v43  ;;  %v1614_v55 = vshll.u32 %v9428_v20, %v1611_v43  ;;  %v1617_v25 = vshll.u32 %v9576_v17, %v1611_v43  ;;  %v9577_v12 = vmov 2131351028  }
 0x1d9   : > { %v1620_v3 = vshll.u32 %v9577_v12, %v1611_v43  ;;  %v1463_v2 = vshrl.u32 %v1445_v4, %v1461_v23  ;;  %v1466_v9 = vadd.s32 127, %v1465_v14  ;;  %v1346_v53 = vadd.s32 536870912, %v1345_v18 }
 0x1da   : > { %v1623_v29 = vshll.u32 %v9567_v6, %v1611_v43  ;;  %v1610_v34 = vshrl.u32 %v1609_v31, 5  ;;  %v1615_v28 = vshrl.u32 %v9576_v17, %v1612_v22  ;;  %v1618_v16 = vshrl.u32 %v9577_v12, %v1612_v22 }
 0x1db   : > { %v1621_v19 = vshrl.u32 %v9567_v6, %v1612_v22  ;;  %v1462_v30 = vshll.u32 %v6156_v13, %v1460_v15  ;;  %v1467_v35 = vshll.u32 %v1466_v9, 23  ;;  %v6226_v11 = vshrl.u32 %v1346_v53, 30 }
 0x1dc   : > { %v1624_v20 = vshrl.u32 %v9569_v5, %v1612_v22  ;;  %v1616_v4 = vor.u32 %v1615_v28, %v1614_v55  ;;  %v1619_v23 = vor.u32 %v1618_v16, %v1617_v25  ;;  %v1626_v38 = vshll.u32 %v9569_v5, %v1611_v43 }
 0x1dd   : > { %9578 = vst [vmem:[#allocation23_spill] sm:$0xff] %v6226_v11  ;;  %v1622_v14 = vor.u32 %v1621_v19, %v1620_v3  ;;  %v1464_v31 = vor.u32 %v1463_v2, %v1462_v30  ;;  %v1468_v44 = vor.u32 4788187, %v1467_v35  ;;  %v1348_v10 = vshll.u32 %v6226_v11, 30 }
 0x1de   : > { %v1625_v1 = vor.u32 %v1624_v20, %v1623_v29  ;;  %v9579_v26 = vand.u32 2147483647, %v5922_v45  ;;  %v9580_v13 = vmov 0  ;;  %v9583_v15 = vmov 683565275  }
 0x1df   : > { %v1613_v9 = vshrl.u32 %v9583_v15, %v1612_v22  ;;  %v9584_v53 = vmov 1326507024   ;;  %vm1629_vm8 = vcmp.lt.s32.totalorder %v1610_v34, 1  ;;  %v6240_v55 = vadd.f32 %v6189_v58, %v4908_v21 }
 0x1e0   : > { %vm6233_vm7 = vcmp.le.f32.partialorder %v9579_v26, 0.7853982  ;;  %v1627_v24 = vshrl.u32 %v9584_v53, %v1612_v22  ;;  %v1469_v43 = vand.u32 2147483647, %v1468_v44  ;;  %v6242_v25 = vsub.s32 %v1345_v18, %v1348_v10 }
 0x1e1   : > { %v9581_v13 = vsel %vm6233_vm7, 4294967295, %v9580_v13  ;;  %9585 = vst [vmem:[#allocation25_spill] sm:$0xff] %v6240_v55  ;;  %vm1631_vm12 = vcmp.lt.s32.totalorder %v1610_v34, 3  ;;  %vm1632_vm14 = vcmp.lt.s32.totalorder %v1610_v34, 4  ;;  %v1637_v26 = vsel %vm1629_vm8, %v1616_v4, %v1619_v23 }
 0x1e2   : > { %9582 = vst [vmem:[#allocation24_spill] sm:$0xff] %v9581_v13  ;;  %v1628_v20 = vor.u32 %v1627_v24, %v1626_v38  ;;  %v1634_v35 = vsel %vm1632_vm14, %v1622_v14, 2102212464  ;;  %v1638_v3 = vsel %vm1632_vm14, %v1625_v1, 920167782  ;;  %v1471_v2 = vcvt.s32.f32 %v1464_v31 }
 0x1e3   : > { %v1351_v29 = vsub.s32 0, %v6242_v25  ;;  %vm1630_vm0 = vcmp.lt.s32.totalorder %v1610_v34, 2  ;;  %v1639_v22 = vsel %vm1631_vm12, %v1622_v14, %v1638_v3  ;;  %v1633_v28 = vsel %vm1629_vm8, %v1613_v9, %v1616_v4 }
 0x1e4   : > { %v1640_v21 = vsel %vm1630_vm0, %v1637_v26, %v1639_v22  ;;  %v1641_v44 = vsel %vm1629_vm8, %v1619_v23, %v1622_v14  ;;  %v1642_v10 = vsel %vm1632_vm14, %v1628_v20, 1326507024  ;;  %v1472_v18 = vmul.f32 %v1471_v2, %v1469_v43 }
 0x1e5   : > { %v4581_v24 = vmin.u32 %v1351_v29, %v6242_v25  ;;  %v1635_v38 = vsel %vm1631_vm12, %v1619_v23, %v1634_v35  ;;  %v1643_v16 = vsel %vm1631_vm12, %v1625_v1, %v1642_v10  ;;  %v1497_v4 = vshrl.u32 %v1496_v37, 23 }
 0x1e6   : > { %v1644_v19 = vsel %vm1630_vm0, %v1641_v44, %v1643_v16  ;;  %v6255_v30 = vmul.u32.u64.low %v6213_v40, %v1640_v21  ;;  %v6256_v31 = vmul.u32.u64.high %v6213_v40, %v1640_v21, %v6255_v30  ;;  %vm9445_vm1 = vcmp.lt.s32.totalorder %v5991_v27, 0 }
 0x1e7   : > { %v1353_v9 = vclz %v4581_v24  ;;  %v6261_v14 = vmul.u32.u64.low %v6213_v40, %v1644_v19  ;;  %v6262_v43 = vmul.u32.u64.high %v6213_v40, %v1644_v19, %v6261_v14  ;;  %v9586_v20 = vand.u32 2147483647, %v6192_v48 }
 0x1e8   : > { %v9587_v1 = vshll.u32 %v5964_v7, %v6063_v52  ;;  %v947_v26 = vshll.u32 %v6196_v51, 23  ;;  %v1636_v37 = vsel %vm1630_vm0, %v1633_v28, %v1635_v38  ;;  %v4588_v3 = vadd.s32 4294967169, %v1497_v4 }
 0x1e9   : > { %v1500_v23 = vand.u32 8388607, %v9586_v20  ;;  %5209 = vcosq.f32 %v6201_v57  ;;  %v1165_v2 = vsel %vm6233_vm7, %v5922_v45, %v6207_v32  ;;  %v4582_v29 = vadd.s32 4294967294, %v1353_v9 }
 0x1ea   : > { %v6270_v35 = vor.u32 %v6184_v42, %v9587_v1  ;;  %v1808_v22 = vand.u32 2139095040, %v6240_v55  ;;  %v1473_v21 = vxor.u32 2147483648, %v1472_v18  ;;  %v1341_v7 = vadd.s32 %v6170_v62, %v6177_v47 }
 0x1eb   : > { %v1655_v52 = vadd.s32 1, %v6256_v31  ;;  %v1503_v42 = vadd.s32 1, %v4588_v3  ;;  %vm4583_vm2 = vcmp.lt.s32.totalorder %v4582_v29, 0  ;;  %v1652_v51 = vmul.u32 %v6213_v40, %v1636_v37 }
 0x1ec   : > { %vm1654_vm4 = vc.u32 %v6262_v43, %v6255_v30  ;;  %v1501_v34 = vor.u32 8388608, %v1500_v23  ;;  %v1356_v28 = vsel %vm4583_vm2, 0, %v4582_v29  ;;  %v1809_v44 = vshrl.u32 %v1808_v22, 23 }
 0x1ed   : > { %v1656_v32 = vsel %vm1654_vm4, %v1655_v52, %v6256_v31  ;;  %vm1504_vm6 = vcmp.gt.s32.totalorder %v1503_v42, 0  ;;  %v1357_v10 = vsub.s32 32, %v1356_v28  ;;  %v1361_v24 = vsub.s32 4294967266, %v1356_v28 }
 0x1ee   : > { %v1657_v38 = vadd.s32 %v1656_v32, %v1652_v51  ;;  %v9441_v62 = vand.u32 2147483647, %v6240_v55  ;;  %v6288_v47 = vor.u32 4788187, %v947_v26  ;;  %5211 = vsinq.f32 %v6201_v57 }
 0x1ef   : > { %v1505_v16 = vsel %vm1504_vm6, %v1503_v42, 0  ;;  %v4600_v40 = vadd.s32 4294967169, %v1809_v44  ;;  %5213 = vcosq.f32 %v1165_v2  ;;  %v1359_v19 = vshrl.u32 %v1341_v7, %v1357_v10 }
 0x1f0   : > { %v1362_v4 = vadd.s32 127, %v1361_v24  ;;  %v1658_v9 = vadd.s32 536870912, %v1657_v38  ;;  %5215 = vsinq.f32 %v1165_v2  ;;  %v6293_v31 = vsel %vm9445_vm1, %v1473_v21, %v1472_v18 }
 0x1f1   : > { %v1358_v14 = vshll.u32 %v6242_v25, %v1356_v28  ;;  %v1507_v20 = vand.u32 31, %v1505_v16  ;;  %v6298_v26 = vshll.u32 %v1501_v34, 8  ;;  %v6302_v57 = vand.u32 8388607, %v9441_v62 }
 0x1f2   : > { %v1363_v23 = vshll.u32 %v1362_v4, 23  ;;  %v6296_v1 = vshrl.u32 %v1658_v9, 30  ;;  %v1506_v3 = vshrl.u32 %v1505_v16, 5  ;;  %v1815_v2 = vadd.s32 1, %v4600_v40 }
 0x1f3   : > { %v1360_v37 = vor.u32 %v1359_v19, %v1358_v14  ;;  %v1508_v29 = vsub.s32 32, %v1507_v20  ;;  %v1510_v18 = vshll.u32 %v9583_v15, %v1507_v20  ;;  %v1513_v25 = vshll.u32 %v9576_v17, %v1507_v20 }
 0x1f4   : > { %9588 = vst [vmem:[#allocation26_spill] sm:$0xff] %v6296_v1  ;;  %v1660_v22 = vshll.u32 %v6296_v1, 30  ;;  %v1516_v21 = vshll.u32 %v9577_v12, %v1507_v20  ;;  %v1364_v7 = vor.u32 4788187, %v1363_v23  ;;  %v1519_v28 = vshll.u32 %v9567_v6, %v1507_v20 }
 0x1f5   : > { %v1511_v52 = vshrl.u32 %v9576_v17, %v1508_v29  ;;  %v1514_v42 = vshrl.u32 %v9577_v12, %v1508_v29  ;;  %v1517_v51 = vshrl.u32 %v9567_v6, %v1508_v29  ;;  %v1520_v32 = vshrl.u32 %v9569_v5, %v1508_v29 }
 0x1f6   : > { %v6311_v34 = vsub.s32 %v1657_v38, %v1660_v22  ;;  %v1522_v44 = vshll.u32 %v9569_v5, %v1507_v20  ;;  %v6316_v10 = vpop.eup %5209  ;;  %v1523_v19 = vshrl.u32 %v9584_v53, %v1508_v29  ;;  %v1367_v4 = vcvt.s32.f32 %v1360_v37 }
 0x1f7   : > { %9589 = vst [vmem:[#allocation27_spill] sm:$0xff] %v6316_v10  ;;  %v1512_v24 = vor.u32 %v1511_v52, %v1510_v18  ;;  %v1515_v16 = vor.u32 %v1514_v42, %v1513_v25  ;;  %v1518_v40 = vor.u32 %v1517_v51, %v1516_v21  ;;  %v1521_v14 = vor.u32 %v1520_v32, %v1519_v28  ;;  %v600_v25 = vpop.f32.mrf.mxu1 }
 0x1f8   : > { %v1663_v9 = vsub.s32 0, %v6311_v34  ;;  %vm1525_vm8 = vcmp.lt.s32.totalorder %v1506_v3, 1  ;;  %v1365_v38 = vand.u32 2147483647, %v1364_v7  ;;  %v1509_v23 = vshrl.u32 %v9583_v15, %v1508_v29 }
 0x1f9   : > { %v1524_v22 = vor.u32 %v1523_v19, %v1522_v44  ;;  %vm1528_vm12 = vcmp.lt.s32.totalorder %v1506_v3, 4  ;;  %vm1526_vm14 = vcmp.lt.s32.totalorder %v1506_v3, 2  ;;  %v1533_v18 = vsel %vm1525_vm8, %v1512_v24, %v1515_v16 }
 0x1fa   : > { %v4593_v62 = vmin.u32 %v1663_v9, %v6311_v34  ;;  %v1530_v20 = vsel %vm1528_vm12, %v1518_v40, 2102212464  ;;  %vm1527_vm0 = vcmp.lt.s32.totalorder %v1506_v3, 3  ;;  %v1534_v21 = vsel %vm1528_vm12, %v1521_v14, 920167782 }
 0x1fb   : > { %v1537_v37 = vsel %vm1525_vm8, %v1515_v16, %v1518_v40  ;;  %v1538_v52 = vsel %vm1528_vm12, %v1524_v22, 1326507024  ;;  %v6324_v42 = vpop.eup %5211  ;;  %v1529_v7 = vsel %vm1525_vm8, %v1509_v23, %v1512_v24  ;;  %v1531_v29 = vsel %vm1527_vm0, %v1515_v16, %v1530_v20 }
 0x1fc   : > { %9590 = vst [vmem:[#allocation28_spill] sm:$0xff] %v6324_v42  ;;  %v1665_v51 = vclz %v4593_v62  ;;  %v1535_v28 = vsel %vm1527_vm0, %v1518_v40, %v1534_v21  ;;  %v6327_v32 = vpop.eup %5213  ;;  %v6329_v44 = vmul.f32 %v1367_v4, %v1365_v38  ;;  %v1539_v9 = vsel %vm1527_vm0, %v1521_v14, %v1538_v52 }
 0x1fd   : > { %9591 = vst [vmem:[#allocation29_spill] sm:$0xff] %v6327_v32  ;;  %v1536_v19 = vsel %vm1526_vm14, %v1533_v18, %v1535_v28  ;;  %v6333_v1 = vadd.f32 %v6189_v58, %v600_v25  ;;  %v6335_v10 = vpop.eup %5215  ;;  %v1653_v22 = vadd.s32 %v6255_v30, %v6262_v43  ;;  %v1540_v24 = vsel %vm1526_vm14, %v1537_v37, %v1539_v9 }
 0x1fe   : > { %9593 = vst [vmem:[#allocation31_spill] sm:$0xff] %v6335_v10  ;;  %v4594_v62 = vadd.s32 4294967294, %v1665_v51  ;;  %vm1816_vm2 = vcmp.gt.s32.totalorder %v1815_v2, 0  ;;  %v1532_v16 = vsel %vm1526_vm14, %v1529_v7, %v1531_v29  ;;  %v1813_v20 = vor.u32 8388608, %v6302_v57 }
 0x1ff   : > { %9592 = vst [vmem:[#allocation30_spill] sm:$0xff] %v6333_v1  ;;  %v6342_v40 = vmul.u32.u64.low %v6298_v26, %v1540_v24  ;;  %v6343_v4 = vmul.u32.u64.high %v6298_v26, %v1540_v24, %v6342_v40  ;;  %v1817_v38 = vsel %vm1816_vm2, %v1815_v2, 0  ;;  %v1548_v37 = vmul.u32 %v6298_v26, %v1532_v16 }
 0x200   : > { %vm4595_vm4 = vcmp.lt.s32.totalorder %v4594_v62, 0  ;;  %v6346_v14 = vmul.u32.u64.low %v6298_v26, %v1536_v19  ;;  %v6347_v23 = vmul.u32.u64.high %v6298_v26, %v1536_v19, %v6346_v14  ;;  %v1819_v18 = vand.u32 31, %v1817_v38 }
 0x201   : > { %v1668_v43 = vsel %vm4595_vm4, 0, %v4594_v62  ;;  %v6354_v52 = vshrl.u32 %v1817_v38, 5  ;;  %v6365_v24 = vshll.u32 %v1813_v20, 8  ;;  %vm9463_vm12 = vcmp.lt.s32.totalorder %v6001_v36, 0 }
 0x202   : > { %v1669_v25 = vsub.s32 32, %v1668_v43  ;;  %v1673_v21 = vsub.s32 4294967266, %v1668_v43  ;;  %v1670_v2 = vshll.u32 %v6311_v34, %v1668_v43  ;;  %vm1550_vm6 = vc.u32 %v6343_v4, %v6346_v14 }
 0x203   : > { %v1820_v51 = vsub.s32 32, %v1819_v18  ;;  %v1822_v57 = vshll.u32 %v9583_v15, %v1819_v18  ;;  %v1551_v28 = vadd.s32 1, %v6347_v23  ;;  %v1825_v19 = vshll.u32 %v9576_v17, %v1819_v18 }
 0x204   : > { %v1671_v7 = vshrl.u32 %v1653_v22, %v1669_v25  ;;  %v1674_v29 = vadd.s32 127, %v1673_v21  ;;  %v1828_v62 = vshll.u32 %v9577_v12, %v1819_v18  ;;  %v9594_v22 = vand.u32 2147483647, %v5991_v27 }
 0x205   : > { %v1823_v9 = vshrl.u32 %v9576_v17, %v1820_v51  ;;  %v1826_v26 = vshrl.u32 %v9577_v12, %v1820_v51  ;;  %v1552_v40 = vsel %vm1550_vm6, %v1551_v28, %v6347_v23  ;;  %v1829_v38 = vshrl.u32 %v9567_v6, %v1820_v51 }
 0x206   : > { %v1672_v34 = vor.u32 %v1671_v7, %v1670_v2  ;;  %v1675_v16 = vshll.u32 %v1674_v29, 23  ;;  %vm6371_vm8 = vcmp.le.f32.partialorder %v9594_v22, 0.7853982  ;;  %v9595_v43 = vmov 0 }
 0x207   : > { %v9596_v43 = vsel %vm6371_vm8, 4294967295, %v9595_v43  ;;  %v1553_v25 = vadd.s32 %v1552_v40, %v1548_v37  ;;  %v1824_v21 = vor.u32 %v1823_v9, %v1822_v57  ;;  %v1831_v3 = vshll.u32 %v9567_v6, %v1819_v18 }
 0x208   : > { %9597 = vst [vmem:[#allocation32_spill] sm:$0xff] %v9596_v43  ;;  %vm1837_vm14 = vcmp.lt.s32.totalorder %v6354_v52, 1  ;;  %v1676_v20 = vor.u32 4788187, %v1675_v16  ;;  %v1827_v2 = vor.u32 %v1826_v26, %v1825_v19  ;;  %v1830_v7 = vor.u32 %v1829_v38, %v1828_v62 }
 0x209   : > { %v1832_v23 = vshrl.u32 %v9569_v5, %v1820_v51  ;;  %vm9462_vm0 = vcmp.lt.s32.totalorder %v6075_v61, 0  ;;  %v1554_v29 = vadd.s32 536870912, %v1553_v25  ;;  %v1821_v28 = vshrl.u32 %v9583_v15, %v1820_v51 }
 0x20a   : > { %v1834_v22 = vshll.u32 %v9569_v5, %v1819_v18  ;;  %v1835_v30 = vshrl.u32 %v9584_v53, %v1820_v51  ;;  %v9598_v37 = vand.u32 2147483647, %v6001_v36  ;;  %v9599_v57 = vmov 0 }
 0x20b   : > { %v1677_v9 = vand.u32 2147483647, %v1676_v20  ;;  %v1679_v19 = vcvt.s32.f32 %v1672_v34  ;;  %v1833_v26 = vor.u32 %v1832_v23, %v1831_v3  ;;  %vm1840_vm4 = vcmp.lt.s32.totalorder %v6354_v52, 4 }
 0x20c   : > { %vm6385_vm2 = vcmp.le.f32.partialorder %v9598_v37, 0.7853982  ;;  %v6390_v62 = vshrl.u32 %v1554_v29, 30  ;;  %v1836_v16 = vor.u32 %v1835_v30, %v1834_v22  ;;  %vm1838_vm6 = vcmp.lt.s32.totalorder %v6354_v52, 2 }
 0x20d   : > { %v9600_v57 = vsel %vm6385_vm2, 4294967295, %v9599_v57  ;;  %v1842_v18 = vsel %vm1840_vm4, %v1830_v7, 2102212464  ;;  %v1680_v51 = vmul.f32 %v1679_v19, %v1677_v9  ;;  %vm1839_vm1 = vcmp.lt.s32.totalorder %v6354_v52, 3 }
 0x20e   : > { %9601 = vst [vmem:[#allocation33_spill] sm:$0xff] %v9600_v57  ;;  %9602 = vst [vmem:[#allocation34_spill] sm:$0xff] %v6390_v62  ;;  %v1845_v40 = vsel %vm1837_vm14, %v1824_v21, %v1827_v2  ;;  %v1846_v34 = vsel %vm1840_vm4, %v1833_v26, 920167782  ;;  %v1556_v3 = vshll.u32 %v6390_v62, 30  ;;  %v1841_v38 = vsel %vm1837_vm14, %v1821_v28, %v1824_v21  ;;  %v4911_v21 = vpop.f32.mrf.mxu1 }
 0x20f   : > { %v1847_v30 = vsel %vm1839_vm1, %v1830_v7, %v1846_v34  ;;  %v1849_v20 = vsel %vm1837_vm14, %v1827_v2, %v1830_v7  ;;  %v1681_v23 = vxor.u32 2147483648, %v1680_v51  ;;  %v1843_v29 = vsel %vm1839_vm1, %v1827_v2, %v1842_v18 }
 0x210   : > { %v1848_v22 = vsel %vm1838_vm6, %v1845_v40, %v1847_v30  ;;  %v1850_v37 = vsel %vm1840_vm4, %v1836_v16, 1326507024  ;;  %v6409_v9 = vsub.s32 %v1553_v25, %v1556_v3  ;;  %v1477_v2 = vsel %vm6371_vm8, %v5991_v27, %v6293_v31 }
 0x211   : > { %v1851_v19 = vsel %vm1839_vm1, %v1833_v26, %v1850_v37  ;;  %v6412_v62 = vmul.u32.u64.low %v6365_v24, %v1848_v22  ;;  %v6413_v11 = vmul.u32.u64.high %v6365_v24, %v1848_v22, %v6412_v62  ;;  %v9603_v7 = vxor.u32 2147483648, %v6329_v44 }
 0x212   : > { %v1852_v25 = vsel %vm1838_vm6, %v1849_v20, %v1851_v19  ;;  %v1704_v26 = vand.u32 2139095040, %v6333_v1  ;;  %v1559_v16 = vsub.s32 0, %v6409_v9  ;;  %v1844_v18 = vsel %vm1838_vm6, %v1841_v38, %v1843_v29 }
 0x213   : > { %v1370_v28 = vsel %vm9463_vm12, %v9603_v7, %v6329_v44  ;;  %v6432_v40 = vmul.u32.u64.low %v6365_v24, %v1852_v25  ;;  %v6433_v34 = vmul.u32.u64.high %v6365_v24, %v1852_v25, %v6432_v40  ;;  %v1682_v31 = vsel %vm9462_vm0, %v1681_v23, %v1680_v51  ;;  %v610_v7 = vpop.f32.mrf.mxu1 }
 0x214   : > { %v1705_v3 = vshrl.u32 %v1704_v26, 23  ;;  %v9604_v44 = vand.u32 2147483647, %v6333_v1  ;;  %v6440_v20 = vadd.f32 %v6189_v58, %v4911_v21  ;;  %5217 = vcosq.f32 %v1477_v2 }
 0x215   : > { %v1373_v52 = vsel %vm6385_vm2, %v6001_v36, %v1370_v28  ;;  %v4589_v38 = vmin.u32 %v1559_v16, %v6409_v9  ;;  %v1863_v29 = vadd.s32 1, %v6413_v11  ;;  %5219 = vsinq.f32 %v1477_v2 }
 0x216   : > { %v1708_v30 = vand.u32 8388607, %v9604_v44  ;;  %9605 = vst [vmem:[#allocation35_spill] sm:$0xff] %v6440_v20  ;;  %v9606_v22 = vand.u32 2147483647, %v6075_v61  ;;  %v9607_v51 = vmov 0  ;;  %v1860_v23 = vmul.u32 %v6365_v24, %v1844_v18 }
 0x217   : > { %v4596_v37 = vadd.s32 4294967169, %v1705_v3  ;;  %v1561_v21 = vclz %v4589_v38  ;;  %vm1862_vm14 = vc.u32 %v6433_v34, %v6412_v62  ;;  %v2016_v2 = vand.u32 2139095040, %v6440_v20 }
 0x218   : > { %vm6449_vm1 = vcmp.le.f32.partialorder %v9606_v22, 0.7853982  ;;  %5221 = vcosq.f32 %v1373_v52  ;;  %v1864_v28 = vsel %vm1862_vm14, %v1863_v29, %v6413_v11  ;;  %v1709_v25 = vor.u32 8388608, %v1708_v30 }
 0x219   : > { %v9608_v51 = vsel %vm6449_vm1, 4294967295, %v9607_v51  ;;  %v6457_v19 = vsel %vm6449_vm1, %v6075_v61, %v1682_v31  ;;  %v1711_v26 = vadd.s32 1, %v4596_v37  ;;  %5223 = vsinq.f32 %v1373_v52 }
 0x21a   : > { %9609 = vst [vmem:[#allocation36_spill] sm:$0xff] %v9608_v51  ;;  %v4590_v24 = vadd.s32 4294967294, %v1561_v21  ;;  %v1865_v16 = vadd.s32 %v1864_v28, %v1860_v23  ;;  %v2017_v18 = vshrl.u32 %v2016_v2, 23  ;;  %5225 = vcosq.f32 %v6457_v19 }
 0x21b   : > { %v1549_v40 = vadd.s32 %v6346_v14, %v6343_v4  ;;  %vm1712_vm4 = vcmp.gt.s32.totalorder %v1711_v26, 0  ;;  %v6467_v31 = vadd.f32 %v6189_v58, %v610_v7  ;;  %v6470_v52 = vshll.u32 %v1709_v25, 8 }
 0x21c   : > { %vm4591_vm6 = vcmp.lt.s32.totalorder %v4590_v24, 0  ;;  %v1866_v3 = vadd.s32 536870912, %v1865_v16  ;;  %v1713_v44 = vsel %vm1712_vm4, %v1711_v26, 0  ;;  %v4608_v29 = vadd.s32 4294967169, %v2017_v18 }
 0x21d   : > { %v1564_v30 = vsel %vm4591_vm6, 0, %v4590_v24  ;;  %v1715_v38 = vand.u32 31, %v1713_v44  ;;  %v1714_v21 = vshrl.u32 %v1713_v44, 5  ;;  %vm9475_vm14 = vcmp.lt.s32.totalorder %v6192_v48, 0 }
 0x21e   : > { %v1565_v22 = vsub.s32 32, %v1564_v30  ;;  %v1569_v23 = vsub.s32 4294967266, %v1564_v30  ;;  %v6472_v37 = vshrl.u32 %v1866_v3, 30  ;;  %v1566_v4 = vshll.u32 %v6409_v9, %v1564_v30 }
 0x21f   : > { %v1716_v14 = vsub.s32 32, %v1715_v38  ;;  %v1718_v2 = vshll.u32 %v9583_v15, %v1715_v38  ;;  %v1721_v7 = vshll.u32 %v9576_v17, %v1715_v38  ;;  %v1724_v25 = vshll.u32 %v9577_v12, %v1715_v38 }
 0x220   : > { %9610 = vst [vmem:[#allocation37_spill] sm:$0xff] %v6472_v37  ;;  %v1567_v28 = vshrl.u32 %v1549_v40, %v1565_v22  ;;  %v1570_v26 = vadd.s32 127, %v1569_v23  ;;  %v1868_v24 = vshll.u32 %v6472_v37, 30  ;;  %v1727_v44 = vshll.u32 %v9567_v6, %v1715_v38 }
 0x221   : > { %v1719_v18 = vshrl.u32 %v9576_v17, %v1716_v14  ;;  %v1722_v11 = vshrl.u32 %v9577_v12, %v1716_v14  ;;  %v1725_v3 = vshrl.u32 %v9567_v6, %v1716_v14  ;;  %v1728_v61 = vshrl.u32 %v9569_v5, %v1716_v14  ;;  %v6486_v40 = vpop.eup %5217 }
 0x222   : > { %v1568_v9 = vor.u32 %v1567_v28, %v1566_v4  ;;  %v1571_v30 = vshll.u32 %v1570_v26, 23  ;;  %v6483_v51 = vsub.s32 %v1865_v16, %v1868_v24  ;;  %9611 = vst [vmem:[#allocation38_spill] sm:$0xff] %v6486_v40  ;;  %v1717_v22 = vshrl.u32 %v9583_v15, %v1716_v14  ;;  %v6489_v27 = vpop.eup %5219 }
 0x223   : > { %v1720_v23 = vor.u32 %v1719_v18, %v1718_v2  ;;  %v1723_v37 = vor.u32 %v1722_v11, %v1721_v7  ;;  %v1726_v43 = vor.u32 %v1725_v3, %v1724_v25  ;;  %9612 = vst [vmem:[#allocation39_spill] sm:$0xff] %v6489_v27  ;;  %v1729_v42 = vor.u32 %v1728_v61, %v1727_v44 }
 0x224   : > { %v1572_v57 = vor.u32 4788187, %v1571_v30  ;;  %v1871_v36 = vsub.s32 0, %v6483_v51  ;;  %v1730_v4 = vshll.u32 %v9569_v5, %v1715_v38  ;;  %v1575_v16 = vcvt.s32.f32 %v1568_v9 }
 0x225   : > { %v1731_v28 = vshrl.u32 %v9584_v53, %v1716_v14  ;;  %vm1733_vm4 = vcmp.lt.s32.totalorder %v1714_v21, 1  ;;  %vm1734_vm6 = vcmp.lt.s32.totalorder %v1714_v21, 2  ;;  %v6495_v26 = vpop.eup %5221  ;;  %vm1735_vm0 = vcmp.lt.s32.totalorder %v1714_v21, 3 }
 0x226   : > { %9613 = vst [vmem:[#allocation40_spill] sm:$0xff] %v6495_v26  ;;  %v1573_v2 = vand.u32 2147483647, %v1572_v57  ;;  %v4601_v11 = vmin.u32 %v1871_v36, %v6483_v51  ;;  %vm1736_vm12 = vcmp.lt.s32.totalorder %v1714_v21, 4  ;;  %v6498_v7 = vpop.eup %5223  ;;  %v1741_v38 = vsel %vm1733_vm4, %v1720_v23, %v1723_v37 }
 0x227   : > { %9614 = vst [vmem:[#allocation41_spill] sm:$0xff] %v6498_v7  ;;  %v1732_v24 = vor.u32 %v1731_v28, %v1730_v4  ;;  %v1738_v61 = vsel %vm1736_vm12, %v1726_v43, 2102212464  ;;  %v1742_v25 = vsel %vm1736_vm12, %v1729_v42, 920167782  ;;  %v6501_v18 = vpop.eup %5225  ;;  %v9617_v3 = vmov 0 }
 0x228   : > { %9615 = vst [vmem:[#allocation42_spill] sm:$0xff] %v6501_v18  ;;  %v9616_v14 = vand.u32 2147483647, %v6192_v48  ;;  %v1576_v57 = vmul.f32 %v1575_v16, %v1573_v2  ;;  %v1873_v44 = vclz %v4601_v11  ;;  %v1737_v36 = vsel %vm1733_vm4, %v1717_v22, %v1720_v23 }
 0x229   : > { %v1743_v9 = vsel %vm1735_vm0, %v1726_v43, %v1742_v25  ;;  %v1739_v30 = vsel %vm1735_vm0, %v1723_v37, %v1738_v61  ;;  %v1745_v28 = vsel %vm1733_vm4, %v1723_v37, %v1726_v43  ;;  %v1746_v40 = vsel %vm1736_vm12, %v1732_v24, 1326507024 }
 0x22a   : > { %vm6505_vm10 = vcmp.le.f32.partialorder %v9616_v14, 0.7853982  ;;  %v1744_v4 = vsel %vm1734_vm6, %v1741_v38, %v1743_v9  ;;  %v1577_v18 = vxor.u32 2147483648, %v1576_v57  ;;  %v4602_v27 = vadd.s32 4294967294, %v1873_v44 }
 0x22b   : > { %v9618_v3 = vsel %vm6505_vm10, 4294967295, %v9617_v3  ;;  %v1747_v14 = vsel %vm1735_vm0, %v1729_v42, %v1746_v40  ;;  %v9620_v26 = vand.u32 2147483647, %v6440_v20  ;;  %v2023_v2 = vadd.s32 1, %v4608_v29 }
 0x22c   : > { %9619 = vst [vmem:[#allocation43_spill] sm:$0xff] %v9618_v3  ;;  %v1748_v16 = vsel %vm1734_vm6, %v1745_v28, %v1747_v14  ;;  %v6519_v22 = vmul.u32.u64.low %v6470_v52, %v1744_v4  ;;  %v6520_v23 = vmul.u32.u64.high %v6470_v52, %v1744_v4, %v6519_v22  ;;  %vm4603_vm15 = vcmp.lt.s32.totalorder %v4602_v27, 0 }
 0x22d   : > { %v2020_v7 = vand.u32 8388607, %v9620_v26  ;;  %v1740_v11 = vsel %vm1734_vm6, %v1737_v36, %v1739_v30  ;;  %v6525_v43 = vmul.u32.u64.low %v6470_v52, %v1748_v16  ;;  %v6526_v37 = vmul.u32.u64.high %v6470_v52, %v1748_v16, %v6525_v43 }
 0x22e   : > { %5227 = vsinq.f32 %v6457_v19  ;;  %v1861_v42 = vadd.s32 %v6412_v62, %v6433_v34  ;;  %v1876_v40 = vsel %vm4603_vm15, 0, %v4602_v27  ;;  %vm2024_vm12 = vcmp.gt.s32.totalorder %v2023_v2, 0 }
 0x22f   : > { %v1578_v26 = vsel %vm9475_vm14, %v1577_v18, %v1576_v57  ;;  %v1877_v24 = vsub.s32 32, %v1876_v40  ;;  %v1881_v61 = vsub.s32 4294967266, %v1876_v40  ;;  %v2021_v29 = vor.u32 8388608, %v2020_v7 }
 0x230   : > { %v1756_v21 = vmul.u32 %v6470_v52, %v1740_v11  ;;  %v1759_v38 = vadd.s32 1, %v6520_v23  ;;  %v2025_v25 = vsel %vm2024_vm12, %v2023_v2, 0  ;;  %v1878_v19 = vshll.u32 %v6483_v51, %v1876_v40 }
 0x231   : > { %v1879_v36 = vshrl.u32 %v1861_v42, %v1877_v24  ;;  %v1882_v9 = vadd.s32 127, %v1881_v61  ;;  %vm1758_vm15 = vc.u32 %v6526_v37, %v6519_v22  ;;  %v6542_v27 = vsel %vm6505_vm10, %v6192_v48, %v1578_v26 }
 0x232   : > { %v1760_v62 = vsel %vm1758_vm15, %v1759_v38, %v6520_v23  ;;  %v2027_v34 = vand.u32 31, %v2025_v25  ;;  %v1912_v52 = vand.u32 2139095040, %v6467_v31  ;;  %v6546_v30 = vshll.u32 %v2021_v29, 8 }
 0x233   : > { %v1880_v7 = vor.u32 %v1879_v36, %v1878_v19  ;;  %v1883_v18 = vshll.u32 %v1882_v9, 23  ;;  %v1761_v57 = vadd.s32 %v1760_v62, %v1756_v21  ;;  %vm9476_vm0 = vcmp.lt.s32.totalorder %v6240_v55, 0 }
 0x234   : > { %v2028_v51 = vsub.s32 32, %v2027_v34  ;;  %v2030_v4 = vshll.u32 %v9583_v15, %v2027_v34  ;;  %v2033_v28 = vshll.u32 %v9576_v17, %v2027_v34  ;;  %v2036_v14 = vshll.u32 %v9577_v12, %v2027_v34 }
 0x235   : > { %v1884_v16 = vor.u32 4788187, %v1883_v18  ;;  %v1762_v2 = vadd.s32 536870912, %v1761_v57  ;;  %v2026_v23 = vshrl.u32 %v2025_v25, 5  ;;  %v2039_v11 = vshll.u32 %v9567_v6, %v2027_v34 }
 0x236   : > { %v1887_v43 = vcvt.s32.f32 %v1880_v7  ;;  %v2031_v42 = vshrl.u32 %v9576_v17, %v2028_v51  ;;  %v2034_v40 = vshrl.u32 %v9577_v12, %v2028_v51  ;;  %v2037_v26 = vshrl.u32 %v9567_v6, %v2028_v51 }
 0x237   : > { %v9621_v24 = vand.u32 2147483647, %v6240_v55  ;;  %v9622_v61 = vmov 0  ;;  %v1885_v29 = vand.u32 2147483647, %v1884_v16  ;;  %v6562_v21 = vshrl.u32 %v1762_v2, 30 }
 0x238   : > { %v2040_v38 = vshrl.u32 %v9569_v5, %v2028_v51  ;;  %v2042_v25 = vshll.u32 %v9569_v5, %v2027_v34  ;;  %v2032_v19 = vor.u32 %v2031_v42, %v2030_v4  ;;  %v2035_v36 = vor.u32 %v2034_v40, %v2033_v28 }
 0x239   : > { %vm6558_vm4 = vcmp.le.f32.partialorder %v9621_v24, 0.7853982  ;;  %9625 = vst [vmem:[#allocation45_spill] sm:$0xff] %v6562_v21  ;;  %v2038_v9 = vor.u32 %v2037_v26, %v2036_v14  ;;  %v2043_v62 = vshrl.u32 %v9584_v53, %v2028_v51  ;;  %v1888_v7 = vmul.f32 %v1887_v43, %v1885_v29 }
 0x23a   : > { %v9623_v61 = vsel %vm6558_vm4, 4294967295, %v9622_v61  ;;  %v1764_v18 = vshll.u32 %v6562_v21, 30  ;;  %v2041_v44 = vor.u32 %v2040_v38, %v2039_v11  ;;  %v1913_v24 = vshrl.u32 %v1912_v52, 23 }
 0x23b   : > { %9624 = vst [vmem:[#allocation44_spill] sm:$0xff] %v9623_v61  ;;  %v2029_v3 = vshrl.u32 %v9583_v15, %v2028_v51  ;;  %v2044_v48 = vor.u32 %v2043_v62, %v2042_v25  ;;  %vm2048_vm6 = vcmp.lt.s32.totalorder %v2026_v23, 4  ;;  %v9626_v16 = vand.u32 2147483647, %v6467_v31  ;;  %v6571_v32 = vpop.eup %5227 }
 0x23c   : > { %9627 = vst [vmem:[#allocation46_spill] sm:$0xff] %v6571_v32  ;;  %v1889_v34 = vxor.u32 2147483648, %v1888_v7  ;;  %v6573_v4 = vsub.s32 %v1761_v57, %v1764_v18  ;;  %vm2045_vm12 = vcmp.lt.s32.totalorder %v2026_v23, 1  ;;  %v2050_v28 = vsel %vm2048_vm6, %v2038_v9, 2102212464 }
 0x23d   : > { %v1916_v2 = vand.u32 8388607, %v9626_v16  ;;  %vm2046_vm15 = vcmp.lt.s32.totalorder %v2026_v23, 2  ;;  %vm2047_vm14 = vcmp.lt.s32.totalorder %v2026_v23, 3  ;;  %v2053_v14 = vsel %vm2045_vm12, %v2032_v19, %v2035_v36 }
 0x23e   : > { %v2054_v52 = vsel %vm2048_vm6, %v2041_v44, 920167782  ;;  %v1890_v51 = vsel %vm9476_vm0, %v1889_v34, %v1888_v7  ;;  %v1767_v11 = vsub.s32 0, %v6573_v4  ;;  %v2057_v42 = vsel %vm2045_vm12, %v2035_v36, %v2038_v9 }
 0x23f   : > { %v2055_v43 = vsel %vm2047_vm14, %v2038_v9, %v2054_v52  ;;  %v2049_v40 = vsel %vm2045_vm12, %v2029_v3, %v2032_v19  ;;  %v2051_v26 = vsel %vm2047_vm14, %v2035_v36, %v2050_v28  ;;  %v2058_v29 = vsel %vm2048_vm6, %v2044_v48, 1326507024  ;;  %v4914_v28 = vpop.f32.mrf.mxu1 }
 0x240   : > { %v2056_v57 = vsel %vm2046_vm15, %v2053_v14, %v2055_v43  ;;  %5229 = vcosq.f32 %v6542_v27  ;;  %v4597_v38 = vmin.u32 %v1767_v11, %v6573_v4  ;;  %v2059_v25 = vsel %vm2047_vm14, %v2041_v44, %v2058_v29 }
 0x241   : > { %v4604_v62 = vadd.s32 4294967169, %v1913_v24  ;;  %v1893_v7 = vsel %vm6558_vm4, %v6240_v55, %v1890_v51  ;;  %v2060_v18 = vsel %vm2046_vm15, %v2057_v42, %v2059_v25  ;;  %v2052_v48 = vsel %vm2046_vm15, %v2049_v40, %v2051_v26 }
 0x242   : > { %v6589_v9 = vmul.u32.u64.low %v6546_v30, %v2056_v57  ;;  %v6590_v3 = vmul.u32.u64.high %v6546_v30, %v2056_v57, %v6589_v9  ;;  %v1769_v19 = vclz %v4597_v38  ;;  %5231 = vsinq.f32 %v6542_v27 }
 0x243   : > { %v6595_v36 = vmul.u32.u64.low %v6546_v30, %v2060_v18  ;;  %v6596_v16 = vmul.u32.u64.high %v6546_v30, %v2060_v18, %v6595_v36  ;;  %v1917_v24 = vor.u32 8388608, %v1916_v2  ;;  %v1919_v34 = vadd.s32 1, %v4604_v62 }
 0x244   : > { %5233 = vcosq.f32 %v1893_v7  ;;  %v1757_v52 = vadd.s32 %v6519_v22, %v6526_v37  ;;  %v4598_v51 = vadd.s32 4294967294, %v1769_v19  ;;  %v2068_v23 = vmul.u32 %v6546_v30, %v2052_v48 }
 0x245   : > { %5235 = vsinq.f32 %v1893_v7  ;;  %v2071_v11 = vadd.s32 1, %v6590_v3  ;;  %vm1920_vm14 = vcmp.gt.s32.totalorder %v1919_v34, 0  ;;  %vm2070_vm12 = vc.u32 %v6596_v16, %v6589_v9 }
 0x246   : > { %vm4599_vm6 = vcmp.lt.s32.totalorder %v4598_v51, 0  ;;  %v1921_v27 = vsel %vm1920_vm14, %v1919_v34, 0  ;;  %v6608_v2 = vadd.f32 %v6189_v58, %v4914_v28  ;;  %v6611_v22 = vshll.u32 %v1917_v24, 8 }
 0x247   : > { %v1772_v43 = vsel %vm4599_vm6, 0, %v4598_v51  ;;  %v2072_v42 = vsel %vm2070_vm12, %v2071_v11, %v6590_v3  ;;  %v1923_v40 = vand.u32 31, %v1921_v27  ;;  %v6613_v57 = vshrl.u32 %v1921_v27, 5 }
 0x248   : > { %v1773_v37 = vsub.s32 32, %v1772_v43  ;;  %v1777_v26 = vsub.s32 4294967266, %v1772_v43  ;;  %v2073_v30 = vadd.s32 %v2072_v42, %v2068_v23  ;;  %v1774_v29 = vshll.u32 %v6573_v4, %v1772_v43 }
 0x249   : > { %v1924_v38 = vsub.s32 32, %v1923_v40  ;;  %v1926_v25 = vshll.u32 %v9583_v15, %v1923_v40  ;;  %v1929_v62 = vshll.u32 %v9576_v17, %v1923_v40  ;;  %v1932_v3 = vshll.u32 %v9577_v12, %v1923_v40 }
 0x24a   : > { %v1775_v58 = vshrl.u32 %v1757_v52, %v1773_v37  ;;  %v1778_v7 = vadd.s32 127, %v1777_v26  ;;  %v2074_v18 = vadd.s32 536870912, %v2073_v30  ;;  %v1935_v24 = vshll.u32 %v9567_v6, %v1923_v40 }
 0x24b   : > { %v1927_v19 = vshrl.u32 %v9576_v17, %v1924_v38  ;;  %v1930_v48 = vshrl.u32 %v9577_v12, %v1924_v38  ;;  %v1933_v36 = vshrl.u32 %v9567_v6, %v1924_v38  ;;  %v1936_v51 = vshrl.u32 %v9569_v5, %v1924_v38 }
 0x24c   : > { %v1776_v34 = vor.u32 %v1775_v58, %v1774_v29  ;;  %v1779_v4 = vshll.u32 %v1778_v7, 23  ;;  %v6623_v28 = vshrl.u32 %v2074_v18, 30  ;;  %vm9494_vm15 = vcmp.lt.s32.totalorder %v6333_v1, 0 }
 0x24d   : > { %v6626_v23 = vpop.eup %5229  ;;  %v1928_v52 = vor.u32 %v1927_v19, %v1926_v25  ;;  %v1931_v11 = vor.u32 %v1930_v48, %v1929_v62  ;;  %v1934_v27 = vor.u32 %v1933_v36, %v1932_v3  ;;  %v1925_v26 = vshrl.u32 %v9583_v15, %v1924_v38  ;;  %v4837_v62 = vpop.f32.mrf.mxu0 }
 0x24e   : > { %9628 = vst [vmem:[#allocation47_spill] sm:$0xff] %v6623_v28  ;;  %9629 = vst [vmem:[#allocation48_spill] sm:$0xff] %v6626_v23  ;;  %v1780_v42 = vor.u32 4788187, %v1779_v4  ;;  %v2076_v37 = vshll.u32 %v6623_v28, 30  ;;  %v1937_v29 = vor.u32 %v1936_v51, %v1935_v24  ;;  %v9631_v7 = vmov 0 }
 0x24f   : > { %v9630_v58 = vand.u32 2147483647, %v6333_v1  ;;  %v1783_v18 = vcvt.s32.f32 %v1776_v34  ;;  %v1938_v44 = vshll.u32 %v9569_v5, %v1923_v40  ;;  %v1939_v25 = vshrl.u32 %v9584_v53, %v1924_v38  ;;  %v6641_v3 = vpop.eup %5231  ;;  %v382_v43 = vpop.f32.mrf.mxu0 }
 0x250   : > { %vm1941_vm6 = vcmp.lt.s32.totalorder %v6613_v57, 1  ;;  %9634 = vst [vmem:[#allocation50_spill] sm:$0xff] %v6641_v3  ;;  %v1781_v19 = vand.u32 2147483647, %v1780_v42  ;;  %v6643_v48 = vsub.s32 %v2073_v30, %v2076_v37  ;;  %vm1943_vm12 = vcmp.lt.s32.totalorder %v6613_v57, 3  ;;  %v620_v42 = vpop.f32.mrf.mxu1 }
 0x251   : > { %vm6634_vm14 = vcmp.le.f32.partialorder %v9630_v58, 0.7853982  ;;  %vm1944_vm0 = vcmp.lt.s32.totalorder %v6613_v57, 4  ;;  %v6647_v36 = vpop.eup %5233  ;;  %v1940_v24 = vor.u32 %v1939_v25, %v1938_v44  ;;  %v1949_v40 = vsel %vm1941_vm6, %v1928_v52, %v1931_v11 }
 0x252   : > { %v9632_v7 = vsel %vm6634_vm14, 4294967295, %v9631_v7  ;;  %9635 = vst [vmem:[#allocation51_spill] sm:$0xff] %v6647_v36  ;;  %v1946_v34 = vsel %vm1944_vm0, %v1934_v27, 2102212464  ;;  %v1950_v38 = vsel %vm1944_vm0, %v1937_v29, 920167782  ;;  %v6651_v4 = vpop.eup %5235  ;;  %v1784_v51 = vmul.f32 %v1783_v18, %v1781_v19 }
 0x253   : > { %9633 = vst [vmem:[#allocation49_spill] sm:$0xff] %v9632_v7  ;;  %9636 = vst [vmem:[#allocation52_spill] sm:$0xff] %v6651_v4  ;;  %v2079_v58 = vsub.s32 0, %v6643_v48  ;;  %vm1942_vm3 = vcmp.lt.s32.totalorder %v6613_v57, 2  ;;  %v1951_v30 = vsel %vm1943_vm12, %v1934_v27, %v1950_v38  ;;  %v1945_v37 = vsel %vm1941_vm6, %v1925_v26, %v1928_v52  ;;  %v6671_v52 = vld [vmem:[%s9404_s2] ss:$0 sm:$0xff] }
 0x254   : > { %v1952_v44 = vsel %vm1942_vm3, %v1949_v40, %v1951_v30  ;;  %v1953_v25 = vsel %vm1941_vm6, %v1931_v11, %v1934_v27  ;;  %v1954_v14 = vsel %vm1944_vm0, %v1940_v24, 1326507024  ;;  %v1785_v18 = vxor.u32 2147483648, %v1784_v51  ;;  %v5394_v40 = vld [vmem:[%s9404_s2 + $0x1] ss:$0 sm:$0xff] }
 0x255   : > { %v4609_v19 = vmin.u32 %v2079_v58, %v6643_v48  ;;  %v1947_v28 = vsel %vm1943_vm12, %v1931_v11, %v1946_v34  ;;  %v1955_v38 = vsel %vm1943_vm12, %v1937_v29, %v1954_v14  ;;  %v6682_v11 = vadd.f32 %v5394_v40, %v620_v42  ;;  %v4840_v42 = vpop.f32.mrf.mxu0 }
 0x256   : > { %v1956_v26 = vsel %vm1942_vm3, %v1953_v25, %v1955_v38  ;;  %v6676_v27 = vmul.u32.u64.low %v6611_v22, %v1952_v44  ;;  %v6677_v24 = vmul.u32.u64.high %v6611_v22, %v1952_v44, %v6676_v27  ;;  %v1786_v14 = vsel %vm9494_vm15, %v1785_v18, %v1784_v51 }
 0x257   : > { %v2081_v29 = vclz %v4609_v19  ;;  %v6687_v34 = vmul.u32.u64.low %v6611_v22, %v1956_v26  ;;  %v6688_v58 = vmul.u32.u64.high %v6611_v22, %v1956_v26, %v6687_v34  ;;  %v1948_v30 = vsel %vm1942_vm3, %v1945_v37, %v1947_v28  ;;  %v392_v32 = vpop.f32.mrf.mxu0 }
 0x258   : > { %v2224_v44 = vand.u32 2139095040, %v6608_v2  ;;  %v9637_v25 = vand.u32 2147483647, %v6608_v2  ;;  %v388_v36 = vadd.f32 %v4837_v62, %v6671_v52  ;;  %v1789_v51 = vsel %vm6634_vm14, %v6333_v1, %v1786_v14 }
 0x259   : > { %v4610_v18 = vadd.s32 4294967294, %v2081_v29  ;;  %v383_v19 = vadd.f32 %v6671_v52, %v382_v43  ;;  %v6701_v26 = vadd.f32 %v4840_v42, %v6671_v52  ;;  %v1967_v57 = vadd.s32 1, %v6677_v24 }
 0x25a   : > { %v2228_v38 = vand.u32 8388607, %v9637_v25  ;;  %v2225_v28 = vshrl.u32 %v2224_v44, 23  ;;  %v2120_v40 = vand.u32 2139095040, %v6682_v11  ;;  %v2069_v62 = vadd.s32 %v6589_v9, %v6596_v16 }
 0x25b   : > { %vm4611_vm3 = vcmp.lt.s32.totalorder %v4610_v18, 0  ;;  %v1964_v34 = vmul.u32 %v6611_v22, %v1948_v30  ;;  %vm1966_vm0 = vc.u32 %v6688_v58, %v6676_v27  ;;  %5237 = vcosq.f32 %v1789_v51 }
 0x25c   : > { %v2084_v14 = vsel %vm4611_vm3, 0, %v4610_v18  ;;  %v1968_v43 = vsel %vm1966_vm0, %v1967_v57, %v6677_v24  ;;  %v4616_v29 = vadd.s32 4294967169, %v2225_v28  ;;  %v2229_v25 = vor.u32 8388608, %v2228_v38 }
 0x25d   : > { %v2085_v42 = vsub.s32 32, %v2084_v14  ;;  %v2089_v44 = vsub.s32 4294967266, %v2084_v14  ;;  %v1969_v4 = vadd.s32 %v1968_v43, %v1964_v34  ;;  %5239 = vsinq.f32 %v1789_v51  ;;  %v2404_v43 = vld [vmem:[#allocation5 + $0x178] sm:$0xff] }
 0x25e   : > { %v2231_v37 = vadd.s32 1, %v4616_v29  ;;  %v2121_v61 = vshrl.u32 %v2120_v40, 23  ;;  %v9638_v55 = vand.u32 2147483647, %v6682_v11  ;;  %v2086_v16 = vshll.u32 %v6643_v48, %v2084_v14  ;;  %4915 = vmatprep.subr.mxu0 %v2404_v43 }
 0x25f   : > { %v2087_v22 = vshrl.u32 %v2069_v62, %v2085_v42  ;;  %v2090_v30 = vadd.s32 127, %v2089_v44  ;;  %v1970_v18 = vadd.s32 536870912, %v1969_v4  ;;  %v6717_v24 = vadd.s32 %v6676_v27, %v6688_v58  ;;  %4916 = vmatpush3.msra.mxu0 %v2404_v43 }
 0x260   : > { %v6713_v9 = vand.u32 8388607, %v9638_v55  ;;  %vm2232_vm6 = vcmp.gt.s32.totalorder %v2231_v37, 0  ;;  %v6719_v38 = vshll.u32 %v2229_v25, 8  ;;  %5241 = vtanh.f32 %v388_v36  ;;  %v2403_v36 = vld [vmem:[#allocation5 + $0x160] sm:$0xff] }
 0x261   : > { %v2088_v57 = vor.u32 %v2087_v22, %v2086_v16  ;;  %v2091_v51 = vshll.u32 %v2090_v30, 23  ;;  %v6721_v28 = vshrl.u32 %v1970_v18, 30  ;;  %v2233_v40 = vsel %vm2232_vm6, %v2231_v37, 0  ;;  %v2402_v30 = vld [vmem:[#allocation5 + $0x148] sm:$0xff]  ;;  %4917 = vmatprep.subr.mxu0 %v2403_v36 }
 0x262   : > { %vm9495_vm12 = vcmp.lt.s32.totalorder %v6440_v20, 0  ;;  %v2235_v55 = vand.u32 31, %v2233_v40  ;;  %v4612_v34 = vadd.s32 4294967169, %v2121_v61  ;;  %v2125_v48 = vor.u32 8388608, %v6713_v9  ;;  %4918 = vmatpush3.msra.mxu0 %v2403_v36  ;;  %v4843_v36 = vpop.f32.mrf.mxu0 }
 0x263   : > { %9639 = vst [vmem:[#allocation53_spill] sm:$0xff] %v6721_v28  ;;  %5243 = vtanh.f32 %v383_v19  ;;  %v2092_v62 = vor.u32 4788187, %v2091_v51  ;;  %v2095_v14 = vcvt.s32.f32 %v2088_v57  ;;  %v1972_v27 = vshll.u32 %v6721_v28, 30  ;;  %4919 = vmatprep.subr.mxu0 %v2402_v30 }
 0x264   : > { %v6726_v58 = vshrl.u32 %v2233_v40, 5  ;;  %v2236_v29 = vsub.s32 32, %v2235_v55  ;;  %v2238_v25 = vshll.u32 %v9583_v15, %v2235_v55  ;;  %v2241_v37 = vshll.u32 %v9576_v17, %v2235_v55  ;;  %4920 = vmatpush3.msra.mxu0 %v2402_v30  ;;  %v2399_v30 = vld [vmem:[#allocation5 + $0x100] sm:$0xff] }
 0x265   : > { %v2244_v42 = vshll.u32 %v9577_v12, %v2235_v55  ;;  %v9640_v61 = vand.u32 2147483647, %v6440_v20  ;;  %v9641_v19 = vmov 0  ;;  %v2093_v44 = vand.u32 2147483647, %v2092_v62 }
 0x266   : > { %v6737_v9 = vsub.s32 %v1969_v4, %v1972_v27  ;;  %v2247_v16 = vshll.u32 %v9567_v6, %v2235_v55  ;;  %v2250_v22 = vshll.u32 %v9569_v5, %v2235_v55  ;;  %v2237_v18 = vshrl.u32 %v9583_v15, %v2236_v29  ;;  %v2401_v55 = vld [vmem:[#allocation5 + $0x130] sm:$0xff] }
 0x267   : > { %vm6733_vm3 = vcmp.le.f32.partialorder %v9640_v61, 0.7853982  ;;  %v2239_v57 = vshrl.u32 %v9576_v17, %v2236_v29  ;;  %v2242_v51 = vshrl.u32 %v9577_v12, %v2236_v29  ;;  %v2245_v40 = vshrl.u32 %v9567_v6, %v2236_v29  ;;  %4921 = vmatprep.subr.mxu0 %v2401_v55 }
 0x268   : > { %v9642_v19 = vsel %vm6733_vm3, 4294967295, %v9641_v19  ;;  %v2096_v61 = vmul.f32 %v2095_v14, %v2093_v44  ;;  %v1975_v62 = vsub.s32 0, %v6737_v9  ;;  %v2248_v4 = vshrl.u32 %v9569_v5, %v2236_v29  ;;  %v2400_v14 = vld [vmem:[#allocation5 + $0x118] sm:$0xff]  ;;  %v6751_v44 = vpop.eup %5237  ;;  %4922 = vmatpush3.msra.mxu0 %v2401_v55 }
 0x269   : > { %9643 = vst [vmem:[#allocation54_spill] sm:$0xff] %v9642_v19  ;;  %v2251_v27 = vshrl.u32 %v9584_v53, %v2236_v29  ;;  %v2240_v43 = vor.u32 %v2239_v57, %v2238_v25  ;;  %v2243_v28 = vor.u32 %v2242_v51, %v2241_v37  ;;  %v2246_v7 = vor.u32 %v2245_v40, %v2244_v42 }
 0x26a   : > { %5245 = vtanh.f32 %v6701_v26  ;;  %v2097_v1 = vxor.u32 2147483648, %v2096_v61  ;;  %v4605_v21 = vmin.u32 %v1975_v62, %v6737_v9  ;;  %v2249_v23 = vor.u32 %v2248_v4, %v2247_v16  ;;  %9644 = vst [vmem:[#allocation55_spill] sm:$0xff] %v6751_v44  ;;  %v6757_v25 = vpop.eup %5239  ;;  %4923 = vmatprep.subr.mxu0 %v2400_v14  ;;  %v2398_v4 = vld [vmem:[#allocation5 + $0xe8] sm:$0xff]  ;;  %v2393_v44 = vld [vmem:[#allocation5 + $0x70] sm:$0xff] }
 0x26b   : > { %vm2253_vm0 = vcmp.lt.s32.totalorder %v6726_v58, 1  ;;  %v2252_v29 = vor.u32 %v2251_v27, %v2250_v22  ;;  %vm2255_vm6 = vcmp.lt.s32.totalorder %v6726_v58, 3  ;;  %vm2256_vm15 = vcmp.lt.s32.totalorder %v6726_v58, 4  ;;  %9645 = vst [vmem:[#allocation56_spill] sm:$0xff] %v6757_v25  ;;  %4924 = vmatpush3.msra.mxu0 %v2400_v14 }
 0x26c   : > { %v2257_v26 = vsel %vm2253_vm0, %v2237_v18, %v2240_v43  ;;  %v2098_v37 = vsel %vm9495_vm12, %v2097_v1, %v2096_v61  ;;  %v1977_v42 = vclz %v4605_v21  ;;  %v2258_v16 = vsel %vm2256_vm15, %v2246_v7, 2102212464  ;;  %4925 = vmatprep.subr.mxu0 %v2399_v30 }
 0x26d   : > { %v2261_v22 = vsel %vm2253_vm0, %v2240_v43, %v2243_v28  ;;  %v2259_v57 = vsel %vm2255_vm6, %v2243_v28, %v2258_v16  ;;  %v2262_v18 = vsel %vm2256_vm15, %v2249_v23, 920167782  ;;  %v2127_v51 = vadd.s32 1, %v4612_v34  ;;  %v6771_v1 = vpop.eup %5241  ;;  %v6789_v43 = vpop.f32.mrf.mxu0  ;;  %4926 = vmatpush3.msra.mxu0 %v2399_v30 }
 0x26e   : > { %v6769_v40 = vshll.u32 %v2125_v48, 8  ;;  %v4606_v21 = vadd.s32 4294967294, %v1977_v42  ;;  %vm2254_vm12 = vcmp.lt.s32.totalorder %v6726_v58, 2  ;;  %v2263_v61 = vsel %vm2255_vm6, %v2246_v7, %v2262_v18  ;;  %4927 = vmatprep.subr.mxu0 %v2398_v4  ;;  %v2396_v18 = vld [vmem:[#allocation5 + $0xb8] sm:$0xff] }
 0x26f   : > { %v2265_v62 = vsel %vm2253_vm0, %v2243_v28, %v2246_v7  ;;  %v6781_v34 = vsel %vm6733_vm3, %v6440_v20, %v2098_v37  ;;  %v2260_v48 = vsel %vm2254_vm12, %v2257_v26, %v2259_v57  ;;  %v2264_v27 = vsel %vm2254_vm12, %v2261_v22, %v2263_v61  ;;  %v2397_v26 = vld [vmem:[#allocation5 + $0xd0] sm:$0xff]  ;;  %4928 = vmatpush3.msra.mxu0 %v2398_v4 }
 0x270   : > { %v2266_v55 = vsel %vm2256_vm15, %v2252_v29, 1326507024  ;;  %v6791_v7 = vpop.eup %5243  ;;  %vm4607_vm0 = vcmp.lt.s32.totalorder %v4606_v21, 0  ;;  %v6796_v14 = vmul.u32.u64.low %v6719_v38, %v2264_v27  ;;  %v6797_v37 = vmul.u32.u64.high %v6719_v38, %v2264_v27, %v6796_v14  ;;  %4929 = vmatprep.subr.mxu0 %v2397_v26 }
 0x271   : > { %v2267_v28 = vsel %vm2255_vm6, %v2249_v23, %v2266_v55  ;;  %v1980_v42 = vsel %vm4607_vm0, 0, %v4606_v21  ;;  %vm2128_vm15 = vcmp.gt.s32.totalorder %v2127_v51, 0  ;;  %v6803_v16 = vadd.f32 %v6671_v52, %v392_v32  ;;  %4930 = vmatpush3.msra.mxu0 %v2397_v26  ;;  %v2394_v26 = vld [vmem:[#allocation5 + $0x88] sm:$0xff] }
 0x272   : > { %v2268_v29 = vsel %vm2254_vm12, %v2265_v62, %v2267_v28  ;;  %5247 = vcosq.f32 %v6781_v34  ;;  %v1981_v22 = vsub.s32 32, %v1980_v42  ;;  %v1985_v23 = vsub.s32 4294967266, %v1980_v42  ;;  %v6811_v62 = vpop.f32.mrf.mxu0  ;;  %4931 = vmatprep.subr.mxu0 %v2396_v18 }
 0x273   : > { %v2129_v57 = vsel %vm2128_vm15, %v2127_v51, 0  ;;  %v6807_v61 = vmul.u32.u64.low %v6719_v38, %v2268_v29  ;;  %v6808_v30 = vmul.u32.u64.high %v6719_v38, %v2268_v29, %v6807_v61  ;;  %v2276_v21 = vmul.u32 %v6719_v38, %v2260_v48  ;;  %v2395_v51 = vld [vmem:[#allocation5 + $0xa0] sm:$0xff]  ;;  %4932 = vmatpush3.msra.mxu0 %v2396_v18 }
 0x274   : > { %v2131_v58 = vand.u32 31, %v2129_v57  ;;  %v1982_v32 = vshll.u32 %v6737_v9, %v1980_v42  ;;  %v1983_v27 = vshrl.u32 %v6717_v24, %v1981_v22  ;;  %v1986_v55 = vadd.s32 127, %v1985_v23  ;;  %4933 = vmatprep.subr.mxu0 %v2395_v51 }
 0x275   : > { %v2279_v28 = vadd.s32 1, %v6797_v37  ;;  %v6816_v4 = vshrl.u32 %v2129_v57, 5  ;;  %v6820_v38 = vadd.f32 %v4843_v36, %v6671_v52  ;;  %vm2278_vm6 = vc.u32 %v6808_v30, %v6796_v14  ;;  %v6832_v57 = vpop.f32.mrf.mxu0  ;;  %4934 = vmatpush3.msra.mxu0 %v2395_v51 }
 0x276   : > { %v2132_v19 = vsub.s32 32, %v2131_v58  ;;  %v2134_v29 = vshll.u32 %v9583_v15, %v2131_v58  ;;  %v1984_v61 = vor.u32 %v1983_v27, %v1982_v32  ;;  %v1987_v9 = vshll.u32 %v1986_v55, 23  ;;  %4935 = vmatprep.subr.mxu0 %v2394_v26 }
 0x277   : > { %v6822_v48 = vpop.eup %5245  ;;  %v2137_v24 = vshll.u32 %v9576_v17, %v2131_v58  ;;  %v2140_v42 = vshll.u32 %v9577_v12, %v2131_v58  ;;  %v2143_v36 = vshll.u32 %v9567_v6, %v2131_v58  ;;  %v2146_v23 = vshll.u32 %v9569_v5, %v2131_v58  ;;  %4936 = vmatpush3.msra.mxu0 %v2394_v26 }
 0x278   : > { %v2135_v22 = vshrl.u32 %v9576_v17, %v2132_v19  ;;  %v9646_v32 = vand.u32 2147483647, %v6467_v31  ;;  %v9647_v27 = vmov 0  ;;  %v1988_v18 = vor.u32 4788187, %v1987_v9  ;;  %4937 = vmatprep.subr.mxu0 %v2393_v44 }
 0x279   : > { %v2280_v55 = vsel %vm2278_vm6, %v2279_v28, %v6797_v37  ;;  %v2133_v20 = vshrl.u32 %v9583_v15, %v2132_v19  ;;  %v2138_v17 = vshrl.u32 %v9577_v12, %v2132_v19  ;;  %v2141_v3 = vshrl.u32 %v9567_v6, %v2132_v19  ;;  %v2392_v37 = vld [vmem:[#allocation5 + $0x58] sm:$0xff]  ;;  %4938 = vmatpush3.msra.mxu0 %v2393_v44 }
 0x27a   : > { %vm6836_vm0 = vcmp.le.f32.partialorder %v9646_v32, 0.7853982  ;;  %v2281_v25 = vadd.s32 %v2280_v55, %v2276_v21  ;;  %v2136_v58 = vor.u32 %v2135_v22, %v2134_v29  ;;  %v2144_v10 = vshrl.u32 %v9569_v5, %v2132_v19  ;;  %v4849_v21 = vpop.f32.mrf.mxu0  ;;  %4939 = vmatprep.subr.mxu0 %v2392_v37 }
 0x27b   : > { %v9648_v27 = vsel %vm6836_vm0, 4294967295, %v9647_v27  ;;  %v1989_v32 = vand.u32 2147483647, %v1988_v18  ;;  %v1991_v13 = vcvt.s32.f32 %v1984_v61  ;;  %v2139_v45 = vor.u32 %v2138_v17, %v2137_v24  ;;  %v2391_v17 = vld [vmem:[#allocation5 + $0x40] sm:$0xff]  ;;  %4940 = vmatpush3.msra.mxu0 %v2392_v37 }
 0x27c   : > { %v2147_v9 = vshrl.u32 %v9584_v53, %v2132_v19  ;;  %vm663_vm15 = vcmp.lt.s32.totalorder %v5726_v54, 0  ;;  %v2282_v28 = vadd.s32 536870912, %v2281_v25  ;;  %v2142_v12 = vor.u32 %v2141_v3, %v2140_v42  ;;  %v422_v18 = vpop.f32.mrf.mxu0  ;;  %4941 = vmatprep.subr.mxu0 %v2391_v17 }
 0x27d   : > { %v2145_v51 = vor.u32 %v2144_v10, %v2143_v36  ;;  %vm2149_vm6 = vcmp.lt.s32.totalorder %v6816_v4, 1  ;;  %v1992_v29 = vmul.f32 %v1991_v13, %v1989_v32  ;;  %vm2150_vm9 = vcmp.lt.s32.totalorder %v6816_v4, 2  ;;  %4942 = vmatpush3.msra.mxu0 %v2391_v17 }
 0x27e   : > { %v2148_v22 = vor.u32 %v2147_v9, %v2146_v23  ;;  %vm2152_vm12 = vcmp.lt.s32.totalorder %v6816_v4, 4  ;;  %v6850_v19 = vshrl.u32 %v2282_v28, 30  ;;  %vm2151_vm3 = vcmp.lt.s32.totalorder %v6816_v4, 3  ;;  %v4852_v17 = vpop.f32.mrf.mxu0 }
 0x27f   : > { %v2154_v3 = vsel %vm2152_vm12, %v2142_v12, 2102212464  ;;  %v2157_v10 = vsel %vm2149_vm6, %v2136_v58, %v2139_v45  ;;  %v1993_v61 = vxor.u32 2147483648, %v1992_v29  ;;  %v2153_v13 = vsel %vm2149_vm6, %v2133_v20, %v2136_v58  ;;  %v6863_v42 = vpop.eup %5247 }
 0x280   : > { %v2158_v24 = vsel %vm2152_vm12, %v2145_v51, 920167782  ;;  %v2161_v44 = vsel %vm2149_vm6, %v2139_v45, %v2142_v12  ;;  %v2284_v26 = vshll.u32 %v6850_v19, 30  ;;  %v2155_v36 = vsel %vm2151_vm3, %v2139_v45, %v2154_v3 }
 0x281   : > { %v2159_v23 = vsel %vm2151_vm3, %v2142_v12, %v2158_v24  ;;  %v2162_v20 = vsel %vm2152_vm12, %v2148_v22, 1326507024  ;;  %5249 = vsinq.f32 %v6781_v34  ;;  %vm9649_vm6 = vcmp.lt.s32.totalorder %v6467_v31, 0 }
 0x282   : > { %v1994_v55 = vsel %vm9649_vm6, %v1993_v61, %v1992_v29  ;;  %v2160_v58 = vsel %vm2150_vm9, %v2157_v10, %v2159_v23  ;;  %v2163_v32 = vsel %vm2151_vm3, %v2145_v51, %v2162_v20  ;;  %v6882_v12 = vsub.s32 %v2281_v25, %v2284_v26 }
 0x283   : > { %v1997_v45 = vsel %vm6836_vm0, %v6467_v31, %v1994_v55  ;;  %v2164_v9 = vsel %vm2150_vm9, %v2161_v44, %v2163_v32  ;;  %5251 = vtanh.f32 %v6803_v16  ;;  %v2156_v34 = vsel %vm2150_vm9, %v2153_v13, %v2155_v36 }
 0x284   : > { %v6890_v37 = vmul.u32.u64.low %v6769_v40, %v2164_v9  ;;  %v6891_v28 = vmul.u32.u64.high %v6769_v40, %v2164_v9, %v6890_v37  ;;  %v403_v51 = vadd.f32 %v6671_v52, %v6789_v43  ;;  %v2287_v29 = vsub.s32 0, %v6882_v12 }
 0x285   : > { %v6897_v25 = vmul.u32.u64.low %v6769_v40, %v2160_v58  ;;  %v6898_v22 = vmul.u32.u64.high %v6769_v40, %v2160_v58, %v6897_v25  ;;  %5253 = vtanh.f32 %v6820_v38  ;;  %v9650_v16 = vxor.u32 2147483648, %v5994_v56 }
 0x286   : > { %v9651_v3 = vand.u32 2147483647, %v6288_v47  ;;  %v9652_v10 = vcvt.s32.f32 %v6270_v35  ;;  %5255 = vcosq.f32 %v1997_v45  ;;  %v418_v61 = vadd.f32 %v6811_v62, %v6671_v52  ;;  %v432_v62 = vpop.f32.mrf.mxu0 }
 0x287   : > { %v746_v4 = vsel %vm663_vm15, %v9650_v16, %v5994_v56  ;;  %5257 = vsinq.f32 %v1997_v45  ;;  %v4617_v13 = vmin.u32 %v2287_v29, %v6882_v12  ;;  %v2172_v38 = vmul.u32 %v6769_v40, %v2156_v34 }
 0x288   : > { %v952_v43 = vmul.f32 %v9652_v10, %v9651_v3  ;;  %v413_v24 = vadd.f32 %v6671_v52, %v6832_v57  ;;  %vm2174_vm9 = vc.u32 %v6891_v28, %v6897_v25  ;;  %5259 = vtanh.f32 %v403_v51  ;;  %v4855_v37 = vpop.f32.mrf.mxu0 }
 0x289   : > { %v428_v56 = vadd.f32 %v4849_v21, %v6671_v52  ;;  %v269_v47 = vlaneseq  ;;  %v2289_v35 = vclz %v4617_v13  ;;  %v2175_v44 = vadd.s32 1, %v6898_v22 }
 0x28a   : > { %v423_v26 = vadd.f32 %v6671_v52, %v422_v18  ;;  %5261 = vtanh.f32 %v418_v61  ;;  %v438_v36 = vadd.f32 %v4852_v17, %v6671_v52  ;;  %v9653_v40 = vand.u32 2147483647, %v5726_v54 }
 0x28b   : > { %v747_v57 = vsub.s32 4, %v5844_v41  ;;  %v9511_v20 = vmov 0.0   ;;  %v4618_v21 = vadd.s32 4294967294, %v2289_v35  ;;  %v2176_v55 = vsel %vm2174_vm9, %v2175_v44, %v6898_v22 }
 0x28c   : > { %vm6923_vm3 = vcmp.le.f32.partialorder %v9653_v40, 0.7853982  ;;  %4971 = vmatprep.subr.mxu1 %v9511_v20  ;;  %5263 = vtanh.f32 %v413_v24  ;;  %v2177_v58 = vadd.s32 %v2176_v55, %v2172_v38  ;;  %v6933_v32 = vand.u32 127, %v269_v47 }
 0x28d   : > { %v749_v18 = vsel %vm6923_vm3, %v5726_v54, %v746_v4  ;;  %5265 = vtanh.f32 %v428_v56  ;;  %v748_v45 = vsel %vm663_vm15, %v747_v57, %v5844_v41  ;;  %v953_v9 = vxor.u32 2147483648, %v952_v43  ;;  %v442_v56 = vpop.f32.mrf.mxu0 }
 0x28e   : > { %vm4619_vm12 = vcmp.lt.s32.totalorder %v4618_v21, 0  ;;  %5267 = vtanh.f32 %v423_v26  ;;  %v433_v34 = vadd.f32 %v6671_v52, %v432_v62  ;;  %v2178_v29 = vadd.s32 536870912, %v2177_v58  ;;  %v6941_v17 = vpop.eup %5249 }
 0x28f   : > { %v2292_v51 = vsel %vm4619_vm12, 0, %v4618_v21  ;;  %v750_v22 = vsel %vm6923_vm3, 0, %v748_v45  ;;  %5269 = vcosq.f32 %v749_v18  ;;  %v2277_v16 = vadd.s32 %v6796_v14, %v6808_v30 }
 0x290   : > { %v2293_v4 = vsub.s32 32, %v2292_v51  ;;  %v2297_v3 = vsub.s32 4294967266, %v2292_v51  ;;  %5271 = vsinq.f32 %v749_v18  ;;  %v5252_v41 = vpop.eup %5251  ;;  %vm871_vm15 = vcmp.lt.s32.totalorder %v5744_v8, 0 }
 0x291   : > { %v6946_v10 = vshrl.u32 %v2178_v29, 30  ;;  %5273 = vtanh.f32 %v438_v36  ;;  %vm271_vm6 = vcmp.ge.s32.totalorder %v6933_v32, 64  ;;  %v2294_v61 = vshll.u32 %v6882_v12, %v2292_v51  ;;  %v4858_v51 = vpop.f32.mrf.mxu0 }
 0x292   : > { %v2295_v13 = vshrl.u32 %v2277_v16, %v2293_v4  ;;  %v2298_v38 = vadd.s32 127, %v2297_v3  ;;  %v754_v24 = vadd.s32 3, %v750_v22  ;;  %v6950_v47 = vpop.eup %5253  ;;  %v954_v14 = vsel %vm871_vm15, %v953_v9, %v952_v43 }
 0x293   : > { %v6955_v30 = vadd.s32 %v6897_v25, %v6891_v28  ;;  %v2180_v35 = vshll.u32 %v6946_v10, 30  ;;  %5275 = vtanh.f32 %v433_v34  ;;  %v6958_v44 = vpop.eup %5255  ;;  %v6961_v12 = vsel %vm271_vm6, 1.0, %v9511_v20 }
 0x294   : > { %v2296_v26 = vor.u32 %v2295_v13, %v2294_v61  ;;  %v2299_v62 = vshll.u32 %v2298_v38, 23  ;;  %v955_v36 = vsub.s32 4, %v5947_v39  ;;  %v6964_v40 = vpop.eup %5257  ;;  %v448_v28 = vadd.f32 %v4855_v37, %v6671_v52 }
 0x295   : > { %v6967_v43 = vsub.s32 %v2177_v58, %v2180_v35  ;;  %v443_v25 = vadd.f32 %v6671_v52, %v442_v56  ;;  %v9656_v23 = vand.u32 2147483647, %v5744_v8  ;;  %v6977_v21 = vpop.eup %5259  ;;  %v6979_v18 = vand.u32 3, %v754_v24  ;;  %v2390_v24 = vld [vmem:[#allocation5 + $0x28] sm:$0xff] }
 0x296   : > { %v2300_v55 = vor.u32 4788187, %v2299_v62  ;;  %v956_v58 = vsel %vm871_vm15, %v955_v36, %v5947_v39  ;;  %v6990_v34 = vadd.f32 %v6791_v7, %v6961_v12  ;;  %v9659_v22 = vand.u32 2147483647, %v6608_v2  ;;  %4943 = vmatprep.subr.mxu0 %v2390_v24  ;;  %v452_v36 = vpop.f32.mrf.mxu0 }
 0x297   : > { %vm6973_vm3 = vcmp.le.f32.partialorder %v9656_v23, 0.7853982  ;;  %v2183_v9 = vsub.s32 0, %v6967_v43  ;;  %v6994_v29 = vpop.eup %5261  ;;  %v2303_v4 = vcvt.s32.f32 %v2296_v26  ;;  %v7006_v13 = vadd.f32 %v5252_v41, %v6961_v12  ;;  %4944 = vmatpush3.msra.mxu0 %v2390_v24 }
 0x298   : > { %v957_v45 = vsel %vm6973_vm3, %v5744_v8, %v954_v14  ;;  %v958_v37 = vsel %vm6973_vm3, 0, %v956_v58  ;;  %vm6998_vm12 = vcmp.le.f32.partialorder %v9659_v22, 0.7853982  ;;  %v2301_v16 = vand.u32 2147483647, %v2300_v55 }
 0x299   : > { %5277 = vcosq.f32 %v957_v45  ;;  %v962_v3 = vadd.s32 3, %v958_v37  ;;  %v7002_v61 = vpop.eup %5263  ;;  %v4613_v7 = vmin.u32 %v2183_v9, %v6967_v43  ;;  %v851_v38 = vsub.s32 4, %v5811_v59 }
 0x29a   : > { %5279 = vsinq.f32 %v957_v45  ;;  %v7009_v56 = vpop.eup %5265  ;;  %v2304_v14 = vmul.f32 %v2303_v4, %v2301_v16  ;;  %vm757_vm3 = vcmp.eq.s32.totalorder %v6979_v18, 0  ;;  %vm760_vm9 = vcmp.eq.s32.totalorder %v6979_v18, 2 }
 0x29b   : > { %5281 = vtanh.f32 %v448_v28  ;;  %v7014_v35 = vpop.eup %5267  ;;  %v2185_v26 = vclz %v4613_v7  ;;  %v7017_v41 = vand.u32 3, %v962_v3  ;;  %vm9662_vm0 = vcmp.lt.s32.totalorder %v5721_v50, 0  ;;  %v2389_v28 = vld [vmem:[#allocation5 + $0x10] sm:$0xff] }
 0x29c   : > { %5283 = vtanh.f32 %v443_v25  ;;  %v852_v62 = vsel %vm9662_vm0, %v851_v38, %v5811_v59  ;;  %v5270_v23 = vpop.eup %5269  ;;  %v2305_v57 = vxor.u32 2147483648, %v2304_v14  ;;  %v7024_v25 = vadd.f32 %v6771_v1, %v6961_v12  ;;  %4945 = vmatprep.subr.mxu0 %v2389_v28 }
 0x29d   : > { %v862_v55 = vxor.u32 2147483648, %v6088_v46  ;;  %v865_v58 = vxor.u32 2147483648, %v6031_v63  ;;  %v5272_v45 = vpop.eup %5271  ;;  %v4614_v9 = vadd.s32 4294967294, %v2185_v26  ;;  %v761_v37 = vxor.u32 2147483648, %v5270_v23  ;;  %4946 = vmatpush3.msra.mxu0 %v2389_v28 }
 0x29e   : > { %v854_v59 = vsel %vm5931_vm13, 0, %v852_v62  ;;  %v458_v22 = vadd.f32 %v4858_v51, %v6671_v52  ;;  %v7032_v16 = vpop.eup %5273  ;;  %vm9663_vm15 = vcmp.lt.s32.totalorder %v6608_v2, 0  ;;  %v758_v4 = vxor.u32 2147483648, %v5272_v45 }
 0x29f   : > { %v2306_v1 = vsel %vm9663_vm15, %v2305_v57, %v2304_v14  ;;  %v858_v3 = vadd.s32 3, %v854_v59  ;;  %v453_v7 = vadd.f32 %v6671_v52, %v452_v36  ;;  %vm4615_vm6 = vcmp.lt.s32.totalorder %v4614_v9, 0 }
 0x2a0   : > { %v762_v38 = vsel %vm760_vm9, %v761_v37, %v5272_v45  ;;  %vm968_vm0 = vcmp.eq.s32.totalorder %v7017_v41, 2  ;;  %v7041_v33 = vpop.eup %5275  ;;  %v2188_v51 = vsel %vm4615_vm6, 0, %v4614_v9  ;;  %v759_v24 = vsel %vm757_vm3, %v5270_v23, %v758_v4 }
 0x2a1   : > { %v859_v14 = vand.u32 3, %v858_v3  ;;  %v1059_v26 = vsub.s32 4, %v5891_v0  ;;  %v2309_v52 = vsel %vm6998_vm12, %v6608_v2, %v2306_v1  ;;  %v2189_v62 = vsub.s32 32, %v2188_v51 }
 0x2a2   : > { %v2193_v36 = vsub.s32 4294967266, %v2188_v51  ;;  %5285 = vtanh.f32 %v458_v22  ;;  %v2190_v28 = vshll.u32 %v6967_v43, %v2188_v51  ;;  %vm9664_vm6 = vcmp.lt.s32.totalorder %v6979_v18, 2  ;;  %v9668_v51 = vld [vmem:[#allocation20_spill] sm:$0xff] }
 0x2a3   : > { %v763_v57 = vsel %vm9664_vm6, %v759_v24, %v762_v38  ;;  %vm861_vm3 = vcmp.eq.s32.totalorder %v859_v14, 0  ;;  %vm864_vm13 = vcmp.eq.s32.totalorder %v859_v14, 2  ;;  %v2191_v23 = vshrl.u32 %v6955_v30, %v2189_v62 }
 0x2a4   : > { %v2194_v45 = vadd.s32 127, %v2193_v36  ;;  %vm9665_vm15 = vweird.f32 %v5726_v54  ;;  %v863_v37 = vsel %vm861_vm3, %v6031_v63, %v862_v55  ;;  %vm860_vm9 = vcmp.lt.s32.totalorder %v859_v14, 2 }
 0x2a5   : > { %v764_v9 = vsel %vm9665_vm15, nan, %v763_v57  ;;  %v866_v43 = vsel %vm864_vm13, %v865_v58, %v6088_v46  ;;  %vm9666_vm6 = vcmp.lt.s32.totalorder %v5733_v60, 0  ;;  %v2192_v4 = vor.u32 %v2191_v23, %v2190_v28  ;;  %v9674_v57 = vld [vmem:[#allocation18_spill] sm:$0xff] }
 0x2a6   : > { %v5278_v59 = vpop.eup %5277  ;;  %v7059_v1 = vmul.f32 %v764_v9, %v6990_v34  ;;  %v1060_v18 = vsel %vm9666_vm6, %v1059_v26, %v5891_v0  ;;  %v2195_v30 = vshll.u32 %v2194_v45, 23  ;;  %v867_v38 = vsel %vm860_vm9, %v863_v37, %v866_v43  ;;  %v9675_v45 = vld [vmem:[#allocation17_spill] sm:$0xff] }
 0x2a7   : > { %v5280_v22 = vpop.eup %5279  ;;  %v969_v3 = vxor.u32 2147483648, %v5278_v59  ;;  %vm2119_vm15 = vcmp.lt.s32.totalorder %v6682_v11, 0  ;;  %vm9667_vm13 = vweird.f32 %v5721_v50  ;;  %5287 = vtanh.f32 %v453_v7 }
 0x2a8   : > { %v7065_v54 = vpop.eup %5281  ;;  %2341 = vrot.lane.b32.xlu0 %v7059_v1, %s5530_s10  ;;  %v966_v63 = vxor.u32 2147483648, %v5280_v22  ;;  %v868_v46 = vsel %vm9667_vm13, nan, %v867_v38  ;;  %v1062_v0 = vsel %vm6015_vm5, 0, %v1060_v18  ;;  %5289 = vcosq.f32 %v2309_v52 }
 0x2a9   : > { %v7074_v34 = vpop.eup %5283  ;;  %v2196_v55 = vor.u32 4788187, %v2195_v30  ;;  %v970_v58 = vsel %vm968_vm0, %v969_v3, %v5280_v22  ;;  %v1070_v24 = vxor.u32 2147483648, %v9668_v51  ;;  %v9669_v14 = vand.u32 2147483647, %v6682_v11 }
 0x2aa   : > { %v2199_v50 = vcvt.s32.f32 %v2192_v4  ;;  %vm9672_vm3 = vcmp.eq.s32.totalorder %v7017_v41, 0  ;;  %v7088_v7 = vmul.f32 %v868_v46, %v7024_v25  ;;  %v1066_v62 = vadd.s32 3, %v1062_v0  ;;  %v9681_v0 = vld [vmem:[#allocation29_spill] sm:$0xff] }
 0x2ab   : > { %vm7081_vm9 = vcmp.le.f32.partialorder %v9669_v14, 0.7853982  ;;  %v967_v49 = vsel %vm9672_vm3, %v5278_v59, %v966_v63  ;;  %v2197_v36 = vand.u32 2147483647, %v2196_v55  ;;  %vm9673_vm5 = vcmp.lt.s32.totalorder %v7017_v41, 2  ;;  %v9677_v41 = vld [vmem:[#allocation12_spill] sm:$0xff] }
 0x2ac   : > { %v971_v28 = vsel %vm9673_vm5, %v967_v49, %v970_v58  ;;  %v1073_v23 = vxor.u32 2147483648, %v9674_v57  ;;  %v1163_v9 = vsub.s32 4, %v9675_v45  ;;  %5291 = vsinq.f32 %v2309_v52  ;;  %2343 = vrot.lane.b32.xlu0 %v7088_v7, %s5530_s10  ;;  %v9680_v63 = vld [vmem:[#allocation31_spill] sm:$0xff] }
 0x2ad   : > { %vm9676_vm0 = vweird.f32 %v5744_v8  ;;  %v648_v25 = vadd.f32 %v6822_v48, %v6961_v12  ;;  %v1067_v59 = vand.u32 3, %v1066_v62  ;;  %v2200_v43 = vmul.f32 %v2199_v50, %v2197_v36  ;;  %v9682_v58 = vld [vmem:[#allocation15_spill] sm:$0xff] }
 0x2ae   : > { %v972_v37 = vsel %vm9676_vm0, nan, %v971_v28  ;;  %vm1065_vm6 = vweird.f32 %v5733_v60  ;;  %vm9678_vm13 = vcmp.lt.s32.totalorder %v9677_v41, 0  ;;  %v1174_v46 = vxor.u32 2147483648, %v9680_v63  ;;  %v9683_v28 = vld [vmem:[#allocation11_spill] sm:$0xff] }
 0x2af   : > { %v7101_v18 = vmul.f32 %v972_v37, %v7006_v13  ;;  %v1164_v52 = vsel %vm9678_vm13, %v1163_v9, %v9675_v45  ;;  %vm1068_vm3 = vcmp.lt.s32.totalorder %v1067_v59, 2  ;;  %vm1069_vm5 = vcmp.eq.s32.totalorder %v1067_v59, 0  ;;  %v7113_v3 = vpop.eup %5285 }
 0x2b0   : > { %vm1072_vm0 = vcmp.eq.s32.totalorder %v1067_v59, 2  ;;  %v1166_v22 = vsel %vm6233_vm7, 0, %v1164_v52  ;;  %v2201_v4 = vxor.u32 2147483648, %v2200_v43  ;;  %v1071_v48 = vsel %vm1069_vm5, %v9674_v57, %v1070_v24  ;;  %v9686_v59 = vld [vmem:[#allocation28_spill] sm:$0xff]  ;;  %v9687_v52 = vld [vmem:[#allocation23_spill] sm:$0xff] }
 0x2b1   : > { %2345 = vrot.lane.b32.xlu1 %v7101_v18, %s5530_s10  ;;  %v1074_v13 = vsel %vm1072_vm0, %v1073_v23, %v9668_v51  ;;  %v1170_v30 = vadd.s32 3, %v1166_v22  ;;  %v1177_v55 = vxor.u32 2147483648, %v9681_v0  ;;  %v1267_v14 = vsub.s32 4, %v9682_v58 }
 0x2b2   : > { %v1075_v38 = vsel %vm1068_vm3, %v1071_v48, %v1074_v13  ;;  %v2202_v50 = vsel %vm2119_vm15, %v2201_v4, %v2200_v43  ;;  %v649_v24 = vadd.f32 %v6977_v21, %v6961_v12  ;;  %vm1169_vm7 = vweird.f32 %v9677_v41  ;;  %v9688_v48 = vld [vmem:[#allocation27_spill] sm:$0xff]  ;;  %v9693_v41 = vld [vmem:[#allocation41_spill] sm:$0xff] }
 0x2b3   : > { %v1076_v49 = vsel %vm1065_vm6, nan, %v1075_v38  ;;  %v1171_v51 = vand.u32 3, %v1170_v30  ;;  %v650_v36 = vadd.f32 %v6950_v47, %v6961_v12  ;;  %vm9684_vm13 = vcmp.lt.s32.totalorder %v9683_v28, 0 }
 0x2b4   : > { %v7124_v62 = vmul.f32 %v1076_v49, %v648_v25  ;;  %v1268_v57 = vsel %vm9684_vm13, %v1267_v14, %v9682_v58  ;;  %v2205_v60 = vsel %vm7081_vm9, %v6682_v11, %v2202_v50  ;;  %vm1273_vm5 = vweird.f32 %v9683_v28  ;;  %v7142_v9 = vpop.eup %5287 }
 0x2b5   : > { %vm1173_vm6 = vcmp.eq.s32.totalorder %v1171_v51, 0  ;;  %vm1176_vm3 = vcmp.eq.s32.totalorder %v1171_v51, 2  ;;  %vm1172_vm0 = vcmp.lt.s32.totalorder %v1171_v51, 2  ;;  %v1270_v45 = vsel %vm6150_vm11, 0, %v1268_v57  ;;  %v7146_v22 = vpop.eup %5289 }
 0x2b6   : > { %2347 = vrot.lane.b32.xlu1 %v7124_v62, %s5530_s10  ;;  %v1175_v21 = vsel %vm1173_vm6, %v9681_v0, %v1174_v46  ;;  %v1178_v47 = vsel %vm1176_vm3, %v1177_v55, %v9680_v63  ;;  %v1274_v25 = vadd.s32 3, %v1270_v45  ;;  %v1278_v43 = vxor.u32 2147483648, %v9686_v59  ;;  %v9689_v46 = vld [vmem:[#allocation14_spill] sm:$0xff]  ;;  %v9691_v55 = vld [vmem:[#allocation19_spill] sm:$0xff] }
 0x2b7   : > { %v1179_v37 = vsel %vm1172_vm0, %v1175_v21, %v1178_v47  ;;  %v1371_v8 = vsub.s32 4, %v9687_v52  ;;  %5293 = vcosq.f32 %v2205_v60  ;;  %v1281_v13 = vxor.u32 2147483648, %v9688_v48  ;;  %v9695_v47 = vld [vmem:[#allocation13_spill] sm:$0xff] }
 0x2b8   : > { %v1180_v4 = vsel %vm1169_vm7, nan, %v1179_v37  ;;  %v651_v30 = vadd.f32 %v7002_v61, %v6961_v12  ;;  %v1275_v63 = vand.u32 3, %v1274_v25  ;;  %vm9690_vm11 = vcmp.lt.s32.totalorder %v9689_v46, 0 }
 0x2b9   : > { %v7153_v38 = vmul.f32 %v1180_v4, %v649_v24  ;;  %v1372_v0 = vsel %vm9690_vm11, %v1371_v8, %v9687_v52  ;;  %v1475_v58 = vsub.s32 4, %v9691_v55  ;;  %5295 = vsinq.f32 %v2205_v60  ;;  %v7163_v51 = vpop.eup %5291  ;;  %v9694_v24 = vld [vmem:[#allocation40_spill] sm:$0xff]  ;;  %v9698_v8 = vld [vmem:[#allocation34_spill] sm:$0xff] }
 0x2ba   : > { %v1374_v50 = vsel %vm6385_vm2, 0, %v1372_v0  ;;  %vm1377_vm7 = vweird.f32 %v9689_v46  ;;  %v1382_v49 = vxor.u32 2147483648, %v9693_v41  ;;  %vm1277_vm13 = vcmp.eq.s32.totalorder %v1275_v63, 0 }
 0x2bb   : > { %2349 = vrot.lane.b32.xlu0 %v7153_v38, %s5530_s10  ;;  %vm1280_vm6 = vcmp.eq.s32.totalorder %v1275_v63, 2  ;;  %v1378_v61 = vadd.s32 3, %v1374_v50  ;;  %v1385_v57 = vxor.u32 2147483648, %v9694_v24  ;;  %vm1276_vm3 = vcmp.lt.s32.totalorder %v1275_v63, 2  ;;  %v9699_v63 = vld [vmem:[#allocation39_spill] sm:$0xff] }
 0x2bc   : > { %v1279_v60 = vsel %vm1277_vm13, %v9688_v48, %v1278_v43  ;;  %v1282_v21 = vsel %vm1280_vm6, %v1281_v13, %v9686_v59  ;;  %vm9696_vm2 = vcmp.lt.s32.totalorder %v9695_v47, 0  ;;  %v1579_v4 = vsub.s32 4, %v9698_v8  ;;  %v9700_v43 = vld [vmem:[#allocation38_spill] sm:$0xff] }
 0x2bd   : > { %v1476_v23 = vsel %vm9696_vm2, %v1475_v58, %v9691_v55  ;;  %v1283_v45 = vsel %vm1276_vm3, %v1279_v60, %v1282_v21  ;;  %v1379_v37 = vand.u32 3, %v1378_v61  ;;  %v1486_v50 = vxor.u32 2147483648, %v9699_v63  ;;  %v9701_v61 = vld [vmem:[#allocation22_spill] sm:$0xff] }
 0x2be   : > { %v1478_v52 = vsel %vm6371_vm8, 0, %v1476_v23  ;;  %v1284_v0 = vsel %vm1273_vm5, nan, %v1283_v45  ;;  %v1489_v48 = vxor.u32 2147483648, %v9700_v43  ;;  %vm9702_vm8 = vcmp.lt.s32.totalorder %v9701_v61, 0  ;;  %v9711_v21 = vld [vmem:[#allocation30_spill] sm:$0xff] }
 0x2bf   : > { %v1482_v14 = vadd.s32 3, %v1478_v52  ;;  %v7180_v59 = vmul.f32 %v1284_v0, %v650_v36  ;;  %vm1380_vm0 = vcmp.lt.s32.totalorder %v1379_v37, 2  ;;  %vm1381_vm11 = vcmp.eq.s32.totalorder %v1379_v37, 0  ;;  %v9705_v52 = vld [vmem:[#allocation48_spill] sm:$0xff] }
 0x2c0   : > { %vm1384_vm13 = vcmp.eq.s32.totalorder %v1379_v37, 2  ;;  %v1383_v13 = vsel %vm1381_vm11, %v9694_v24, %v1382_v49  ;;  %v1580_v28 = vsel %vm9702_vm8, %v1579_v4, %v9698_v8  ;;  %v652_v36 = vadd.f32 %v6994_v29, %v6961_v12  ;;  %v9704_v29 = vld [vmem:[#allocation50_spill] sm:$0xff] }
 0x2c1   : > { %v1386_v55 = vsel %vm1384_vm13, %v1385_v57, %v9693_v41  ;;  %v1483_v58 = vand.u32 3, %v1482_v14  ;;  %2351 = vrot.lane.b32.xlu1 %v7180_v59, %s5530_s10  ;;  %vm1481_vm5 = vweird.f32 %v9695_v47  ;;  %v1582_v23 = vsel %vm6505_vm10, 0, %v1580_v28  ;;  %v9706_v4 = vld [vmem:[#allocation26_spill] sm:$0xff] }
 0x2c2   : > { %v1387_v60 = vsel %vm1380_vm0, %v1383_v13, %v1386_v55  ;;  %v1586_v45 = vadd.s32 3, %v1582_v23  ;;  %v1590_v25 = vxor.u32 2147483648, %v9704_v29  ;;  %v1593_v8 = vxor.u32 2147483648, %v9705_v52  ;;  %v9709_v55 = vld [vmem:[#allocation45_spill] sm:$0xff] }
 0x2c3   : > { %v1388_v41 = vsel %vm1377_vm7, nan, %v1387_v60  ;;  %vm1484_vm6 = vcmp.lt.s32.totalorder %v1483_v58, 2  ;;  %vm1485_vm3 = vcmp.eq.s32.totalorder %v1483_v58, 0  ;;  %vm1488_vm2 = vcmp.eq.s32.totalorder %v1483_v58, 2 }
 0x2c4   : > { %v7196_v49 = vmul.f32 %v1388_v41, %v651_v30  ;;  %v1487_v24 = vsel %vm1485_vm3, %v9700_v43, %v1486_v50  ;;  %v1490_v57 = vsel %vm1488_vm2, %v1489_v48, %v9699_v63  ;;  %v1683_v0 = vsub.s32 4, %v9706_v4  ;;  %v7203_v14 = vpop.eup %5293  ;;  %v9707_v48 = vld [vmem:[#allocation16_spill] sm:$0xff] }
 0x2c5   : > { %v1491_v37 = vsel %vm1484_vm6, %v1487_v24, %v1490_v57  ;;  %v653_v46 = vadd.f32 %v7014_v35, %v6961_v12  ;;  %vm1585_vm10 = vweird.f32 %v9701_v61  ;;  %v1587_v63 = vand.u32 3, %v1586_v45  ;;  %v9713_v24 = vld [vmem:[#allocation46_spill] sm:$0xff] }
 0x2c6   : > { %2353 = vrot.lane.b32.xlu0 %v7196_v49, %s5530_s10  ;;  %v1492_v30 = vsel %vm1481_vm5, nan, %v1491_v37  ;;  %v654_v43 = vadd.f32 %v7009_v56, %v6961_v12  ;;  %vm9708_vm7 = vcmp.lt.s32.totalorder %v9707_v48, 0  ;;  %v1787_v58 = vsub.s32 4, %v9709_v55  ;;  %v7220_v28 = vpop.eup %5295  ;;  %v9714_v45 = vld [vmem:[#allocation42_spill] sm:$0xff] }
 0x2c7   : > { %v7212_v50 = vmul.f32 %v1492_v30, %v652_v36  ;;  %v1684_v13 = vsel %vm9708_vm7, %v1683_v0, %v9706_v4  ;;  %vm1588_vm0 = vcmp.lt.s32.totalorder %v1587_v63, 2  ;;  %vm1589_vm11 = vcmp.eq.s32.totalorder %v1587_v63, 0 }
 0x2c8   : > { %vm1592_vm13 = vcmp.eq.s32.totalorder %v1587_v63, 2  ;;  %v1686_v47 = vsel %vm6449_vm1, 0, %v1684_v13  ;;  %v1591_v60 = vsel %vm1589_vm11, %v9705_v52, %v1590_v25  ;;  %vm9712_vm8 = vcmp.lt.s32.totalorder %v9711_v21, 0  ;;  %v9717_v13 = vld [vmem:[#allocation55_spill] sm:$0xff] }
 0x2c9   : > { %2355 = vrot.lane.b32.xlu1 %v7212_v50, %s5530_s10  ;;  %v1594_v56 = vsel %vm1592_vm13, %v1593_v8, %v9704_v29  ;;  %v1690_v36 = vadd.s32 3, %v1686_v47  ;;  %v1788_v23 = vsel %vm9712_vm8, %v1787_v58, %v9709_v55  ;;  %v1694_v57 = vxor.u32 2147483648, %v9713_v24  ;;  %v9716_v8 = vld [vmem:[#allocation56_spill] sm:$0xff]  ;;  %v9718_v58 = vld [vmem:[#allocation37_spill] sm:$0xff] }
 0x2ca   : > { %v1595_v41 = vsel %vm1588_vm0, %v1591_v60, %v1594_v56  ;;  %v1697_v37 = vxor.u32 2147483648, %v9714_v45  ;;  %v1790_v0 = vsel %vm6634_vm14, 0, %v1788_v23  ;;  %vm1689_vm1 = vweird.f32 %v9707_v48  ;;  %v9719_v56 = vld [vmem:[#allocation25_spill] sm:$0xff] }
 0x2cb   : > { %v1596_v30 = vsel %vm1585_vm10, nan, %v1595_v41  ;;  %v1691_v25 = vand.u32 3, %v1690_v36  ;;  %v1794_v29 = vadd.s32 3, %v1790_v0  ;;  %v1798_v63 = vxor.u32 2147483648, %v9716_v8  ;;  %v9724_v48 = vld [vmem:[#allocation53_spill] sm:$0xff]  ;;  %v9730_v0 = vld [vmem:[#allocation54_spill] sm:$0xff] }
 0x2cc   : > { %v7238_v52 = vmul.f32 %v1596_v30, %v653_v46  ;;  %v1801_v55 = vxor.u32 2147483648, %v9717_v13  ;;  %v1891_v35 = vsub.s32 4, %v9718_v58  ;;  %v655_v47 = vadd.f32 %v7041_v33, %v6961_v12 }
 0x2cd   : > { %vm1693_vm5 = vcmp.eq.s32.totalorder %v1691_v25, 0  ;;  %vm1696_vm6 = vcmp.eq.s32.totalorder %v1691_v25, 2  ;;  %v1795_v60 = vand.u32 3, %v1794_v29  ;;  %vm1692_vm14 = vcmp.lt.s32.totalorder %v1691_v25, 2  ;;  %v9722_v25 = vld [vmem:[#allocation52_spill] sm:$0xff] }
 0x2ce   : > { %2357 = vrot.lane.b32.xlu0 %v7238_v52, %s5530_s10  ;;  %v1695_v61 = vsel %vm1693_vm5, %v9714_v45, %v1694_v57  ;;  %v1698_v46 = vsel %vm1696_vm6, %v1697_v37, %v9713_v24  ;;  %vm9720_vm3 = vcmp.lt.s32.totalorder %v9719_v56, 0  ;;  %vm1793_vm0 = vweird.f32 %v9711_v21 }
 0x2cf   : > { %v1892_v36 = vsel %vm9720_vm3, %v1891_v35, %v9718_v58  ;;  %v1699_v23 = vsel %vm1692_vm14, %v1695_v61, %v1698_v46  ;;  %vm1796_vm2 = vcmp.lt.s32.totalorder %v1795_v60, 2  ;;  %vm1797_vm10 = vcmp.eq.s32.totalorder %v1795_v60, 0  ;;  %v9723_v58 = vld [vmem:[#allocation51_spill] sm:$0xff] }
 0x2d0   : > { %vm1800_vm7 = vcmp.eq.s32.totalorder %v1795_v60, 2  ;;  %v1700_v33 = vsel %vm1689_vm1, nan, %v1699_v23  ;;  %v1799_v41 = vsel %vm1797_vm10, %v9717_v13, %v1798_v63  ;;  %v1894_v57 = vsel %vm6558_vm4, 0, %v1892_v36  ;;  %v9728_v36 = vld [vmem:[#allocation35_spill] sm:$0xff] }
 0x2d1   : > { %v1802_v4 = vsel %vm1800_vm7, %v1801_v55, %v9716_v8  ;;  %v7258_v45 = vmul.f32 %v1700_v33, %v654_v43  ;;  %v1898_v37 = vadd.s32 3, %v1894_v57  ;;  %v1902_v29 = vxor.u32 2147483648, %v9722_v25  ;;  %v9726_v55 = vld [vmem:[#allocation47_spill] sm:$0xff] }
 0x2d2   : > { %v1803_v24 = vsel %vm1796_vm2, %v1799_v41, %v1802_v4  ;;  %v1905_v35 = vxor.u32 2147483648, %v9723_v58  ;;  %v1995_v60 = vsub.s32 4, %v9724_v48  ;;  %v656_v43 = vadd.f32 %v7032_v16, %v6961_v12 }
 0x2d3   : > { %v1804_v30 = vsel %vm1793_vm0, nan, %v1803_v24  ;;  %2359 = vrot.lane.b32.xlu1 %v7258_v45, %s5530_s10  ;;  %vm1897_vm4 = vweird.f32 %v9719_v56  ;;  %v1899_v21 = vand.u32 3, %v1898_v37  ;;  %v657_v63 = vadd.f32 %v7074_v34, %v6961_v12 }
 0x2d4   : > { %v7266_v8 = vmul.f32 %v1804_v30, %v655_v47  ;;  %vm9725_vm11 = vcmp.lt.s32.totalorder %v6467_v31, 0  ;;  %vm2001_vm13 = vweird.f32 %v6467_v31  ;;  %v2099_v61 = vsub.s32 4, %v9726_v55 }
 0x2d5   : > { %v1996_v13 = vsel %vm9725_vm11, %v1995_v60, %v9724_v48  ;;  %vm1900_vm8 = vcmp.lt.s32.totalorder %v1899_v21, 2  ;;  %vm1901_vm1 = vcmp.eq.s32.totalorder %v1899_v21, 0  ;;  %vm1904_vm5 = vcmp.eq.s32.totalorder %v1899_v21, 2 }
 0x2d6   : > { %2361 = vrot.lane.b32.xlu0 %v7266_v8, %s5530_s10  ;;  %vm9727_vm6 = vnez %v9648_v27  ;;  %v1903_v47 = vsel %vm1901_vm1, %v9723_v58, %v1902_v29  ;;  %v1906_v34 = vsel %vm1904_vm5, %v1905_v35, %v9722_v25  ;;  %vm9729_vm14 = vcmp.lt.s32.totalorder %v9728_v36, 0 }
 0x2d7   : > { %v1998_v16 = vsel %vm9727_vm6, 0, %v1996_v13  ;;  %v2100_v23 = vsel %vm9729_vm14, %v2099_v61, %v9726_v55  ;;  %v1907_v33 = vsel %vm1900_vm8, %v1903_v47, %v1906_v34  ;;  %v2006_v41 = vxor.u32 2147483648, %v6964_v40 }
 0x2d8   : > { %v2002_v46 = vadd.s32 3, %v1998_v16  ;;  %v2009_v4 = vxor.u32 2147483648, %v6958_v44  ;;  %vm9731_vm3 = vnez %v9730_v0  ;;  %v1908_v27 = vsel %vm1897_vm4, nan, %v1907_v33 }
 0x2d9   : > { %v2102_v57 = vsel %vm9731_vm3, 0, %v2100_v23  ;;  %v2203_v30 = vsub.s32 4, %v6946_v10  ;;  %v7294_v25 = vmul.f32 %v1908_v27, %v656_v43  ;;  %v658_v29 = vadd.f32 %v7065_v54, %v6961_v12 }
 0x2da   : > { %v2003_v24 = vand.u32 3, %v2002_v46  ;;  %v2106_v37 = vadd.s32 3, %v2102_v57  ;;  %v2110_v58 = vxor.u32 2147483648, %v6941_v17  ;;  %v2113_v35 = vxor.u32 2147483648, %v6863_v42 }
 0x2db   : > { %vm2105_vm7 = vweird.f32 %v9728_v36  ;;  %2363 = vrot.lane.b32.xlu1 %v7294_v25, %s5530_s10  ;;  %v2204_v54 = vsel %vm2119_vm15, %v2203_v30, %v6946_v10  ;;  %v2307_v10 = vsub.s32 4, %v6850_v19  ;;  %v2214_v34 = vxor.u32 2147483648, %v7220_v28 }
 0x2dc   : > { %vm2005_vm2 = vcmp.eq.s32.totalorder %v2003_v24, 0  ;;  %vm2008_vm10 = vcmp.eq.s32.totalorder %v2003_v24, 2  ;;  %v2107_v48 = vand.u32 3, %v2106_v37  ;;  %vm2004_vm0 = vcmp.lt.s32.totalorder %v2003_v24, 2 }
 0x2dd   : > { %v2007_v56 = vsel %vm2005_vm2, %v6958_v44, %v2006_v41  ;;  %v2010_v60 = vsel %vm2008_vm10, %v2009_v4, %v6964_v40  ;;  %v2206_v44 = vsel %vm7081_vm9, 0, %v2204_v54  ;;  %v2217_v31 = vxor.u32 2147483648, %v7203_v14 }
 0x2de   : > { %v2011_v43 = vsel %vm2004_vm0, %v2007_v56, %v2010_v60  ;;  %vm2108_vm4 = vcmp.lt.s32.totalorder %v2107_v48, 2  ;;  %vm2109_vm11 = vcmp.eq.s32.totalorder %v2107_v48, 0  ;;  %vm2112_vm8 = vcmp.eq.s32.totalorder %v2107_v48, 2 }
 0x2df   : > { %v2012_v21 = vsel %vm2001_vm13, nan, %v2011_v43  ;;  %v2111_v13 = vsel %vm2109_vm11, %v6863_v42, %v2110_v58  ;;  %v2114_v55 = vsel %vm2112_vm8, %v2113_v35, %v6941_v17  ;;  %v2210_v16 = vadd.s32 3, %v2206_v44 }
 0x2e0   : > { %v7314_v61 = vmul.f32 %v2012_v21, %v657_v63  ;;  %v2115_v40 = vsel %vm2108_vm4, %v2111_v13, %v2114_v55  ;;  %vm9732_vm15 = vcmp.lt.s32.totalorder %v6608_v2, 0  ;;  %v659_v63 = vadd.f32 %v7142_v9, %v6961_v12 }
 0x2e1   : > { %v2116_v47 = vsel %vm2105_vm7, nan, %v2115_v40  ;;  %v2211_v17 = vand.u32 3, %v2210_v16  ;;  %v2308_v26 = vsel %vm9732_vm15, %v2307_v10, %v6850_v19  ;;  %v2318_v23 = vxor.u32 2147483648, %v7163_v51 }
 0x2e2   : > { %2365 = vrot.lane.b32.xlu0 %v7314_v61, %s5530_s10  ;;  %v7323_v42 = vmul.f32 %v2116_v47, %v658_v29  ;;  %v2310_v46 = vsel %vm6998_vm12, 0, %v2308_v26  ;;  %v2321_v19 = vxor.u32 2147483648, %v7146_v22  ;;  %vm2209_vm5 = vweird.f32 %v6682_v11 }
 0x2e3   : > { %vm2213_vm9 = vcmp.eq.s32.totalorder %v2211_v17, 0  ;;  %vm2216_vm13 = vcmp.eq.s32.totalorder %v2211_v17, 2  ;;  %v2314_v36 = vadd.s32 3, %v2310_v46  ;;  %vm2212_vm1 = vcmp.lt.s32.totalorder %v2211_v17, 2 }
 0x2e4   : > { %2367 = vrot.lane.b32.xlu1 %v7323_v42, %s5530_s10  ;;  %v2215_v33 = vsel %vm2213_vm9, %v7203_v14, %v2214_v34  ;;  %v2218_v41 = vsel %vm2216_vm13, %v2217_v31, %v7220_v28  ;;  %v660_v57 = vadd.f32 %v7113_v3, %v6961_v12  ;;  %vm2313_vm3 = vweird.f32 %v6608_v2 }
 0x2e5   : > { %v2219_v9 = vsel %vm2212_vm1, %v2215_v33, %v2218_v41  ;;  %v2315_v39 = vand.u32 3, %v2314_v36  ;;  %vm273_vm2 = vcmp.ge.s32.totalorder %v6933_v32, 32  ;;  %vm274_vm10 = vcmp.lt.s32.totalorder %v6933_v32, 64 }
 0x2e6   : > { %v2220_v4 = vsel %vm2209_vm5, nan, %v2219_v9  ;;  %vm275_vm7 = vmand %vm273_vm2, %vm274_vm10 }
 0x2e7   : > { %v2339_v0 = vmul.f32 %v2220_v4, %v659_v63  ;;  %vm2317_vm12 = vcmp.eq.s32.totalorder %v2315_v39, 0  ;;  %vm2320_vm6 = vcmp.eq.s32.totalorder %v2315_v39, 2  ;;  %vm2316_vm14 = vcmp.lt.s32.totalorder %v2315_v39, 2 }
 0x2e8   : > { %v2319_v27 = vsel %vm2317_vm12, %v7146_v22, %v2318_v23  ;;  %v2322_v14 = vsel %vm2320_vm6, %v2321_v19, %v7163_v51 }
 0x2e9   : > { %2369 = vrot.lane.b32.xlu0 %v2339_v0, %s5530_s10  ;;  %v2323_v28 = vsel %vm2316_vm14, %v2319_v27, %v2322_v14 }
 0x2ea   : > { %v2324_v11 = vsel %vm2313_vm3, nan, %v2323_v28 }
 0x2eb   : > { %v2340_v24 = vmul.f32 %v2324_v11, %v660_v57 }
 0x2ed   : > { %2371 = vrot.lane.b32.xlu1 %v2340_v24, %s5530_s10 }
 0x31a   : > { %v2342_v37 = vpop.permute.xlu0 %2341 }
 0x31b   : > { %v2373_v30 = vmul.f32 %v2342_v37, %v7059_v1 }
 0x31d   : > { %4947 = vmatprep.mubr.f32.mxu0 %v2373_v30 }
 0x31e   : > { %v2344_v12 = vpop.permute.xlu0 %2343 }
 0x31f   : > { %v2374_v3 = vmul.f32 %v2344_v12, %v7088_v7 }
 0x321   : > { %4948 = vmatmul.mubr.f32.vlgmr.msra.gmra.mxu0 %v2374_v3 }
 0x323   : > { %v2346_v29 = vpop.permute.xlu1 %2345 }
 0x324   : > { %v2375_v22 = vmul.f32 %v2346_v29, %v7101_v18 }
 0x326   : > { %4950 = vmatprep.mubr.f32.mxu0 %v2375_v22 }
 0x328   : > { %v2348_v51 = vpop.permute.xlu1 %2347 }
 0x329   : > { %v2376_v2 = vmul.f32 %v2348_v51, %v7124_v62 }
 0x32b   : > { %4951 = vmatmul.mubr.f32.gmra.mxu0 %v2376_v2 }
 0x32d   : > { %v2350_v58 = vpop.permute.xlu0 %2349 }
 0x32e   : > { %v2377_v35 = vmul.f32 %v2350_v58, %v7153_v38 }
 0x330   : > { %4953 = vmatprep.mubr.f32.mxu0 %v2377_v35 }
 0x333   : > { %v2352_v48 = vpop.permute.xlu1 %2351 }
 0x334   : > { %v2378_v1 = vmul.f32 %v2352_v48, %v7180_v59 }
 0x336   : > { %4954 = vmatmul.mubr.f32.gmra.mxu0 %v2378_v1 }
 0x338   : > { %v2354_v56 = vpop.permute.xlu0 %2353 }
 0x339   : > { %v2379_v7 = vmul.f32 %v2354_v56, %v7196_v49 }
 0x33b   : > { %v2356_v60 = vpop.permute.xlu1 %2355  ;;  %4956 = vmatprep.mubr.f32.mxu0 %v2379_v7 }
 0x33c   : > { %v2380_v18 = vmul.f32 %v2356_v60, %v7212_v50 }
 0x33e   : > { %4957 = vmatmul.mubr.f32.gmra.mxu0 %v2380_v18 }
 0x340   : > { %v2358_v54 = vpop.permute.xlu0 %2357 }
 0x341   : > { %v2381_v62 = vmul.f32 %v2358_v54, %v7238_v52 }
 0x343   : > { %4959 = vmatprep.mubr.f32.mxu0 %v2381_v62 }
 0x345   : > { %v2360_v43 = vpop.permute.xlu1 %2359 }
 0x346   : > { %v2382_v38 = vmul.f32 %v2360_v43, %v7258_v45 }
 0x348   : > { %v2362_v21 = vpop.permute.xlu0 %2361  ;;  %4960 = vmatmul.mubr.f32.gmra.mxu0 %v2382_v38 }
 0x349   : > { %v2383_v13 = vmul.f32 %v2362_v21, %v7266_v8  ;;  %v7363_v8 = vld [vmem:[%s9404_s2 + $0x2] ss:$0 sm:$0xff] }
 0x34b   : > { %4962 = vmatprep.mubr.f32.mxu0 %v2383_v13 }
 0x34d   : > { %v2364_v59 = vpop.permute.xlu1 %2363 }
 0x34e   : > { %v2384_v49 = vmul.f32 %v2364_v59, %v7294_v25 }
 0x350   : > { %4963 = vmatmul.mubr.f32.gmra.mxu0 %v2384_v49 }
 0x354   : > { %v2366_v55 = vpop.permute.xlu0 %2365 }
 0x355   : > { %v2385_v50 = vmul.f32 %v2366_v55, %v7314_v61 }
 0x356   : > { %v2368_v44 = vpop.permute.xlu1 %2367 }
 0x357   : > { %v2386_v40 = vmul.f32 %v2368_v44, %v7323_v42  ;;  %4965 = vmatprep.mubr.f32.mxu0 %v2385_v50 }
 0x359   : > { %4966 = vmatmul.mubr.f32.gmra.mxu0 %v2386_v40 }
 0x35b   : > { %v2370_v52 = vpop.permute.xlu0 %2369 }
 0x35c   : > { %v2387_v16 = vmul.f32 %v2370_v52, %v2339_v0 }
 0x35e   : > { %4968 = vmatprep.mubr.f32.mxu0 %v2387_v16 }
 0x35f   : > { %v2372_v45 = vpop.permute.xlu1 %2371 }
 0x360   : > { %v2388_v10 = vmul.f32 %v2372_v45, %v2340_v24 }
 0x362   : > { %4969 = vmatmul.mubr.f32.gmra.mxu0 %v2388_v10 }
 0x3e1   : > { %v4949_v25 = vpop.f32.mrf.mxu0 }
 0x3e2   : > { %v7366_v47 = vadd.f32 %v4949_v25, %v7363_v8 }
 0x3e3   : > { %v2478_v61 = vpop.f32.mrf.mxu0 }
 0x3e4   : > { %9733 = vst [vmem:[#allocation20_spill] sm:$0xff] %v7366_v47  ;;  %v7369_v34 = vadd.f32 %v7363_v8, %v2478_v61  ;;  %v2696_v11 = vand.u32 2139095040, %v7366_v47  ;;  %v7420_v61 = vsel %vm275_vm7, 1.0, %v9511_v20 }
 0x3e5   : > { %9743 = vst [vmem:[#allocation28_spill] sm:$0xff] %v7420_v61 }
 0x3e6   : > { %9734 = vst [vmem:[#allocation18_spill] sm:$0xff] %v7369_v34  ;;  %v2697_v51 = vshrl.u32 %v2696_v11, 23  ;;  %v2592_v18 = vand.u32 2139095040, %v7369_v34  ;;  %v9754_v34 = vmov 2131351028  }
 0x3e8   : > { %v4625_v43 = vadd.s32 4294967169, %v2697_v51  ;;  %v2593_v16 = vshrl.u32 %v2592_v18, 23 }
 0x3eb   : > { %v4952_v31 = vpop.f32.mrf.mxu0 }
 0x3ec   : > { %v7372_v42 = vadd.f32 %v4952_v31, %v7363_v8  ;;  %v7422_v31 = vadd.s32 1, %v4625_v43 }
 0x3ed   : > { %v2488_v17 = vpop.f32.mrf.mxu0 }
 0x3ee   : > { %9735 = vst [vmem:[#allocation17_spill] sm:$0xff] %v7372_v42  ;;  %v7375_v26 = vadd.f32 %v7363_v8, %v2488_v17  ;;  %v2904_v0 = vand.u32 2139095040, %v7372_v42  ;;  %9744 = vst [vmem:[#allocation23_spill] sm:$0xff] %v7422_v31 }
 0x3f0   : > { %9736 = vst [vmem:[#allocation12_spill] sm:$0xff] %v7375_v26  ;;  %v2800_v27 = vand.u32 2139095040, %v7375_v26  ;;  %v2905_v24 = vshrl.u32 %v2904_v0, 23 }
 0x3f2   : > { %v2801_v37 = vshrl.u32 %v2800_v27, 23  ;;  %v4633_v2 = vadd.s32 4294967169, %v2905_v24 }
 0x3f4   : > { %v4629_v35 = vadd.s32 4294967169, %v2801_v37  ;;  %v2911_v21 = vadd.s32 1, %v4633_v2  ;;  %v7430_v37 = vadd.s32 4294967169, %v2593_v16 }
 0x3f6   : > { %v4955_v63 = vpop.f32.mrf.mxu0  ;;  %v2807_v13 = vadd.s32 1, %v4629_v35  ;;  %vm2912_vm0 = vcmp.gt.s32.totalorder %v2911_v21, 0  ;;  %9745 = vst [vmem:[#allocation27_spill] sm:$0xff] %v7430_v37 }
 0x3f7   : > { %v7378_v46 = vadd.f32 %v4955_v63, %v7363_v8 }
 0x3f8   : > { %v2498_v36 = vpop.f32.mrf.mxu0  ;;  %vm2808_vm4 = vcmp.gt.s32.totalorder %v2807_v13, 0 }
 0x3f9   : > { %9737 = vst [vmem:[#allocation24_spill] sm:$0xff] %v7378_v46  ;;  %v7381_v23 = vadd.f32 %v7363_v8, %v2498_v36  ;;  %v3112_v54 = vand.u32 2139095040, %v7378_v46  ;;  %v7437_v51 = vsel %vm2808_vm4, %v2807_v13, 0 }
 0x3fa   : > { %9747 = vst [vmem:[#allocation19_spill] sm:$0xff] %v7437_v51 }
 0x3fb   : > { %9738 = vst [vmem:[#allocation31_spill] sm:$0xff] %v7381_v23  ;;  %v3113_v45 = vshrl.u32 %v3112_v54, 23  ;;  %v3008_v17 = vand.u32 2139095040, %v7381_v23 }
 0x3fd   : > { %v4641_v27 = vadd.s32 4294967169, %v3113_v45 }
 0x3fe   : > { %v4958_v33 = vpop.f32.mrf.mxu0 }
 0x3ff   : > { %v7384_v41 = vadd.f32 %v4958_v33, %v7363_v8 }
 0x400   : > { %v2508_v19 = vpop.f32.mrf.mxu0 }
 0x401   : > { %9739 = vst [vmem:[#allocation29_spill] sm:$0xff] %v7384_v41  ;;  %v7387_v9 = vadd.f32 %v7363_v8, %v2508_v19  ;;  %v3320_v14 = vand.u32 2139095040, %v7384_v41 }
 0x403   : > { %9740 = vst [vmem:[#allocation15_spill] sm:$0xff] %v7387_v9  ;;  %v3321_v30 = vshrl.u32 %v3320_v14, 23  ;;  %v3216_v12 = vand.u32 2139095040, %v7387_v9 }
 0x405   : > { %v4649_v48 = vadd.s32 4294967169, %v3321_v30  ;;  %v3217_v7 = vshrl.u32 %v3216_v12, 23  ;;  %v3009_v30 = vshrl.u32 %v3008_v17, 23 }
 0x407   : > { %v3327_v59 = vadd.s32 1, %v4649_v48  ;;  %v4645_v50 = vadd.s32 4294967169, %v3217_v7  ;;  %v7444_v18 = vadd.s32 4294967169, %v3009_v30 }
 0x408   : > { %v4961_v39 = vpop.f32.mrf.mxu0 }
 0x409   : > { %v7390_v4 = vadd.f32 %v4961_v39, %v7363_v8  ;;  %vm3328_vm11 = vcmp.gt.s32.totalorder %v3327_v59, 0  ;;  %v3223_v39 = vadd.s32 1, %v4645_v50  ;;  %9750 = vst [vmem:[#allocation40_spill] sm:$0xff] %v7444_v18 }
 0x40a   : > { %v2518_v57 = vpop.f32.mrf.mxu0  ;;  %v7439_v2 = vsel %vm3328_vm11, %v3327_v59, 0 }
 0x40b   : > { %9741 = vst [vmem:[#allocation11_spill] sm:$0xff] %v7390_v4  ;;  %v7396_v28 = vadd.f32 %v7363_v8, %v2518_v57  ;;  %v3528_v3 = vand.u32 2139095040, %v7390_v4  ;;  %9748 = vst [vmem:[#allocation33_spill] sm:$0xff] %v7439_v2  ;;  %vm3224_vm8 = vcmp.gt.s32.totalorder %v3223_v39, 0  ;;  %v7454_v43 = vand.u32 31, %v7439_v2 }
 0x40d   : > { %9742 = vst [vmem:[#allocation21_spill] sm:$0xff] %v7396_v28  ;;  %v3529_v60 = vshrl.u32 %v3528_v3, 23  ;;  %v3424_v49 = vand.u32 2139095040, %v7396_v28  ;;  %9751 = vst [vmem:[#allocation13_spill] sm:$0xff] %v7454_v43 }
 0x40f   : > { %v4657_v44 = vadd.s32 4294967169, %v3529_v60  ;;  %v3425_v33 = vshrl.u32 %v3424_v49, 23 }
 0x410   : > { %v4964_v29 = vpop.f32.mrf.mxu0 }
 0x411   : > { %v7402_v22 = vadd.f32 %v4964_v29, %v7363_v8  ;;  %v3535_v0 = vadd.s32 1, %v4657_v44  ;;  %v7434_v29 = vsel %vm2912_vm0, %v2911_v21, 0 }
 0x412   : > { %v2528_v58 = vpop.f32.mrf.mxu0  ;;  %9746 = vst [vmem:[#allocation14_spill] sm:$0xff] %v7434_v29 }
 0x413   : > { %v3736_v1 = vand.u32 2139095040, %v7402_v22  ;;  %v7408_v56 = vadd.f32 %v7363_v8, %v2528_v58  ;;  %v9513_v3 = vand.u32 2147483647, %v7402_v22  ;;  %v4653_v58 = vadd.s32 4294967169, %v3425_v33 }
 0x414   : > { %vm3536_vm15 = vcmp.gt.s32.totalorder %v3535_v0, 0 }
 0x415   : > { %v3737_v62 = vshrl.u32 %v3736_v1, 23  ;;  %v3632_v38 = vand.u32 2139095040, %v7408_v56  ;;  %v7441_v1 = vadd.s32 1, %v4641_v27  ;;  %v7458_v21 = vsel %vm3536_vm15, %v3535_v0, 0 }
 0x416   : > { %9752 = vst [vmem:[#allocation32_spill] sm:$0xff] %v7458_v21  ;;  %v7460_v13 = vadd.s32 1, %v4653_v58 }
 0x417   : > { %v3633_v40 = vshrl.u32 %v3632_v38, 23  ;;  %v4665_v10 = vadd.s32 4294967169, %v3737_v62  ;;  %9749 = vst [vmem:[#allocation41_spill] sm:$0xff] %v7441_v1  ;;  %v7451_v62 = vand.u32 8388607, %v9513_v3  ;;  %v7456_v38 = vsel %vm3224_vm8, %v3223_v39, 0 }
 0x419   : > { %v4967_v55 = vpop.f32.mrf.mxu0  ;;  %v4661_v63 = vadd.s32 4294967169, %v3633_v40  ;;  %v3743_v14 = vadd.s32 1, %v4665_v10 }
 0x41a   : > { %v7417_v52 = vadd.f32 %v4967_v55, %v7363_v8 }
 0x41b   : > { %v2538_v25 = vpop.f32.mrf.mxu0  ;;  %v3639_v11 = vadd.s32 1, %v4661_v63  ;;  %vm3744_vm9 = vcmp.gt.s32.totalorder %v3743_v14, 0 }
 0x41c   : > { %v3944_v36 = vand.u32 2139095040, %v7417_v52  ;;  %v7427_v19 = vadd.f32 %v7363_v8, %v2538_v25  ;;  %v9515_v60 = vand.u32 2147483647, %v7417_v52  ;;  %v3745_v49 = vsel %vm3744_vm9, %v3743_v14, 0 }
 0x41d   : > { %vm3640_vm13 = vcmp.gt.s32.totalorder %v3639_v11, 0  ;;  %v7470_v25 = vand.u32 31, %v7458_v21  ;;  %v7474_v33 = vand.u32 31, %v3745_v49  ;;  %5297 = vtanh.f32 %v7417_v52 }
 0x41e   : > { %v3945_v57 = vshrl.u32 %v3944_v36, 23  ;;  %v3840_v24 = vand.u32 2139095040, %v7427_v19  ;;  %v3641_v55 = vsel %vm3640_vm13, %v3639_v11, 0  ;;  %v3948_v10 = vand.u32 8388607, %v9515_v60 }
 0x41f   : > { %v9514_v63 = vand.u32 2147483647, %v7427_v19  ;;  %v7476_v39 = vand.u32 31, %v3641_v55  ;;  %v7486_v58 = vshrl.u32 %v3745_v49, 5  ;;  %5299 = vtanh.f32 %v7427_v19 }
 0x420   : > { %v4673_v12 = vadd.s32 4294967169, %v3945_v57  ;;  %v3841_v48 = vshrl.u32 %v3840_v24, 23 }
 0x422   : > { %v3951_v35 = vadd.s32 1, %v4673_v12  ;;  %v4970_v7 = vpop.f32.mrf.mxu0  ;;  %v4669_v50 = vadd.s32 4294967169, %v3841_v48  ;;  %v3949_v12 = vor.u32 8388608, %v3948_v10  ;;  %v7491_v48 = vand.u32 8388607, %v9514_v63 }
 0x423   : > { %v7447_v54 = vadd.f32 %v4970_v7, %v7363_v8  ;;  %v7494_v7 = vsub.s32 32, %v7474_v33 }
 0x424   : > { %vm3952_vm1 = vcmp.gt.s32.totalorder %v3951_v35, 0  ;;  %v2548_v59 = vpop.f32.mrf.mxu0  ;;  %v3847_v27 = vadd.s32 1, %v4669_v50  ;;  %v7499_v50 = vsub.s32 32, %v7476_v39  ;;  %v7508_v20 = vshll.u32 %v3949_v12, 8 }
 0x425   : > { %v4152_v44 = vand.u32 2139095040, %v7447_v54  ;;  %v3953_v40 = vsel %vm3952_vm1, %v3951_v35, 0  ;;  %v7464_v16 = vadd.f32 %v7363_v8, %v2548_v59  ;;  %v9517_v45 = vand.u32 2147483647, %v7447_v54 }
 0x426   : > { %v7480_v57 = vand.u32 31, %v3953_v40  ;;  %v7496_v59 = vshrl.u32 %v3641_v55, 5  ;;  %vm3848_vm5 = vcmp.gt.s32.totalorder %v3847_v27, 0  ;;  %v7510_v55 = vshrl.u32 %v3953_v40, 5 }
 0x427   : > { %v4153_v17 = vshrl.u32 %v4152_v44, 23  ;;  %v4048_v8 = vand.u32 2139095040, %v7464_v16  ;;  %v4156_v11 = vand.u32 8388607, %v9517_v45  ;;  %v9516_v30 = vand.u32 2147483647, %v7464_v16 }
 0x428   : > { %v7502_v10 = vsub.s32 32, %v7480_v57  ;;  %5301 = vtanh.f32 %v7447_v54  ;;  %v7514_v0 = vsel %vm3848_vm5, %v3847_v27, 0  ;;  %v9753_v40 = vmov 2475754826  }
 0x429   : > { %v4681_v14 = vadd.s32 4294967169, %v4153_v17  ;;  %v4049_v24 = vshrl.u32 %v4048_v8, 23  ;;  %v4157_v49 = vor.u32 8388608, %v4156_v11  ;;  %5303 = vtanh.f32 %v7464_v16 }
 0x42a   : > { %v7519_v11 = vshll.u32 %v9583_v15, %v7480_v57  ;;  %v7525_v36 = vshrl.u32 %v9753_v40, %v7502_v10  ;;  %v7539_v18 = vpop.eup %5297  ;;  %vm4151_vm9 = vcmp.lt.s32.totalorder %v7447_v54, 0  ;;  %vm3976_vm1 = vcmp.lt.s32.totalorder %v7510_v55, 4 }
 0x42b   : > { %v4159_v35 = vadd.s32 1, %v4681_v14  ;;  %v4677_v44 = vadd.s32 4294967169, %v4049_v24  ;;  %v7506_v14 = vand.u32 8388607, %v9516_v30  ;;  %v7521_v12 = vshll.u32 %v4157_v49, 8 }
 0x42c   : > { %v7541_v2 = vpop.eup %5299  ;;  %vm3973_vm5 = vcmp.lt.s32.totalorder %v7510_v55, 1 }
 0x42d   : > { %vm4160_vm12 = vcmp.gt.s32.totalorder %v4159_v35, 0  ;;  %v4055_v8 = vadd.s32 1, %v4677_v44  ;;  %9755 = vst [vmem:[#allocation34_spill] sm:$0xff] %v7541_v2  ;;  %v9756_v4 = vor.u32 8388608, %v7506_v14 }
 0x42e   : > { %v4161_v17 = vsel %vm4160_vm12, %v4159_v35, 0  ;;  %vm3975_vm12 = vcmp.lt.s32.totalorder %v7510_v55, 3 }
 0x42f   : > { %v4163_v3 = vand.u32 31, %v4161_v17  ;;  %vm4056_vm6 = vcmp.gt.s32.totalorder %v4055_v8, 0  ;;  %v4162_v63 = vshrl.u32 %v4161_v17, 5 }
 0x430   : > { %v4057_v44 = vsel %vm4056_vm6, %v4055_v8, 0  ;;  %vm3974_vm6 = vcmp.lt.s32.totalorder %v7510_v55, 2 }
 0x431   : > { %v4164_v35 = vsub.s32 32, %v4163_v3  ;;  %v4059_v60 = vand.u32 31, %v4057_v44  ;;  %v4166_v27 = vshll.u32 %v9583_v15, %v4163_v3  ;;  %v4169_v45 = vshll.u32 %v9753_v40, %v4163_v3 }
 0x432   : > { %v4172_v8 = vshll.u32 %v9754_v34, %v4163_v3  ;;  %v4175_v26 = vshll.u32 %v9567_v6, %v4163_v3  ;;  %v4178_v24 = vshll.u32 %v9569_v5, %v4163_v3  ;;  %vm4181_vm14 = vcmp.lt.s32.totalorder %v4162_v63, 1 }
 0x433   : > { %v4167_v30 = vshrl.u32 %v9753_v40, %v4164_v35  ;;  %v4170_v47 = vshrl.u32 %v9754_v34, %v4164_v35  ;;  %v4165_v49 = vshrl.u32 %v9583_v15, %v4164_v35  ;;  %v4173_v37 = vshrl.u32 %v9567_v6, %v4164_v35 }
 0x434   : > { %v4176_v17 = vshrl.u32 %v9569_v5, %v4164_v35  ;;  %v4179_v23 = vshrl.u32 %v9584_v53, %v4164_v35  ;;  %v4060_v46 = vsub.s32 32, %v4059_v60  ;;  %vm4184_vm3 = vcmp.lt.s32.totalorder %v4162_v63, 4 }
 0x435   : > { %v4168_v42 = vor.u32 %v4167_v30, %v4166_v27  ;;  %v4171_v31 = vor.u32 %v4170_v47, %v4169_v45  ;;  %v4174_v51 = vor.u32 %v4173_v37, %v4172_v8  ;;  %vm4183_vm2 = vcmp.lt.s32.totalorder %v4162_v63, 3 }
 0x436   : > { %v4177_v29 = vor.u32 %v4176_v17, %v4175_v26  ;;  %v4180_v9 = vor.u32 %v4179_v23, %v4178_v24  ;;  %vm4182_vm7 = vcmp.lt.s32.totalorder %v4162_v63, 2  ;;  %v7543_v27 = vshrl.u32 %v4057_v44, 5 }
 0x437   : > { %v4185_v43 = vsel %vm4181_vm14, %v4165_v49, %v4168_v42  ;;  %v4189_v41 = vsel %vm4181_vm14, %v4168_v42, %v4171_v31  ;;  %v4186_v1 = vsel %vm4184_vm3, %v4174_v51, 2102212464  ;;  %v4193_v47 = vsel %vm4181_vm14, %v4171_v31, %v4174_v51  ;;  %v7551_v49 = vpop.eup %5301 }
 0x438   : > { %v4190_v30 = vsel %vm4184_vm3, %v4177_v29, 920167782  ;;  %v4187_v3 = vsel %vm4183_vm2, %v4171_v31, %v4186_v1  ;;  %v4194_v35 = vsel %vm4184_vm3, %v4180_v9, 1326507024  ;;  %v4062_v42 = vshll.u32 %v9583_v15, %v4059_v60 }
 0x439   : > { %v4191_v45 = vsel %vm4183_vm2, %v4174_v51, %v4190_v30  ;;  %v4188_v26 = vsel %vm4182_vm7, %v4185_v43, %v4187_v3  ;;  %v4195_v8 = vsel %vm4183_vm2, %v4177_v29, %v4194_v35  ;;  %v4063_v9 = vshrl.u32 %v9753_v40, %v4060_v46 }
 0x43a   : > { %v4192_v37 = vsel %vm4182_vm7, %v4189_v41, %v4191_v45  ;;  %v4196_v17 = vsel %vm4182_vm7, %v4193_v47, %v4195_v8  ;;  %v4065_v51 = vshll.u32 %v9753_v40, %v4059_v60  ;;  %v7559_v41 = vpop.eup %5303  ;;  %v4066_v29 = vshrl.u32 %v9754_v34, %v4060_v46 }
 0x43b   : > { %v7546_v23 = vmul.u32.u64.low %v7521_v12, %v4192_v37  ;;  %v7547_v24 = vmul.u32.u64.high %v7521_v12, %v4192_v37, %v7546_v23  ;;  %v7554_v63 = vmul.u32.u64.low %v7521_v12, %v4196_v17  ;;  %v7555_v31 = vmul.u32.u64.high %v7521_v12, %v4196_v17, %v7554_v63 }
 0x43c   : > { %v4068_v1 = vshll.u32 %v9754_v34, %v4059_v60  ;;  %v4069_v43 = vshrl.u32 %v9567_v6, %v4060_v46  ;;  %v4071_v44 = vshll.u32 %v9567_v6, %v4059_v60  ;;  %v4064_v30 = vor.u32 %v4063_v9, %v4062_v42 }
 0x43d   : > { %v4072_v47 = vshrl.u32 %v9569_v5, %v4060_v46  ;;  %v4074_v3 = vshll.u32 %v9569_v5, %v4059_v60  ;;  %v4075_v45 = vshrl.u32 %v9584_v53, %v4060_v46  ;;  %v4207_v35 = vadd.s32 1, %v7547_v24 }
 0x43e   : > { %v4067_v37 = vor.u32 %v4066_v29, %v4065_v51  ;;  %v4070_v8 = vor.u32 %v4069_v43, %v4068_v1  ;;  %v3962_v17 = vshrl.u32 %v9754_v34, %v7502_v10  ;;  %v4204_v63 = vmul.u32 %v7521_v12, %v4188_v26 }
 0x43f   : > { %vm4206_vm0 = vc.u32 %v7555_v31, %v7546_v23  ;;  %v4073_v28 = vor.u32 %v4072_v47, %v4071_v44  ;;  %v4076_v42 = vor.u32 %v4075_v45, %v4074_v3  ;;  %v4061_v60 = vshrl.u32 %v9583_v15, %v4060_v46 }
 0x440   : > { %v4208_v9 = vsel %vm4206_vm0, %v4207_v35, %v7547_v24  ;;  %vm4077_vm4 = vcmp.lt.s32.totalorder %v7543_v27, 1  ;;  %v4093_v51 = vshll.u32 %v9756_v4, 8  ;;  %vm4079_vm11 = vcmp.lt.s32.totalorder %v7543_v27, 3 }
 0x441   : > { %v4209_v29 = vadd.s32 %v4208_v9, %v4204_v63  ;;  %vm4080_vm8 = vcmp.lt.s32.totalorder %v7543_v27, 4  ;;  %v4085_v12 = vsel %vm4077_vm4, %v4064_v30, %v4067_v37  ;;  %v4089_v43 = vsel %vm4077_vm4, %v4067_v37, %v4070_v8 }
 0x442   : > { %v4082_v26 = vsel %vm4080_vm8, %v4070_v8, 2102212464  ;;  %v4086_v1 = vsel %vm4080_vm8, %v4073_v28, 920167782  ;;  %v4090_v44 = vsel %vm4080_vm8, %v4076_v42, 1326507024  ;;  %v4081_v4 = vsel %vm4077_vm4, %v4061_v60, %v4064_v30 }
 0x443   : > { %v4210_v47 = vadd.s32 536870912, %v4209_v29  ;;  %vm4078_vm15 = vcmp.lt.s32.totalorder %v7543_v27, 2  ;;  %v4087_v46 = vsel %vm4079_vm11, %v4070_v8, %v4086_v1  ;;  %v4091_v14 = vsel %vm4079_vm11, %v4073_v28, %v4090_v44 }
 0x444   : > { %v4088_v24 = vsel %vm4078_vm15, %v4085_v12, %v4087_v46  ;;  %v4092_v3 = vsel %vm4078_vm15, %v4089_v43, %v4091_v14  ;;  %v3965_v45 = vshrl.u32 %v9567_v6, %v7502_v10  ;;  %v4083_v63 = vsel %vm4079_vm11, %v4067_v37, %v4082_v26 }
 0x445   : > { %v4211_v35 = vshrl.u32 %v4210_v47, 30  ;;  %v7594_v42 = vmul.u32.u64.low %v4093_v51, %v4092_v3  ;;  %v7595_v9 = vmul.u32.u64.high %v4093_v51, %v4092_v3, %v7594_v42  ;;  %v3967_v8 = vshll.u32 %v9567_v6, %v7480_v57 }
 0x446   : > { %v7598_v28 = vmul.u32.u64.low %v4093_v51, %v4088_v24  ;;  %v7599_v30 = vmul.u32.u64.high %v4093_v51, %v4088_v24, %v7598_v28  ;;  %v3968_v60 = vshrl.u32 %v9569_v5, %v7502_v10  ;;  %v3961_v1 = vshll.u32 %v9753_v40, %v7480_v57 }
 0x447   : > { %v4212_v12 = vshll.u32 %v4211_v35, 30  ;;  %v3964_v37 = vshll.u32 %v9754_v34, %v7480_v57  ;;  %v3971_v26 = vshrl.u32 %v9584_v53, %v7502_v10  ;;  %v4084_v43 = vsel %vm4078_vm15, %v4081_v4, %v4083_v63 }
 0x448   : > { %v3960_v44 = vor.u32 %v7525_v36, %v7519_v11  ;;  %v3969_v47 = vor.u32 %v3968_v60, %v3967_v8  ;;  %v3970_v46 = vshll.u32 %v9569_v5, %v7480_v57  ;;  %vm4102_vm13 = vc.u32 %v7595_v9, %v7598_v28 }
 0x449   : > { %v7618_v14 = vsub.s32 %v4209_v29, %v4212_v12  ;;  %v3963_v24 = vor.u32 %v3962_v17, %v3961_v1  ;;  %v3966_v3 = vor.u32 %v3965_v45, %v3964_v37  ;;  %v7623_v42 = vshrl.u32 %v7514_v0, 5 }
 0x44a   : > { %v4103_v27 = vadd.s32 1, %v7599_v30  ;;  %v3957_v4 = vshrl.u32 %v9583_v15, %v7502_v10  ;;  %v3972_v36 = vor.u32 %v3971_v26, %v3970_v46  ;;  %v4235_v63 = vsub.s32 4, %v4211_v35 }
 0x44b   : > { %v4215_v11 = vsub.s32 0, %v7618_v14  ;;  %v4100_v57 = vmul.u32 %v4093_v51, %v4084_v43  ;;  %v3982_v17 = vsel %vm3976_vm1, %v3969_v47, 920167782  ;;  %v3978_v60 = vsel %vm3976_vm1, %v3966_v3, 2102212464 }
 0x44c   : > { %v4104_v29 = vsel %vm4102_vm13, %v4103_v27, %v7599_v30  ;;  %v3981_v12 = vsel %vm3973_vm5, %v3960_v44, %v3963_v24  ;;  %v7635_v10 = vand.u32 31, %v7514_v0  ;;  %v3983_v51 = vsel %vm3975_vm12, %v3966_v3, %v3982_v17 }
 0x44d   : > { %v4682_v45 = vmin.u32 %v4215_v11, %v7618_v14  ;;  %v4105_v8 = vadd.s32 %v4104_v29, %v4100_v57  ;;  %v3985_v1 = vsel %vm3973_vm5, %v3963_v24, %v3966_v3  ;;  %v3986_v37 = vsel %vm3976_vm1, %v3972_v36, 1326507024 }
 0x44e   : > { %v4236_v30 = vsel %vm4151_vm9, %v4235_v63, %v4211_v35  ;;  %v3977_v43 = vsel %vm3973_vm5, %v3957_v4, %v3960_v44  ;;  %v3979_v27 = vsel %vm3975_vm12, %v3963_v24, %v3978_v60  ;;  %v3984_v11 = vsel %vm3974_vm6, %v3981_v12, %v3983_v51 }
 0x44f   : > { %v4217_v26 = vclz %v4682_v45  ;;  %v4106_v46 = vadd.s32 536870912, %v4105_v8  ;;  %v3987_v0 = vsel %vm3975_vm12, %v3969_v47, %v3986_v37  ;;  %v9757_v17 = vand.u32 2147483647, %v7447_v54 }
 0x450   : > { %v3988_v29 = vsel %vm3974_vm6, %v3985_v1, %v3987_v0  ;;  %v7647_v3 = vmul.u32.u64.low %v7508_v20, %v3984_v11  ;;  %v7648_v36 = vmul.u32.u64.high %v7508_v20, %v3984_v11, %v7647_v3  ;;  %vm4047_vm2 = vcmp.lt.s32.totalorder %v7464_v16, 0 }
 0x451   : > { %v4683_v57 = vadd.s32 4294967294, %v4217_v26  ;;  %vm7652_vm14 = vcmp.le.f32.partialorder %v9757_v17, 0.7853982  ;;  %v4107_v44 = vshrl.u32 %v4106_v46, 30  ;;  %v3980_v47 = vsel %vm3974_vm6, %v3977_v43, %v3979_v27 }
 0x452   : > { %v7657_v4 = vmul.u32.u64.low %v7508_v20, %v3988_v29  ;;  %v7658_v24 = vmul.u32.u64.high %v7508_v20, %v3988_v29, %v7657_v4  ;;  %v4238_v55 = vsel %vm7652_vm14, 0, %v4236_v30  ;;  %v3852_v63 = vsub.s32 32, %v7635_v10 }
 0x453   : > { %vm4684_vm3 = vcmp.lt.s32.totalorder %v4683_v57, 0  ;;  %v4108_v60 = vshll.u32 %v4107_v44, 30  ;;  %v7666_v12 = vadd.f32 %v7539_v18, %v7420_v61  ;;  %v4205_v51 = vadd.s32 %v7546_v23, %v7555_v31 }
 0x454   : > { %v4220_v45 = vsel %vm4684_vm3, 0, %v4683_v57  ;;  %v3999_v26 = vadd.s32 1, %v7648_v36  ;;  %v4242_v46 = vadd.s32 3, %v4238_v55  ;;  %v9760_v30 = vand.u32 2147483647, %v7464_v16 }
 0x455   : > { %v4221_v1 = vsub.s32 32, %v4220_v45  ;;  %v4225_v37 = vsub.s32 4294967266, %v4220_v45  ;;  %v7677_v27 = vsub.s32 %v4105_v8, %v4108_v60  ;;  %v3996_v11 = vmul.u32 %v7508_v20, %v3980_v47 }
 0x456   : > { %vm7673_vm7 = vcmp.le.f32.partialorder %v9760_v30, 0.7853982  ;;  %vm3998_vm0 = vc.u32 %v7658_v24, %v7647_v3  ;;  %v4222_v18 = vshll.u32 %v7618_v14, %v4220_v45  ;;  %v7685_v57 = vadd.f32 %v7551_v49, %v7420_v61 }
 0x457   : > { %v4223_v23 = vshrl.u32 %v4205_v51, %v4221_v1  ;;  %v4226_v31 = vadd.s32 127, %v4225_v37  ;;  %v4000_v0 = vsel %vm3998_vm0, %v3999_v26, %v7648_v36  ;;  %v4111_v29 = vsub.s32 0, %v7677_v27 }
 0x458   : > { %v4131_v17 = vsub.s32 4, %v4107_v44  ;;  %v4001_v4 = vadd.s32 %v4000_v0, %v3996_v11  ;;  %v7690_v20 = vadd.f32 %v7559_v41, %v7420_v61  ;;  %v4101_v14 = vadd.s32 %v7598_v28, %v7595_v9 }
 0x459   : > { %v4224_v8 = vor.u32 %v4223_v23, %v4222_v18  ;;  %v4227_v55 = vshll.u32 %v4226_v31, 23  ;;  %v7694_v47 = vand.u32 3, %v4242_v46  ;;  %v4678_v36 = vmin.u32 %v4111_v29, %v7677_v27 }
 0x45a   : > { %v4002_v45 = vadd.s32 536870912, %v4001_v4  ;;  %v3853_v49 = vshrl.u32 %v9583_v15, %v3852_v63  ;;  %v3854_v51 = vshll.u32 %v9583_v15, %v7635_v10  ;;  %v3855_v1 = vshrl.u32 %v9753_v40, %v3852_v63 }
 0x45b   : > { %v4228_v60 = vor.u32 4788187, %v4227_v55  ;;  %v3858_v37 = vshrl.u32 %v9754_v34, %v3852_v63  ;;  %v4113_v41 = vclz %v4678_v36  ;;  %v7704_v26 = vsel %vm4047_vm2, %v4131_v17, %v4107_v44 }
 0x45c   : > { %v3861_v9 = vshrl.u32 %v9567_v6, %v3852_v63  ;;  %v3864_v28 = vshrl.u32 %v9569_v5, %v3852_v63  ;;  %v4231_v30 = vcvt.s32.f32 %v4224_v8  ;;  %v7708_v11 = vshrl.u32 %v4002_v45, 30 }
 0x45d   : > { %v4229_v46 = vand.u32 2147483647, %v4228_v60  ;;  %v3857_v18 = vshll.u32 %v9753_v40, %v7635_v10  ;;  %v4679_v23 = vadd.s32 4294967294, %v4113_v41  ;;  %v7713_v31 = vadd.s32 %v7647_v3, %v7658_v24 }
 0x45e   : > { %v3860_v0 = vshll.u32 %v9754_v34, %v7635_v10  ;;  %v3863_v44 = vshll.u32 %v9567_v6, %v7635_v10  ;;  %v4134_v17 = vsel %vm7673_vm7, 0, %v7704_v26  ;;  %v4004_v8 = vshll.u32 %v7708_v11, 30 }
 0x45f   : > { %v4232_v29 = vmul.f32 %v4231_v30, %v4229_v46  ;;  %v3856_v55 = vor.u32 %v3855_v1, %v3854_v51  ;;  %vm4680_vm4 = vcmp.lt.s32.totalorder %v4679_v23, 0  ;;  %v3859_v36 = vor.u32 %v3858_v37, %v3857_v18 }
 0x460   : > { %v3862_v45 = vor.u32 %v3861_v9, %v3860_v0  ;;  %v3865_v60 = vor.u32 %v3864_v28, %v3863_v44  ;;  %v4116_v24 = vsel %vm4680_vm4, 0, %v4679_v23  ;;  %v7723_v41 = vsub.s32 %v4001_v4, %v4004_v8 }
 0x461   : > { %v4233_v3 = vxor.u32 2147483648, %v4232_v29  ;;  %v3867_v2 = vshrl.u32 %v9584_v53, %v3852_v63  ;;  %v4117_v61 = vsub.s32 32, %v4116_v24  ;;  %v4121_v21 = vsub.s32 4294967266, %v4116_v24 }
 0x462   : > { %v3866_v46 = vshll.u32 %v9569_v5, %v7635_v10  ;;  %vm3869_vm11 = vcmp.lt.s32.totalorder %v7623_v42, 1  ;;  %v4007_v1 = vsub.s32 0, %v7723_v41  ;;  %vm3870_vm8 = vcmp.lt.s32.totalorder %v7623_v42, 2 }
 0x463   : > { %v4234_v51 = vsel %vm4151_vm9, %v4233_v3, %v4232_v29  ;;  %vm3872_vm15 = vcmp.lt.s32.totalorder %v7623_v42, 4  ;;  %v4118_v4 = vshll.u32 %v7677_v27, %v4116_v24  ;;  %v4119_v37 = vshrl.u32 %v4101_v14, %v4117_v61 }
 0x464   : > { %v4237_v63 = vsel %vm7652_vm14, %v7447_v54, %v4234_v51  ;;  %v4122_v26 = vadd.s32 127, %v4121_v21  ;;  %vm3943_vm13 = vcmp.lt.s32.totalorder %v7417_v52, 0  ;;  %v4674_v10 = vmin.u32 %v4007_v1, %v7723_v41 }
 0x465   : > { %5305 = vcosq.f32 %v4237_v63  ;;  %v3868_v9 = vor.u32 %v3867_v2, %v3866_v46  ;;  %v3874_v28 = vsel %vm3872_vm15, %v3862_v45, 2102212464  ;;  %v4120_v30 = vor.u32 %v4119_v37, %v4118_v4 }
 0x466   : > { %5307 = vsinq.f32 %v4237_v63  ;;  %v4123_v18 = vshll.u32 %v4122_v26, 23  ;;  %v4027_v23 = vsub.s32 4, %v7708_v11  ;;  %v9763_v35 = vand.u32 2147483647, %v7417_v52 }
 0x467   : > { %v4009_v61 = vclz %v4674_v10  ;;  %vm3871_vm1 = vcmp.lt.s32.totalorder %v7623_v42, 3  ;;  %v3873_v2 = vsel %vm3869_vm11, %v3853_v49, %v3856_v55  ;;  %v3877_v21 = vsel %vm3869_vm11, %v3856_v55, %v3859_v36 }
 0x468   : > { %vm7745_vm9 = vcmp.le.f32.partialorder %v9763_v35, 0.7853982  ;;  %v4124_v14 = vor.u32 4788187, %v4123_v18  ;;  %v3875_v0 = vsel %vm3871_vm1, %v3859_v36, %v3874_v28  ;;  %v3878_v44 = vsel %vm3872_vm15, %v3865_v60, 920167782 }
 0x469   : > { %v3881_v29 = vsel %vm3869_vm11, %v3859_v36, %v3862_v45  ;;  %v4675_v8 = vadd.s32 4294967294, %v4009_v61  ;;  %v3879_v3 = vsel %vm3871_vm1, %v3862_v45, %v3878_v44  ;;  %v3882_v24 = vsel %vm3872_vm15, %v3868_v9, 1326507024 }
 0x46a   : > { %v9766_v46 = vor.u32 8388608, %v7491_v48  ;;  %v4125_v49 = vand.u32 2147483647, %v4124_v14  ;;  %v4127_v1 = vcvt.s32.f32 %v4120_v30  ;;  %v3880_v55 = vsel %vm3870_vm8, %v3877_v21, %v3879_v3 }
 0x46b   : > { %v3883_v63 = vsel %vm3871_vm1, %v3865_v60, %v3882_v24  ;;  %vm4676_vm5 = vcmp.lt.s32.totalorder %v4675_v8, 0  ;;  %v4028_v30 = vsel %vm3943_vm13, %v4027_v23, %v7708_v11  ;;  %v3876_v60 = vsel %vm3870_vm8, %v3873_v2, %v3875_v0 }
 0x46c   : > { %v3885_v51 = vshll.u32 %v9766_v46, 8  ;;  %v3884_v4 = vsel %vm3870_vm8, %v3881_v29, %v3883_v63  ;;  %v4128_v45 = vmul.f32 %v4127_v1, %v4125_v49  ;;  %v4012_v26 = vsel %vm4676_vm5, 0, %v4675_v8 }
 0x46d   : > { %v4013_v48 = vsub.s32 32, %v4012_v26  ;;  %v4017_v28 = vsub.s32 4294967266, %v4012_v26  ;;  %vm4244_vm12 = vcmp.lt.s32.totalorder %v7694_v47, 2  ;;  %vm4245_vm6 = vcmp.eq.s32.totalorder %v7694_v47, 0 }
 0x46e   : > { %v7766_v37 = vmul.u32.u64.low %v3885_v51, %v3880_v55  ;;  %v7767_v36 = vmul.u32.u64.high %v3885_v51, %v3880_v55, %v7766_v37  ;;  %v7770_v10 = vmul.u32.u64.low %v3885_v51, %v3884_v4  ;;  %v7771_v9 = vmul.u32.u64.high %v3885_v51, %v3884_v4, %v7770_v10 }
 0x46f   : > { %v4129_v18 = vxor.u32 2147483648, %v4128_v45  ;;  %v4138_v35 = vadd.s32 3, %v4134_v17  ;;  %vm4241_vm14 = vweird.f32 %v7447_v54  ;;  %v4014_v61 = vshll.u32 %v7723_v41, %v4012_v26 }
 0x470   : > { %v4015_v21 = vshrl.u32 %v7713_v31, %v4013_v48  ;;  %v4018_v14 = vadd.s32 127, %v4017_v28  ;;  %v3895_v44 = vadd.s32 1, %v7767_v36  ;;  %v4030_v42 = vsel %vm7745_vm9, 0, %v4028_v30 }
 0x471   : > { %v4130_v11 = vsel %vm4047_vm2, %v4129_v18, %v4128_v45  ;;  %v3892_v23 = vmul.u32 %v3885_v51, %v3876_v60  ;;  %vm3894_vm3 = vc.u32 %v7771_v9, %v7766_v37  ;;  %vm4248_vm0 = vcmp.eq.s32.totalorder %v7694_v47, 2 }
 0x472   : > { %v4133_v17 = vsel %vm7673_vm7, %v7464_v16, %v4130_v11  ;;  %v4016_v41 = vor.u32 %v4015_v21, %v4014_v61  ;;  %v4019_v2 = vshll.u32 %v4018_v14, 23  ;;  %v3896_v31 = vsel %vm3894_vm3, %v3895_v44, %v7767_v36  ;;  %v5306_v0 = vpop.eup %5305 }
 0x473   : > { %5309 = vcosq.f32 %v4133_v17  ;;  %v7795_v29 = vand.u32 3, %v4138_v35  ;;  %v3897_v8 = vadd.s32 %v3896_v31, %v3892_v23  ;;  %v5308_v3 = vpop.eup %5307  ;;  %v4249_v24 = vxor.u32 2147483648, %v5306_v0 }
 0x474   : > { %5311 = vsinq.f32 %v4133_v17  ;;  %v4020_v46 = vor.u32 4788187, %v4019_v2  ;;  %v4034_v51 = vadd.s32 3, %v4030_v42  ;;  %v4246_v49 = vxor.u32 2147483648, %v5308_v3 }
 0x475   : > { %v3898_v1 = vadd.s32 536870912, %v3897_v8  ;;  %v3750_v43 = vshll.u32 %v9583_v15, %v7474_v33  ;;  %v3751_v55 = vshrl.u32 %v9753_v40, %v7494_v7  ;;  %v4250_v63 = vsel %vm4248_vm0, %v4249_v24, %v5308_v3 }
 0x476   : > { %v4021_v4 = vand.u32 2147483647, %v4020_v46  ;;  %v4023_v36 = vcvt.s32.f32 %v4016_v41  ;;  %v3760_v45 = vshrl.u32 %v9569_v5, %v7494_v7  ;;  %v4247_v26 = vsel %vm4245_vm6, %v5306_v0, %v4246_v49 }
 0x477   : > { %v3899_v10 = vshrl.u32 %v3898_v1, 30  ;;  %v3754_v48 = vshrl.u32 %v9754_v34, %v7494_v7  ;;  %v3757_v28 = vshrl.u32 %v9567_v6, %v7494_v7  ;;  %v4251_v30 = vsel %vm4244_vm12, %v4247_v26, %v4250_v63 }
 0x478   : > { %v4024_v60 = vmul.f32 %v4023_v36, %v4021_v4  ;;  %vm3839_vm2 = vcmp.lt.s32.totalorder %v7427_v19, 0  ;;  %v3759_v18 = vshll.u32 %v9567_v6, %v7474_v33  ;;  %v3763_v35 = vshrl.u32 %v9584_v53, %v7494_v7 }
 0x479   : > { %v4252_v61 = vsel %vm4241_vm14, nan, %v4251_v30  ;;  %v3900_v21 = vshll.u32 %v3899_v10, 30  ;;  %v3753_v14 = vshll.u32 %v9753_v40, %v7474_v33  ;;  %v3756_v47 = vshll.u32 %v9754_v34, %v7474_v33 }
 0x47a   : > { %v7825_v44 = vsel %vm274_vm10, %v7685_v57, %v4252_v61  ;;  %v4025_v11 = vxor.u32 2147483648, %v4024_v60  ;;  %v3761_v42 = vor.u32 %v3760_v45, %v3759_v18  ;;  %v3762_v23 = vshll.u32 %v9569_v5, %v7474_v33 }
 0x47b   : > { %4301 = vrot.lane.b32.xlu0 %v7825_v44, %s5531_s15  ;;  %vm4141_vm7 = vcmp.eq.s32.totalorder %v7795_v29, 0  ;;  %v7832_v54 = vsub.s32 %v3897_v8, %v3900_v21  ;;  %v3752_v17 = vor.u32 %v3751_v55, %v3750_v43  ;;  %v3755_v41 = vor.u32 %v3754_v48, %v3753_v14 }
 0x47c   : > { %v3758_v2 = vor.u32 %v3757_v28, %v3756_v47  ;;  %vm4140_vm4 = vcmp.lt.s32.totalorder %v7795_v29, 2  ;;  %vm4144_vm11 = vcmp.eq.s32.totalorder %v7795_v29, 2  ;;  %v4026_v57 = vsel %vm3943_vm13, %v4025_v11, %v4024_v60 }
 0x47d   : > { %v7838_v31 = vand.u32 3, %v4034_v51  ;;  %v3764_v33 = vor.u32 %v3763_v35, %v3762_v23  ;;  %vm4137_vm8 = vweird.f32 %v7464_v16  ;;  %v4029_v0 = vsel %vm7745_vm9, %v7417_v52, %v4026_v57 }
 0x47e   : > { %v3903_v8 = vsub.s32 0, %v7832_v54  ;;  %v3923_v3 = vsub.s32 4, %v3899_v10  ;;  %vm3768_vm15 = vcmp.lt.s32.totalorder %v7486_v58, 4  ;;  %5313 = vcosq.f32 %v4029_v0 }
 0x47f   : > { %vm3765_vm1 = vcmp.lt.s32.totalorder %v7486_v58, 1  ;;  %vm3767_vm5 = vcmp.lt.s32.totalorder %v7486_v58, 3  ;;  %v3774_v24 = vsel %vm3768_vm15, %v3761_v42, 920167782  ;;  %5315 = vsinq.f32 %v4029_v0 }
 0x480   : > { %v9767_v46 = vand.u32 2147483647, %v7427_v19  ;;  %v4670_v27 = vmin.u32 %v3903_v8, %v7832_v54  ;;  %v3773_v49 = vsel %vm3765_vm1, %v3752_v17, %v3755_v41  ;;  %v3775_v1 = vsel %vm3767_vm5, %v3758_v2, %v3774_v24  ;;  %v5310_v43 = vpop.eup %5309 }
 0x481   : > { %v3749_v55 = vshrl.u32 %v9583_v15, %v7494_v7  ;;  %vm3766_vm9 = vcmp.lt.s32.totalorder %v7486_v58, 2  ;;  %v3777_v63 = vsel %vm3765_vm1, %v3755_v41, %v3758_v2  ;;  %v3778_v4 = vsel %vm3768_vm15, %v3764_v33, 1326507024  ;;  %v5312_v36 = vpop.eup %5311 }
 0x482   : > { %vm7852_vm13 = vcmp.le.f32.partialorder %v9767_v46, 0.7853982  ;;  %v4145_v45 = vxor.u32 2147483648, %v5310_v43  ;;  %v3905_v26 = vclz %v4670_v27  ;;  %v7870_v48 = vsel %vm3839_vm2, %v3923_v3, %v3899_v10 }
 0x483   : > { %v3770_v28 = vsel %vm3768_vm15, %v3758_v2, 2102212464  ;;  %v4142_v30 = vxor.u32 2147483648, %v5312_v36  ;;  %v3776_v7 = vsel %vm3766_vm9, %v3773_v49, %v3775_v1  ;;  %v3779_v60 = vsel %vm3767_vm5, %v3761_v42, %v3778_v4 }
 0x484   : > { %v9770_v18 = vor.u32 8388608, %v7451_v62  ;;  %v4146_v61 = vsel %vm4144_vm11, %v4145_v45, %v5312_v36  ;;  %v4671_v21 = vadd.s32 4294967294, %v3905_v26  ;;  %v3769_v10 = vsel %vm3765_vm1, %v3749_v55, %v3752_v17 }
 0x485   : > { %v3780_v14 = vsel %vm3766_vm9, %v3777_v63, %v3779_v60  ;;  %v4143_v47 = vsel %vm4141_vm7, %v5310_v43, %v4142_v30  ;;  %v3771_v11 = vsel %vm3767_vm5, %v3755_v41, %v3770_v28  ;;  %vm4037_vm6 = vcmp.eq.s32.totalorder %v7838_v31, 0 }
 0x486   : > { %v3781_v35 = vshll.u32 %v9770_v18, 8  ;;  %v4147_v62 = vsel %vm4140_vm4, %v4143_v47, %v4146_v61  ;;  %vm4672_vm12 = vcmp.lt.s32.totalorder %v4671_v21, 0  ;;  %v3893_v33 = vadd.s32 %v7766_v37, %v7771_v9 }
 0x487   : > { %v4148_v17 = vsel %vm4137_vm8, nan, %v4147_v62  ;;  %v3908_v41 = vsel %vm4672_vm12, 0, %v4671_v21  ;;  %vm4036_vm14 = vcmp.lt.s32.totalorder %v7838_v31, 2  ;;  %v3772_v3 = vsel %vm3766_vm9, %v3769_v10, %v3771_v11 }
 0x488   : > { %v7890_v42 = vmul.u32.u64.low %v3781_v35, %v3780_v14  ;;  %v7891_v23 = vmul.u32.u64.high %v3781_v35, %v3780_v14, %v7890_v42  ;;  %v7895_v2 = vmul.u32.u64.low %v3781_v35, %v3776_v7  ;;  %v7896_v57 = vmul.u32.u64.high %v3781_v35, %v3776_v7, %v7895_v2 }
 0x489   : > { %v7907_v0 = vsel %vm274_vm10, %v7690_v20, %v4148_v17  ;;  %v3909_v29 = vsub.s32 32, %v3908_v41  ;;  %v3913_v8 = vsub.s32 4294967266, %v3908_v41  ;;  %vm4033_vm3 = vweird.f32 %v7417_v52 }
 0x48a   : > { %4299 = vrot.lane.b32.xlu1 %v7907_v0, %s5531_s15  ;;  %vm4040_vm0 = vcmp.eq.s32.totalorder %v7838_v31, 2  ;;  %v3910_v16 = vshll.u32 %v7832_v54, %v3908_v41  ;;  %v3926_v20 = vsel %vm7852_vm13, 0, %v7870_v48  ;;  %vm3790_vm7 = vc.u32 %v7891_v23, %v7895_v2 }
 0x48b   : > { %v3911_v37 = vshrl.u32 %v3893_v33, %v3909_v29  ;;  %v3914_v9 = vadd.s32 127, %v3913_v8  ;;  %v3791_v58 = vadd.s32 1, %v7896_v57  ;;  %v3647_v24 = vshrl.u32 %v9753_v40, %v7499_v50  ;;  %v5314_v43 = vpop.eup %5313 }
 0x48c   : > { %v3788_v46 = vmul.u32 %v3781_v35, %v3772_v3  ;;  %v9771_v27 = vand.u32 2147483647, %v7408_v56  ;;  %v3646_v54 = vshll.u32 %v9583_v15, %v7476_v39  ;;  %v3650_v1 = vshrl.u32 %v9754_v34, %v7499_v50  ;;  %v5316_v45 = vpop.eup %5315 }
 0x48d   : > { %v3912_v55 = vor.u32 %v3911_v37, %v3910_v16  ;;  %v3915_v63 = vshll.u32 %v3914_v9, 23  ;;  %v3792_v4 = vsel %vm3790_vm7, %v3791_v58, %v7896_v57  ;;  %v3649_v36 = vshll.u32 %v9753_v40, %v7476_v39 }
 0x48e   : > { %v3636_v49 = vand.u32 8388607, %v9771_v27  ;;  %v4041_v26 = vxor.u32 2147483648, %v5314_v43  ;;  %v3793_v48 = vadd.s32 %v3792_v4, %v3788_v46  ;;  %v3652_v28 = vshll.u32 %v9754_v34, %v7476_v39 }
 0x48f   : > { %v3653_v30 = vshrl.u32 %v9567_v6, %v7499_v50  ;;  %v4038_v7 = vxor.u32 2147483648, %v5316_v45  ;;  %v3916_v60 = vor.u32 4788187, %v3915_v63  ;;  %v3648_v18 = vor.u32 %v3647_v24, %v3646_v54 }
 0x490   : > { %v3651_v35 = vor.u32 %v3650_v1, %v3649_v36  ;;  %v4042_v61 = vsel %vm4040_vm0, %v4041_v26, %v5316_v45  ;;  %v3794_v21 = vadd.s32 536870912, %v3793_v48  ;;  %v3655_v10 = vshll.u32 %v9567_v6, %v7476_v39 }
 0x491   : > { %v3656_v14 = vshrl.u32 %v9569_v5, %v7499_v50  ;;  %vm3432_vm4 = vcmp.gt.s32.totalorder %v7460_v13, 0  ;;  %v4039_v47 = vsel %vm4037_vm6, %v5314_v43, %v4038_v7  ;;  %v3917_v11 = vand.u32 2147483647, %v3916_v60 }
 0x492   : > { %v3919_v42 = vcvt.s32.f32 %v3912_v55  ;;  %v3659_v62 = vshrl.u32 %v9584_v53, %v7499_v50  ;;  %v4043_v57 = vsel %vm4036_vm14, %v4039_v47, %v4042_v61  ;;  %v3930_v17 = vadd.s32 3, %v3926_v20 }
 0x493   : > { %v3795_v33 = vshrl.u32 %v3794_v21, 30  ;;  %v3657_v41 = vor.u32 %v3656_v14, %v3655_v10  ;;  %v4044_v29 = vsel %vm4033_vm3, nan, %v4043_v57  ;;  %v3654_v3 = vor.u32 %v3653_v30, %v3652_v28 }
 0x494   : > { %v3920_v8 = vmul.f32 %v3919_v42, %v3917_v11  ;;  %v3658_v16 = vshll.u32 %v9569_v5, %v7476_v39  ;;  %v7958_v37 = vsel %vm274_vm10, %v7666_v12, %v4044_v29  ;;  %v3637_v58 = vor.u32 8388608, %v3636_v49  ;;  %v9772_v11 = vld [vmem:[#allocation32_spill] sm:$0xff]  ;;  %v9777_v29 = vld [vmem:[#allocation34_spill] sm:$0xff] }
 0x495   : > { %v3796_v9 = vshll.u32 %v3795_v33, 30  ;;  %vm3661_vm11 = vcmp.lt.s32.totalorder %v7496_v59, 1  ;;  %4297 = vrot.lane.b32.xlu0 %v7958_v37, %s5531_s15  ;;  %vm3664_vm8 = vcmp.lt.s32.totalorder %v7496_v59, 4  ;;  %v3645_v12 = vshrl.u32 %v9583_v15, %v7499_v50 }
 0x496   : > { %v3921_v31 = vxor.u32 2147483648, %v3920_v8  ;;  %v3660_v52 = vor.u32 %v3659_v62, %v3658_v16  ;;  %v3669_v20 = vsel %vm3661_vm11, %v3648_v18, %v3651_v35  ;;  %vm3663_vm15 = vcmp.lt.s32.totalorder %v7496_v59, 3 }
 0x497   : > { %v7966_v39 = vsub.s32 %v3793_v48, %v3796_v9  ;;  %v3670_v24 = vsel %vm3664_vm8, %v3657_v41, 920167782  ;;  %v3819_v27 = vsub.s32 4, %v3795_v33  ;;  %vm3662_vm1 = vcmp.lt.s32.totalorder %v7496_v59, 2 }
 0x498   : > { %v3922_v46 = vsel %vm3839_vm2, %v3921_v31, %v3920_v8  ;;  %v3671_v49 = vsel %vm3663_vm15, %v3654_v3, %v3670_v24  ;;  %v3666_v1 = vsel %vm3664_vm8, %v3654_v3, 2102212464  ;;  %v3673_v55 = vsel %vm3661_vm11, %v3651_v35, %v3654_v3 }
 0x499   : > { %v3925_v54 = vsel %vm7852_vm13, %v7427_v19, %v3922_v46  ;;  %v3799_v50 = vsub.s32 0, %v7966_v39  ;;  %v3672_v43 = vsel %vm3662_vm1, %v3669_v20, %v3671_v49  ;;  %v3674_v63 = vsel %vm3664_vm8, %v3660_v52, 1326507024 }
 0x49a   : > { %5317 = vcosq.f32 %v3925_v54  ;;  %v3677_v4 = vshll.u32 %v3637_v58, 8  ;;  %v3665_v36 = vsel %vm3661_vm11, %v3645_v12, %v3648_v18  ;;  %v3675_v45 = vsel %vm3663_vm15, %v3657_v41, %v3674_v63  ;;  %v9776_v41 = vld [vmem:[#allocation28_spill] sm:$0xff]  ;;  %v9778_v58 = vld [vmem:[#allocation11_spill] sm:$0xff] }
 0x49b   : > { %5319 = vsinq.f32 %v3925_v54  ;;  %v4666_v51 = vmin.u32 %v3799_v50, %v7966_v39  ;;  %v3667_v26 = vsel %vm3663_vm15, %v3651_v35, %v3666_v1  ;;  %v3676_v48 = vsel %vm3662_vm1, %v3673_v55, %v3675_v45 }
 0x49c   : > { %v7999_v28 = vmul.u32.u64.low %v3677_v4, %v3672_v43  ;;  %v8000_v30 = vmul.u32.u64.high %v3677_v4, %v3672_v43, %v7999_v28  ;;  %v8004_v7 = vand.u32 31, %v7456_v38  ;;  %v8009_v60 = vsel %vm3432_vm4, %v7460_v13, 0 }
 0x49d   : > { %vm3735_vm2 = vcmp.lt.s32.totalorder %v7402_v22, 0  ;;  %v3801_v18 = vclz %v4666_v51  ;;  %v8012_v61 = vand.u32 3, %v3930_v17  ;;  %v3540_v14 = vsub.s32 32, %v7470_v25 }
 0x49e   : > { %v3820_v35 = vsel %vm3735_vm2, %v3819_v27, %v3795_v33  ;;  %v8016_v21 = vmul.u32.u64.low %v3677_v4, %v3676_v48  ;;  %v8017_v10 = vmul.u32.u64.high %v3677_v4, %v3676_v48, %v8016_v21  ;;  %5321 = vtanh.f32 %v7402_v22 }
 0x49f   : > { %v4667_v47 = vadd.s32 4294967294, %v3801_v18  ;;  %v3668_v13 = vsel %vm3662_vm1, %v3665_v36, %v3667_v26  ;;  %v8024_v42 = vshrl.u32 %v9772_v11, 5  ;;  %v8027_v62 = vand.u32 31, %v8009_v60 }
 0x4a0   : > { %v9773_v57 = vand.u32 2147483647, %v7402_v22  ;;  %v3687_v33 = vadd.s32 1, %v8000_v30  ;;  %v2585_v8 = vadd.f32 %v9777_v29, %v9776_v41  ;;  %v3789_v59 = vadd.s32 %v7895_v2, %v7891_v23 }
 0x4a1   : > { %vm4668_vm13 = vcmp.lt.s32.totalorder %v4667_v47, 0  ;;  %vm3933_vm9 = vcmp.eq.s32.totalorder %v8012_v61, 0  ;;  %v3684_v9 = vmul.u32 %v3677_v4, %v3668_v13  ;;  %vm3686_vm12 = vc.u32 %v8017_v10, %v7999_v28 }
 0x4a2   : > { %vm8031_vm5 = vcmp.le.f32.partialorder %v9773_v57, 0.7853982  ;;  %v3804_v16 = vsel %vm4668_vm13, 0, %v4667_v47  ;;  %v3525_v31 = vand.u32 2147483647, %v9778_v58  ;;  %vm3932_vm6 = vcmp.lt.s32.totalorder %v8012_v61, 2 }
 0x4a3   : > { %v3822_v3 = vsel %vm8031_vm5, 0, %v3820_v35  ;;  %v3805_v52 = vsub.s32 32, %v3804_v16  ;;  %v3809_v20 = vsub.s32 4294967266, %v3804_v16  ;;  %v3688_v12 = vsel %vm3686_vm12, %v3687_v33, %v8000_v30 }
 0x4a4   : > { %v3543_v23 = vshrl.u32 %v9753_v40, %v3540_v14  ;;  %vm3929_vm14 = vweird.f32 %v7427_v19  ;;  %vm3936_vm3 = vcmp.eq.s32.totalorder %v8012_v61, 2  ;;  %v8051_v2 = vadd.s32 3, %v3822_v3 }
 0x4a5   : > { %v3689_v24 = vadd.s32 %v3688_v12, %v3684_v9  ;;  %v3542_v46 = vshll.u32 %v9583_v15, %v7470_v25  ;;  %v3806_v27 = vshll.u32 %v7966_v39, %v3804_v16  ;;  %v3807_v49 = vshrl.u32 %v3789_v59, %v3805_v52 }
 0x4a6   : > { %v3810_v54 = vadd.s32 127, %v3809_v20  ;;  %v3546_v50 = vshrl.u32 %v9754_v34, %v3540_v14  ;;  %v3532_v43 = vand.u32 8388607, %v3525_v31  ;;  %v3545_v55 = vshll.u32 %v9753_v40, %v7470_v25 }
 0x4a7   : > { %v3690_v1 = vadd.s32 536870912, %v3689_v24  ;;  %v3549_v63 = vshrl.u32 %v9567_v6, %v3540_v14  ;;  %v5318_v4 = vpop.eup %5317  ;;  %v3808_v51 = vor.u32 %v3807_v49, %v3806_v27  ;;  %v3544_v45 = vor.u32 %v3543_v23, %v3542_v46 }
 0x4a8   : > { %v3811_v36 = vshll.u32 %v3810_v54, 23  ;;  %v3552_v26 = vshrl.u32 %v9569_v5, %v3540_v14  ;;  %v5320_v39 = vpop.eup %5319  ;;  %v3937_v48 = vxor.u32 2147483648, %v5318_v4  ;;  %v3548_v18 = vshll.u32 %v9754_v34, %v7470_v25 }
 0x4a9   : > { %v3691_v30 = vshrl.u32 %v3690_v1, 30  ;;  %v3555_v35 = vshrl.u32 %v9584_v53, %v3540_v14  ;;  %v3934_v21 = vxor.u32 2147483648, %v5320_v39  ;;  %v3547_v13 = vor.u32 %v3546_v50, %v3545_v55 }
 0x4aa   : > { %v3812_v47 = vor.u32 4788187, %v3811_v36  ;;  %v3551_v11 = vshll.u32 %v9567_v6, %v7470_v25  ;;  %v3938_v57 = vsel %vm3936_vm3, %v3937_v48, %v5320_v39  ;;  %v3550_v29 = vor.u32 %v3549_v63, %v3548_v18 }
 0x4ab   : > { %v3692_v33 = vshll.u32 %v3691_v30, 30  ;;  %v3554_v59 = vshll.u32 %v9569_v5, %v7470_v25  ;;  %v3935_v3 = vsel %vm3933_vm9, %v5318_v4, %v3934_v21  ;;  %v3815_v9 = vcvt.s32.f32 %v3808_v51  ;;  %v5322_v20 = vpop.eup %5321 }
 0x4ac   : > { %v3813_v16 = vand.u32 2147483647, %v3812_v47  ;;  %v3553_v52 = vor.u32 %v3552_v26, %v3551_v11  ;;  %v3939_v12 = vsel %vm3932_vm6, %v3935_v3, %v3938_v57  ;;  %vm3631_vm0 = vcmp.lt.s32.totalorder %v7408_v56, 0 }
 0x4ad   : > { %v8077_v23 = vsub.s32 %v3689_v24, %v3692_v33  ;;  %v3541_v46 = vshrl.u32 %v9583_v15, %v3540_v14  ;;  %v3556_v27 = vor.u32 %v3555_v35, %v3554_v59  ;;  %v3940_v25 = vsel %vm3929_vm14, nan, %v3939_v12  ;;  %v9782_v12 = vld [vmem:[#allocation21_spill] sm:$0xff] }
 0x4ae   : > { %v3816_v49 = vmul.f32 %v3815_v9, %v3813_v16  ;;  %v3533_v54 = vor.u32 8388608, %v3532_v43  ;;  %vm3557_vm7 = vcmp.lt.s32.totalorder %v8024_v42, 1  ;;  %v8085_v50 = vsel %vm274_vm10, %v2585_v8, %v3940_v25 }
 0x4af   : > { %v3695_v61 = vsub.s32 0, %v8077_v23  ;;  %vm3559_vm4 = vcmp.lt.s32.totalorder %v8024_v42, 3  ;;  %vm3560_vm11 = vcmp.lt.s32.totalorder %v8024_v42, 4  ;;  %4295 = vrot.lane.b32.xlu1 %v8085_v50, %s5531_s15  ;;  %v3565_v24 = vsel %vm3557_vm7, %v3544_v45, %v3547_v13 }
 0x4b0   : > { %v3817_v14 = vxor.u32 2147483648, %v3816_v49  ;;  %v3562_v19 = vsel %vm3560_vm11, %v3550_v29, 2102212464  ;;  %v3566_v1 = vsel %vm3560_vm11, %v3553_v52, 920167782  ;;  %v3569_v55 = vsel %vm3557_vm7, %v3547_v13, %v3550_v29 }
 0x4b1   : > { %v4662_v43 = vmin.u32 %v3695_v61, %v8077_v23  ;;  %v3567_v8 = vsel %vm3559_vm4, %v3550_v29, %v3566_v1  ;;  %v3570_v63 = vsel %vm3560_vm11, %v3556_v27, 1326507024  ;;  %v3715_v51 = vsub.s32 4, %v3691_v30 }
 0x4b2   : > { %v3818_v4 = vsel %vm3735_vm2, %v3817_v14, %v3816_v49  ;;  %vm3558_vm8 = vcmp.lt.s32.totalorder %v8024_v42, 2  ;;  %v3571_v36 = vsel %vm3559_vm4, %v3553_v52, %v3570_v63  ;;  %v3573_v18 = vshll.u32 %v3533_v54, 8 }
 0x4b3   : > { %v3821_v26 = vsel %vm8031_vm5, %v7402_v22, %v3818_v4  ;;  %v3697_v39 = vclz %v4662_v43  ;;  %v3568_v48 = vsel %vm3558_vm8, %v3565_v24, %v3567_v8  ;;  %v3561_v35 = vsel %vm3557_vm7, %v3541_v46, %v3544_v45 }
 0x4b4   : > { %5323 = vcosq.f32 %v3821_v26  ;;  %v3563_v21 = vsel %vm3559_vm4, %v3547_v13, %v3562_v19  ;;  %v3572_v47 = vsel %vm3558_vm8, %v3569_v55, %v3571_v36  ;;  %v3716_v33 = vsel %vm3631_vm0, %v3715_v51, %v3691_v30 }
 0x4b5   : > { %5325 = vsinq.f32 %v3821_v26  ;;  %v4663_v11 = vadd.s32 4294967294, %v3697_v39  ;;  %v8115_v57 = vmul.u32.u64.low %v3573_v18, %v3572_v47  ;;  %v8116_v17 = vmul.u32.u64.high %v3573_v18, %v3572_v47, %v8115_v57 }
 0x4b6   : > { %5327 = vtanh.f32 %v7408_v56  ;;  %v8121_v29 = vmul.u32.u64.low %v3573_v18, %v3568_v48  ;;  %v8122_v59 = vmul.u32.u64.high %v3573_v18, %v3568_v48, %v8121_v29  ;;  %v3436_v45 = vsub.s32 32, %v8027_v62 }
 0x4b7   : > { %v8127_v13 = vand.u32 3, %v8051_v2  ;;  %vm4664_vm15 = vcmp.lt.s32.totalorder %v4663_v11, 0  ;;  %v3564_v3 = vsel %vm3558_vm8, %v3561_v35, %v3563_v21  ;;  %v8132_v16 = vshrl.u32 %v8009_v60, 5 }
 0x4b8   : > { %v9779_v9 = vand.u32 2147483647, %v7408_v56  ;;  %v3700_v52 = vsel %vm4664_vm15, 0, %v4663_v11  ;;  %v3421_v46 = vand.u32 2147483647, %v9782_v12  ;;  %v3685_v2 = vadd.s32 %v7999_v28, %v8017_v10 }
 0x4b9   : > { %v3701_v27 = vsub.s32 32, %v3700_v52  ;;  %v3705_v25 = vsub.s32 4294967266, %v3700_v52  ;;  %v8146_v60 = vadd.f32 %v5322_v20, %v9776_v41  ;;  %v3580_v49 = vmul.u32 %v3573_v18, %v3564_v3 }
 0x4ba   : > { %vm8136_vm1 = vcmp.le.f32.partialorder %v9779_v9, 0.7853982  ;;  %vm3582_vm2 = vc.u32 %v8116_v17, %v8121_v29  ;;  %v3583_v54 = vadd.s32 1, %v8122_v59  ;;  %vm3832_vm5 = vcmp.eq.s32.totalorder %v8127_v13, 2 }
 0x4bb   : > { %v3718_v42 = vsel %vm8136_vm1, 0, %v3716_v33  ;;  %v3702_v61 = vshll.u32 %v8077_v23, %v3700_v52  ;;  %v3703_v14 = vshrl.u32 %v3685_v2, %v3701_v27  ;;  %v3706_v28 = vadd.s32 127, %v3705_v25  ;;  %v9783_v2 = vld [vmem:[#allocation41_spill] sm:$0xff] }
 0x4bc   : > { %v3439_v10 = vshrl.u32 %v9753_v40, %v3436_v45  ;;  %vm3829_vm13 = vcmp.eq.s32.totalorder %v8127_v13, 0  ;;  %v8155_v19 = vadd.s32 3, %v3718_v42  ;;  %v3584_v20 = vsel %vm3582_vm2, %v3583_v54, %v8122_v59 }
 0x4bd   : > { %v8160_v24 = vand.u32 8388607, %v3421_v46  ;;  %v3438_v1 = vshll.u32 %v9583_v15, %v8027_v62  ;;  %vm3828_vm9 = vcmp.lt.s32.totalorder %v8127_v13, 2  ;;  %v3704_v23 = vor.u32 %v3703_v14, %v3702_v61 }
 0x4be   : > { %v3707_v43 = vshll.u32 %v3706_v28, 23  ;;  %v3585_v8 = vadd.s32 %v3584_v20, %v3580_v49  ;;  %v3442_v55 = vshrl.u32 %v9754_v34, %v3436_v45  ;;  %vm3825_vm12 = vweird.f32 %v7402_v22 }
 0x4bf   : > { %v3437_v63 = vshrl.u32 %v9583_v15, %v3436_v45  ;;  %v3445_v4 = vshrl.u32 %v9567_v6, %v3436_v45  ;;  %v3447_v51 = vshll.u32 %v9567_v6, %v8027_v62  ;;  %v3448_v36 = vshrl.u32 %v9569_v5, %v3436_v45 }
 0x4c0   : > { %v3708_v26 = vor.u32 4788187, %v3707_v43  ;;  %v3586_v39 = vadd.s32 536870912, %v3585_v8  ;;  %v3440_v48 = vor.u32 %v3439_v10, %v3438_v1  ;;  %v3441_v18 = vshll.u32 %v9753_v40, %v8027_v62 }
 0x4c1   : > { %v3429_v35 = vor.u32 8388608, %v8160_v24  ;;  %v3444_v21 = vshll.u32 %v9754_v34, %v8027_v62  ;;  %v3449_v47 = vor.u32 %v3448_v36, %v3447_v51  ;;  %v3451_v11 = vshrl.u32 %v9584_v53, %v3436_v45  ;;  %v5324_v57 = vpop.eup %5323 }
 0x4c2   : > { %v3709_v33 = vand.u32 2147483647, %v3708_v26  ;;  %v3711_v59 = vcvt.s32.f32 %v3704_v23  ;;  %v3587_v3 = vshrl.u32 %v3586_v39, 30  ;;  %v3443_v9 = vor.u32 %v3442_v55, %v3441_v18  ;;  %v5326_v52 = vpop.eup %5325 }
 0x4c3   : > { %vm3120_vm6 = vcmp.gt.s32.totalorder %v9783_v2, 0  ;;  %v3833_v27 = vxor.u32 2147483648, %v5324_v57  ;;  %vm3527_vm14 = vcmp.lt.s32.totalorder %v9778_v58, 0  ;;  %v3446_v25 = vor.u32 %v3445_v4, %v3444_v21  ;;  %v5328_v49 = vpop.eup %5327 }
 0x4c4   : > { %v3450_v42 = vshll.u32 %v9569_v5, %v8027_v62  ;;  %vm3453_vm3 = vcmp.lt.s32.totalorder %v8132_v16, 1  ;;  %v3830_v54 = vxor.u32 2147483648, %v5326_v52  ;;  %v3712_v45 = vmul.f32 %v3711_v59, %v3709_v33 }
 0x4c5   : > { %v3588_v61 = vshll.u32 %v3587_v3, 30  ;;  %vm3456_vm7 = vcmp.lt.s32.totalorder %v8132_v16, 4  ;;  %v3834_v14 = vsel %vm3832_vm5, %v3833_v27, %v5326_v52  ;;  %vm3454_vm4 = vcmp.lt.s32.totalorder %v8132_v16, 2 }
 0x4c6   : > { %v3452_v28 = vor.u32 %v3451_v11, %v3450_v42  ;;  %v3462_v10 = vsel %vm3456_vm7, %v3449_v47, 920167782  ;;  %v3831_v62 = vsel %vm3829_vm13, %v5324_v57, %v3830_v54  ;;  %v3713_v20 = vxor.u32 2147483648, %v3712_v45  ;;  %v9784_v54 = vld [vmem:[#allocation33_spill] sm:$0xff] }
 0x4c7   : > { %v8191_v24 = vsub.s32 %v3585_v8, %v3588_v61  ;;  %vm3455_vm11 = vcmp.lt.s32.totalorder %v8132_v16, 3  ;;  %v3835_v1 = vsel %vm3828_vm9, %v3831_v62, %v3834_v14  ;;  %v3611_v23 = vsub.s32 4, %v3587_v3  ;;  %v9786_v61 = vld [vmem:[#allocation13_spill] sm:$0xff] }
 0x4c8   : > { %v3461_v43 = vsel %vm3453_vm3, %v3440_v48, %v3443_v9  ;;  %v3463_v55 = vsel %vm3455_vm11, %v3446_v25, %v3462_v10  ;;  %v3836_v4 = vsel %vm3825_vm12, nan, %v3835_v1  ;;  %v3714_v51 = vsel %vm3631_vm0, %v3713_v20, %v3712_v45 }
 0x4c9   : > { %v3591_v8 = vsub.s32 0, %v8191_v24  ;;  %v3465_v36 = vsel %vm3453_vm3, %v3443_v9, %v3446_v25  ;;  %v8210_v13 = vsel %vm274_vm10, %v8146_v60, %v3836_v4  ;;  %v3717_v26 = vsel %vm8136_vm1, %v7408_v56, %v3714_v51 }
 0x4ca   : > { %v3458_v22 = vsel %vm3456_vm7, %v3446_v25, 2102212464  ;;  %v3466_v39 = vsel %vm3456_vm7, %v3452_v28, 1326507024  ;;  %4293 = vrot.lane.b32.xlu0 %v8210_v13, %s5531_s15  ;;  %5329 = vcosq.f32 %v3717_v26  ;;  %v3464_v60 = vsel %vm3454_vm4, %v3461_v43, %v3463_v55 }
 0x4cb   : > { %v4658_v18 = vmin.u32 %v3591_v8, %v8191_v24  ;;  %v3467_v21 = vsel %vm3455_vm11, %v3449_v47, %v3466_v39  ;;  %5331 = vsinq.f32 %v3717_v26  ;;  %v8227_v30 = vand.u32 3, %v8155_v19 }
 0x4cc   : > { %v3468_v11 = vsel %vm3454_vm4, %v3465_v36, %v3467_v21  ;;  %v3469_v57 = vshll.u32 %v3429_v35, 8  ;;  %v3612_v59 = vsel %vm3527_vm14, %v3611_v23, %v3587_v3  ;;  %v3457_v52 = vsel %vm3453_vm3, %v3437_v63, %v3440_v48  ;;  %v9785_v63 = vld [vmem:[#allocation29_spill] sm:$0xff] }
 0x4cd   : > { %v3593_v33 = vclz %v4658_v18  ;;  %v3459_v27 = vsel %vm3455_vm11, %v3443_v9, %v3458_v22  ;;  %v8247_v35 = vsel %vm3120_vm6, %v9783_v2, 0  ;;  %v8250_v3 = vshrl.u32 %v9784_v54, 5 }
 0x4ce   : > { %v8237_v25 = vmul.u32.u64.low %v3469_v57, %v3468_v11  ;;  %v8238_v47 = vmul.u32.u64.high %v3469_v57, %v3468_v11, %v8237_v25  ;;  %v8240_v42 = vmul.u32.u64.low %v3469_v57, %v3464_v60  ;;  %v8241_v19 = vmul.u32.u64.high %v3469_v57, %v3464_v60, %v8240_v42 }
 0x4cf   : > { %v4659_v45 = vadd.s32 4294967294, %v3593_v33  ;;  %v3317_v48 = vand.u32 2147483647, %v9785_v63  ;;  %v3332_v9 = vsub.s32 32, %v9786_v61  ;;  %5333 = vtanh.f32 %v9778_v58 }
 0x4d0   : > { %vm8257_vm0 = vcmp.le.f32.partialorder %v3525_v31, 0.7853982  ;;  %v3460_v2 = vsel %vm3454_vm4, %v3457_v52, %v3459_v27  ;;  %v8264_v28 = vsub.s32 32, %v8004_v7  ;;  %v8267_v10 = vadd.f32 %v5328_v49, %v9776_v41 }
 0x4d1   : > { %vm4660_vm8 = vcmp.lt.s32.totalorder %v4659_v45, 0  ;;  %v3614_v62 = vsel %vm8257_vm0, 0, %v3612_v59  ;;  %vm3728_vm15 = vcmp.eq.s32.totalorder %v8227_v30, 2  ;;  %v3581_v31 = vadd.s32 %v8121_v29, %v8116_v17 }
 0x4d2   : > { %v3596_v20 = vsel %vm4660_vm8, 0, %v4659_v45  ;;  %vm3478_vm1 = vc.u32 %v8238_v47, %v8240_v42  ;;  %v3479_v16 = vadd.s32 1, %v8241_v19  ;;  %vm3725_vm2 = vcmp.eq.s32.totalorder %v8227_v30, 0 }
 0x4d3   : > { %v3597_v1 = vsub.s32 32, %v3596_v20  ;;  %v3601_v49 = vsub.s32 4294967266, %v3596_v20  ;;  %v3476_v23 = vmul.u32 %v3469_v57, %v3460_v2  ;;  %v8280_v43 = vand.u32 8388607, %v3317_v48 }
 0x4d4   : > { %vm3724_vm5 = vcmp.lt.s32.totalorder %v8227_v30, 2  ;;  %v8283_v55 = vadd.s32 3, %v3614_v62  ;;  %v3480_v17 = vsel %vm3478_vm1, %v3479_v16, %v8241_v19  ;;  %v3333_v29 = vshrl.u32 %v9583_v15, %v3332_v9 }
 0x4d5   : > { %v3335_v4 = vshrl.u32 %v9753_v40, %v3332_v9  ;;  %vm3721_vm13 = vweird.f32 %v7408_v56  ;;  %v3598_v51 = vshll.u32 %v8191_v24, %v3596_v20  ;;  %v3599_v8 = vshrl.u32 %v3581_v31, %v3597_v1 }
 0x4d6   : > { %v3602_v36 = vadd.s32 127, %v3601_v49  ;;  %v3481_v26 = vadd.s32 %v3480_v17, %v3476_v23  ;;  %v3334_v22 = vshll.u32 %v9583_v15, %v9786_v61  ;;  %v3337_v39 = vshll.u32 %v9753_v40, %v9786_v61 }
 0x4d7   : > { %v3341_v18 = vshrl.u32 %v9567_v6, %v3332_v9  ;;  %v3344_v60 = vshrl.u32 %v9569_v5, %v3332_v9  ;;  %v3600_v21 = vor.u32 %v3599_v8, %v3598_v51  ;;  %v3325_v33 = vor.u32 8388608, %v8280_v43  ;;  %v5330_v59 = vpop.eup %5329 }
 0x4d8   : > { %v3603_v11 = vshll.u32 %v3602_v36, 23  ;;  %v3482_v57 = vadd.s32 536870912, %v3481_v26  ;;  %v3338_v24 = vshrl.u32 %v9754_v34, %v3332_v9  ;;  %v3340_v52 = vshll.u32 %v9754_v34, %v9786_v61  ;;  %v5332_v19 = vpop.eup %5331 }
 0x4d9   : > { %v3343_v27 = vshll.u32 %v9567_v6, %v9786_v61  ;;  %v3347_v25 = vshrl.u32 %v9584_v53, %v3332_v9  ;;  %v3729_v54 = vxor.u32 2147483648, %v5330_v59  ;;  %vm3423_vm9 = vcmp.lt.s32.totalorder %v9782_v12, 0 }
 0x4da   : > { %v3604_v45 = vor.u32 4788187, %v3603_v11  ;;  %v3483_v2 = vshrl.u32 %v3482_v57, 30  ;;  %v3336_v62 = vor.u32 %v3335_v4, %v3334_v22  ;;  %v3726_v31 = vxor.u32 2147483648, %v5332_v19 }
 0x4db   : > { %v3342_v20 = vor.u32 %v3341_v18, %v3340_v52  ;;  %v3345_v16 = vor.u32 %v3344_v60, %v3343_v27  ;;  %v3346_v1 = vshll.u32 %v9569_v5, %v9786_v61  ;;  %v3730_v49 = vsel %vm3728_vm15, %v3729_v54, %v5332_v19 }
 0x4dc   : > { %v3605_v23 = vand.u32 2147483647, %v3604_v45  ;;  %v3607_v43 = vcvt.s32.f32 %v3600_v21  ;;  %v3484_v17 = vshll.u32 %v3483_v2, 30  ;;  %v3727_v9 = vsel %vm3725_vm2, %v5330_v59, %v3726_v31  ;;  %v5334_v4 = vpop.eup %5333 }
 0x4dd   : > { %v3339_v51 = vor.u32 %v3338_v24, %v3337_v39  ;;  %v3348_v8 = vor.u32 %v3347_v25, %v3346_v1  ;;  %vm3349_vm12 = vcmp.lt.s32.totalorder %v8250_v3, 1  ;;  %v3731_v36 = vsel %vm3724_vm5, %v3727_v9, %v3730_v49 }
 0x4de   : > { %v3608_v22 = vmul.f32 %v3607_v43, %v3605_v23  ;;  %v8313_v18 = vsub.s32 %v3481_v26, %v3484_v17  ;;  %vm3352_vm6 = vcmp.lt.s32.totalorder %v8250_v3, 4  ;;  %v3732_v61 = vsel %vm3721_vm13, nan, %v3731_v36 }
 0x4df   : > { %v3507_v60 = vsub.s32 4, %v3483_v2  ;;  %vm3351_vm3 = vcmp.lt.s32.totalorder %v8250_v3, 3  ;;  %v3358_v21 = vsel %vm3352_vm6, %v3345_v16, 920167782  ;;  %v8322_v39 = vsel %vm274_vm10, %v8267_v10, %v3732_v61 }
 0x4e0   : > { %v3609_v11 = vxor.u32 2147483648, %v3608_v22  ;;  %v3487_v30 = vsub.s32 0, %v8313_v18  ;;  %v3354_v57 = vsel %vm3352_vm6, %v3342_v20, 2102212464  ;;  %4291 = vrot.lane.b32.xlu1 %v8322_v39, %s5531_s15  ;;  %vm3350_vm7 = vcmp.lt.s32.totalorder %v8250_v3, 2 }
 0x4e1   : > { %v3357_v56 = vsel %vm3349_vm12, %v3336_v62, %v3339_v51  ;;  %v3359_v26 = vsel %vm3351_vm3, %v3342_v20, %v3358_v21  ;;  %v3362_v59 = vsel %vm3352_vm6, %v3348_v8, 1326507024  ;;  %v3353_v52 = vsel %vm3349_vm12, %v3333_v29, %v3336_v62 }
 0x4e2   : > { %v3610_v10 = vsel %vm3527_vm14, %v3609_v11, %v3608_v22  ;;  %v4654_v24 = vmin.u32 %v3487_v30, %v8313_v18  ;;  %v3361_v27 = vsel %vm3349_vm12, %v3339_v51, %v3342_v20  ;;  %v3508_v19 = vsel %vm3423_vm9, %v3507_v60, %v3483_v2 }
 0x4e3   : > { %v3613_v25 = vsel %vm8257_vm0, %v9778_v58, %v3610_v10  ;;  %v3355_v54 = vsel %vm3351_vm3, %v3339_v51, %v3354_v57  ;;  %v3363_v45 = vsel %vm3351_vm3, %v3345_v16, %v3362_v59  ;;  %v3360_v29 = vsel %vm3350_vm7, %v3357_v56, %v3359_v26  ;;  %v9792_v51 = vld [vmem:[#allocation40_spill] sm:$0xff] }
 0x4e4   : > { %5335 = vcosq.f32 %v3613_v25  ;;  %v3489_v31 = vclz %v4654_v24  ;;  %v3365_v62 = vshll.u32 %v3325_v33, 8  ;;  %v8351_v20 = vand.u32 3, %v8283_v55 }
 0x4e5   : > { %5337 = vsinq.f32 %v3613_v25  ;;  %vm8355_vm14 = vcmp.le.f32.partialorder %v3421_v46, 0.7853982  ;;  %v3364_v2 = vsel %vm3350_vm7, %v3361_v27, %v3363_v45  ;;  %v3356_v55 = vsel %vm3350_vm7, %v3353_v52, %v3355_v54  ;;  %v9791_v46 = vld [vmem:[#allocation15_spill] sm:$0xff] }
 0x4e6   : > { %v4655_v16 = vadd.s32 4294967294, %v3489_v31  ;;  %v3510_v1 = vsel %vm8355_vm14, 0, %v3508_v19  ;;  %v8363_v49 = vmul.u32.u64.low %v3365_v62, %v3364_v2  ;;  %v8364_v23 = vmul.u32.u64.high %v3365_v62, %v3364_v2, %v8363_v49 }
 0x4e7   : > { %v8368_v33 = vmul.u32.u64.low %v3365_v62, %v3360_v29  ;;  %v8369_v43 = vmul.u32.u64.high %v3365_v62, %v3360_v29, %v8368_v33  ;;  %v3213_v17 = vand.u32 2147483647, %v9791_v46  ;;  %v8374_v9 = vand.u32 31, %v8247_v35 }
 0x4e8   : > { %v8377_v8 = vadd.s32 1, %v9792_v51  ;;  %v8380_v36 = vshrl.u32 %v7456_v38, 5  ;;  %vm4656_vm4 = vcmp.lt.s32.totalorder %v4655_v16, 0  ;;  %5339 = vtanh.f32 %v9782_v12 }
 0x4e9   : > { %v8384_v3 = vadd.f32 %v5334_v4, %v9776_v41  ;;  %v3477_v22 = vadd.s32 %v8240_v42, %v8238_v47  ;;  %v3492_v61 = vsel %vm4656_vm4, 0, %v4655_v16  ;;  %v8388_v11 = vadd.s32 3, %v3510_v1 }
 0x4ea   : > { %v3493_v60 = vsub.s32 32, %v3492_v61  ;;  %v3497_v21 = vsub.s32 4294967266, %v3492_v61  ;;  %v3372_v30 = vmul.u32 %v3365_v62, %v3356_v55  ;;  %vm3624_vm11 = vcmp.eq.s32.totalorder %v8351_v20, 2 }
 0x4eb   : > { %vm3374_vm0 = vc.u32 %v8364_v23, %v8368_v33  ;;  %v3375_v38 = vadd.s32 1, %v8369_v43  ;;  %v8396_v4 = vand.u32 8388607, %v3213_v17  ;;  %v3231_v47 = vshrl.u32 %v9753_v40, %v8264_v28 }
 0x4ec   : > { %vm3621_vm8 = vcmp.eq.s32.totalorder %v8351_v20, 0  ;;  %v3494_v42 = vshll.u32 %v8313_v18, %v3492_v61  ;;  %v3495_v57 = vshrl.u32 %v3477_v22, %v3493_v60  ;;  %v3498_v56 = vadd.s32 127, %v3497_v21 }
 0x4ed   : > { %v3234_v26 = vshrl.u32 %v9754_v34, %v8264_v28  ;;  %vm3620_vm15 = vcmp.lt.s32.totalorder %v8351_v20, 2  ;;  %v3376_v59 = vsel %vm3374_vm0, %v3375_v38, %v8369_v43  ;;  %v3237_v10 = vshrl.u32 %v9567_v6, %v8264_v28 }
 0x4ee   : > { %v3239_v24 = vshll.u32 %v9567_v6, %v8004_v7  ;;  %v3240_v52 = vshrl.u32 %v9569_v5, %v8264_v28  ;;  %vm3617_vm1 = vweird.f32 %v9778_v58  ;;  %v3496_v18 = vor.u32 %v3495_v57, %v3494_v42 }
 0x4ef   : > { %v3499_v27 = vshll.u32 %v3498_v56, 23  ;;  %v3377_v25 = vadd.s32 %v3376_v59, %v3372_v30  ;;  %v3230_v19 = vshll.u32 %v9583_v15, %v8004_v7  ;;  %v3229_v54 = vshrl.u32 %v9583_v15, %v8264_v28 }
 0x4f0   : > { %v3233_v45 = vshll.u32 %v9753_v40, %v8004_v7  ;;  %v3236_v31 = vshll.u32 %v9754_v34, %v8004_v7  ;;  %v3241_v29 = vor.u32 %v3240_v52, %v3239_v24  ;;  %v3221_v16 = vor.u32 8388608, %v8396_v4 }
 0x4f1   : > { %v3500_v62 = vor.u32 4788187, %v3499_v27  ;;  %v3378_v2 = vadd.s32 536870912, %v3377_v25  ;;  %v3232_v1 = vor.u32 %v3231_v47, %v3230_v19  ;;  %v5336_v49 = vpop.eup %5335  ;;  %vm3016_vm2 = vcmp.gt.s32.totalorder %v8377_v8, 0 }
 0x4f2   : > { %v3503_v55 = vcvt.s32.f32 %v3496_v18  ;;  %v3235_v43 = vor.u32 %v3234_v26, %v3233_v45  ;;  %v3238_v51 = vor.u32 %v3237_v10, %v3236_v31  ;;  %v3243_v22 = vshrl.u32 %v9584_v53, %v8264_v28  ;;  %v5338_v61 = vpop.eup %5337 }
 0x4f3   : > { %v3625_v60 = vxor.u32 2147483648, %v5336_v49  ;;  %v3501_v21 = vand.u32 2147483647, %v3500_v62  ;;  %v3379_v30 = vshrl.u32 %v3378_v2, 30  ;;  %vm3248_vm5 = vcmp.lt.s32.totalorder %v8380_v36, 4 }
 0x4f4   : > { %v3622_v38 = vxor.u32 2147483648, %v5338_v61  ;;  %v3242_v4 = vshll.u32 %v9569_v5, %v8004_v7  ;;  %vm3245_vm13 = vcmp.lt.s32.totalorder %v8380_v36, 1  ;;  %v3254_v47 = vsel %vm3248_vm5, %v3241_v29, 920167782 }
 0x4f5   : > { %v3626_v42 = vsel %vm3624_vm11, %v3625_v60, %v5338_v61  ;;  %v3504_v57 = vmul.f32 %v3503_v55, %v3501_v21  ;;  %v3380_v28 = vshll.u32 %v3379_v30, 30  ;;  %vm3247_vm12 = vcmp.lt.s32.totalorder %v8380_v36, 3  ;;  %v5340_v10 = vpop.eup %5339  ;;  %v9793_v60 = vld [vmem:[#allocation14_spill] sm:$0xff] }
 0x4f6   : > { %v3623_v56 = vsel %vm3621_vm8, %v5336_v49, %v3622_v38  ;;  %v3244_v26 = vor.u32 %v3243_v22, %v3242_v4  ;;  %v3253_v59 = vsel %vm3245_vm13, %v3232_v1, %v3235_v43  ;;  %v3255_v7 = vsel %vm3247_vm12, %v3238_v51, %v3254_v47 }
 0x4f7   : > { %v3627_v24 = vsel %vm3620_vm15, %v3623_v56, %v3626_v42  ;;  %v3505_v52 = vxor.u32 2147483648, %v3504_v57  ;;  %v8442_v18 = vsub.s32 %v3377_v25, %v3380_v28  ;;  %vm3246_vm6 = vcmp.lt.s32.totalorder %v8380_v36, 2  ;;  %v9794_v42 = vld [vmem:[#allocation19_spill] sm:$0xff] }
 0x4f8   : > { %v3628_v27 = vsel %vm3617_vm1, nan, %v3627_v24  ;;  %v3249_v19 = vsel %vm3245_vm13, %v3229_v54, %v3232_v1  ;;  %v3250_v45 = vsel %vm3248_vm5, %v3238_v51, 2102212464  ;;  %v3257_v31 = vsel %vm3245_vm13, %v3235_v43, %v3238_v51 }
 0x4f9   : > { %v8456_v20 = vsel %vm274_vm10, %v8384_v3, %v3628_v27  ;;  %v3506_v25 = vsel %vm3423_vm9, %v3505_v52, %v3504_v57  ;;  %v3383_v58 = vsub.s32 0, %v8442_v18  ;;  %v3256_v62 = vsel %vm3246_vm6, %v3253_v59, %v3255_v7 }
 0x4fa   : > { %4289 = vrot.lane.b32.xlu0 %v8456_v20, %s5531_s15  ;;  %v3509_v54 = vsel %vm8355_vm14, %v9782_v12, %v3506_v25  ;;  %v3403_v2 = vsub.s32 4, %v3379_v30  ;;  %v3258_v3 = vsel %vm3248_vm5, %v3244_v26, 1326507024  ;;  %v3261_v1 = vshll.u32 %v3221_v16, 8 }
 0x4fb   : > { %5341 = vcosq.f32 %v3509_v54  ;;  %v4650_v49 = vmin.u32 %v3383_v58, %v8442_v18  ;;  %v3251_v55 = vsel %vm3247_vm12, %v3235_v43, %v3250_v45  ;;  %v3259_v51 = vsel %vm3247_vm12, %v3241_v29, %v3258_v3 }
 0x4fc   : > { %5343 = vsinq.f32 %v3509_v54  ;;  %v3260_v22 = vsel %vm3246_vm6, %v3257_v31, %v3259_v51  ;;  %v8477_v14 = vmul.u32.u64.low %v3261_v1, %v3256_v62  ;;  %v8478_v61 = vmul.u32.u64.high %v3261_v1, %v3256_v62, %v8477_v14 }
 0x4fd   : > { %v8482_v21 = vand.u32 31, %v9793_v60  ;;  %v8487_v16 = vsel %vm3016_vm2, %v8377_v8, 0  ;;  %vm3319_vm9 = vcmp.lt.s32.totalorder %v9785_v63, 0  ;;  %v3385_v43 = vclz %v4650_v49 }
 0x4fe   : > { %v8491_v29 = vand.u32 3, %v8388_v11  ;;  %v3404_v38 = vsel %vm3319_vm9, %v3403_v2, %v3379_v30  ;;  %v8495_v4 = vmul.u32.u64.low %v3261_v1, %v3260_v22  ;;  %v8496_v47 = vmul.u32.u64.high %v3261_v1, %v3260_v22, %v8495_v4 }
 0x4ff   : > { %v8499_v57 = vand.u32 31, %v9794_v42  ;;  %5345 = vtanh.f32 %v9785_v63  ;;  %v4651_v28 = vadd.s32 4294967294, %v3385_v43  ;;  %v3252_v8 = vsel %vm3246_vm6, %v3249_v19, %v3251_v55  ;;  %v9797_v19 = vld [vmem:[#allocation24_spill] sm:$0xff] }
 0x500   : > { %v8505_v56 = vshrl.u32 %v8247_v35, 5  ;;  %v3124_v11 = vsub.s32 32, %v8374_v9  ;;  %vm8510_vm3 = vcmp.le.f32.partialorder %v3317_v48, 0.7853982  ;;  %v3271_v26 = vadd.s32 1, %v8478_v61 }
 0x501   : > { %v8516_v59 = vand.u32 31, %v8487_v16  ;;  %v8519_v7 = vadd.f32 %v5340_v10, %v9776_v41  ;;  %vm4652_vm7 = vcmp.lt.s32.totalorder %v4651_v28, 0  ;;  %v3406_v35 = vsel %vm8510_vm3, 0, %v3404_v38 }
 0x502   : > { %vm3520_vm14 = vcmp.eq.s32.totalorder %v8491_v29, 2  ;;  %v3373_v48 = vadd.s32 %v8368_v33, %v8364_v23  ;;  %v3388_v36 = vsel %vm4652_vm7, 0, %v4651_v28  ;;  %v3268_v24 = vmul.u32 %v3261_v1, %v3252_v8 }
 0x503   : > { %vm3270_vm4 = vc.u32 %v8496_v47, %v8477_v14  ;;  %vm3517_vm11 = vcmp.eq.s32.totalorder %v8491_v29, 0  ;;  %v3389_v52 = vsub.s32 32, %v3388_v36  ;;  %v3393_v27 = vsub.s32 4294967266, %v3388_v36 }
 0x504   : > { %v3272_v10 = vsel %vm3270_vm4, %v3271_v26, %v8478_v61  ;;  %v3109_v45 = vand.u32 2147483647, %v9797_v19  ;;  %vm3516_vm0 = vcmp.lt.s32.totalorder %v8491_v29, 2  ;;  %v8532_v31 = vadd.s32 3, %v3406_v35 }
 0x505   : > { %v3273_v25 = vadd.s32 %v3272_v10, %v3268_v24  ;;  %v8535_v23 = vshrl.u32 %v9583_v15, %v3124_v11  ;;  %v3127_v33 = vshrl.u32 %v9753_v40, %v3124_v11  ;;  %vm3513_vm8 = vweird.f32 %v9782_v12 }
 0x506   : > { %v3390_v58 = vshll.u32 %v8442_v18, %v3388_v36  ;;  %v3391_v62 = vshrl.u32 %v3373_v48, %v3389_v52  ;;  %v3394_v54 = vadd.s32 127, %v3393_v27  ;;  %v3130_v2 = vshrl.u32 %v9754_v34, %v3124_v11 }
 0x507   : > { %v3274_v3 = vadd.s32 536870912, %v3273_v25  ;;  %v3126_v1 = vshll.u32 %v9583_v15, %v8374_v9  ;;  %v3129_v49 = vshll.u32 %v9753_v40, %v8374_v9  ;;  %v3133_v55 = vshrl.u32 %v9567_v6, %v3124_v11 }
 0x508   : > { %v3392_v51 = vor.u32 %v3391_v62, %v3390_v58  ;;  %v3395_v22 = vshll.u32 %v3394_v54, 23  ;;  %v3116_v61 = vand.u32 8388607, %v3109_v45  ;;  %v3136_v18 = vshrl.u32 %v9569_v5, %v3124_v11  ;;  %v5342_v43 = vpop.eup %5341 }
 0x509   : > { %v3275_v38 = vshrl.u32 %v3274_v3, 30  ;;  %v3128_v4 = vor.u32 %v3127_v33, %v3126_v1  ;;  %v3132_v28 = vshll.u32 %v9754_v34, %v8374_v9  ;;  %v3139_v8 = vshrl.u32 %v9584_v53, %v3124_v11  ;;  %v5344_v26 = vpop.eup %5343 }
 0x50a   : > { %v3521_v35 = vxor.u32 2147483648, %v5342_v43  ;;  %v3396_v48 = vor.u32 4788187, %v3395_v22  ;;  %v3131_v36 = vor.u32 %v3130_v2, %v3129_v49  ;;  %v3135_v24 = vshll.u32 %v9567_v6, %v8374_v9 }
 0x50b   : > { %v3518_v52 = vxor.u32 2147483648, %v5344_v26  ;;  %v3276_v27 = vshll.u32 %v3275_v38, 30  ;;  %v3134_v10 = vor.u32 %v3133_v55, %v3132_v28  ;;  %v3138_v58 = vshll.u32 %v9569_v5, %v8374_v9 }
 0x50c   : > { %v3522_v33 = vsel %vm3520_vm14, %v3521_v35, %v5344_v26  ;;  %v3397_v62 = vand.u32 2147483647, %v3396_v48  ;;  %v3399_v54 = vcvt.s32.f32 %v3392_v51  ;;  %v3137_v3 = vor.u32 %v3136_v18, %v3135_v24  ;;  %v5346_v11 = vpop.eup %5345 }
 0x50d   : > { %v3519_v1 = vsel %vm3517_vm11, %v5342_v43, %v3518_v52  ;;  %vm3215_vm15 = vcmp.lt.s32.totalorder %v9791_v46, 0  ;;  %v8561_v2 = vsub.s32 %v3273_v25, %v3276_v27  ;;  %v3117_v49 = vor.u32 8388608, %v3116_v61 }
 0x50e   : > { %v3140_v22 = vor.u32 %v3139_v8, %v3138_v58  ;;  %v3523_v55 = vsel %vm3516_vm0, %v3519_v1, %v3522_v33  ;;  %v3400_v9 = vmul.f32 %v3399_v54, %v3397_v62  ;;  %vm3141_vm1 = vcmp.lt.s32.totalorder %v8505_v56, 1 }
 0x50f   : > { %vm3144_vm2 = vcmp.lt.s32.totalorder %v8505_v56, 4  ;;  %v3524_v51 = vsel %vm3513_vm8, nan, %v3523_v55  ;;  %v3279_v18 = vsub.s32 0, %v8561_v2  ;;  %vm3143_vm5 = vcmp.lt.s32.totalorder %v8505_v56, 3 }
 0x510   : > { %v3146_v43 = vsel %vm3144_vm2, %v3134_v10, 2102212464  ;;  %v8574_v25 = vsel %vm274_vm10, %v8519_v7, %v3524_v51  ;;  %v3401_v29 = vxor.u32 2147483648, %v3400_v9  ;;  %v3149_v61 = vsel %vm3141_vm1, %v3128_v4, %v3131_v36 }
 0x511   : > { %v3150_v28 = vsel %vm3144_vm2, %v3137_v3, 920167782  ;;  %4287 = vrot.lane.b32.xlu1 %v8574_v25, %s5531_s15  ;;  %v4646_v12 = vmin.u32 %v3279_v18, %v8561_v2  ;;  %v3153_v26 = vsel %vm3141_vm1, %v3131_v36, %v3134_v10  ;;  %v3154_v35 = vsel %vm3144_vm2, %v3140_v22, 1326507024  ;;  %v9800_v18 = vld [vmem:[#allocation31_spill] sm:$0xff] }
 0x512   : > { %v3151_v8 = vsel %vm3143_vm5, %v3134_v10, %v3150_v28  ;;  %v3402_v7 = vsel %vm3319_vm9, %v3401_v29, %v3400_v9  ;;  %v3299_v48 = vsub.s32 4, %v3275_v38  ;;  %vm3142_vm13 = vcmp.lt.s32.totalorder %v8505_v56, 2 }
 0x513   : > { %v3155_v24 = vsel %vm3143_vm5, %v3137_v3, %v3154_v35  ;;  %v3405_v52 = vsel %vm8510_vm3, %v9785_v63, %v3402_v7  ;;  %v3281_v27 = vclz %v4646_v12  ;;  %v3152_v58 = vsel %vm3142_vm13, %v3149_v61, %v3151_v8 }
 0x514   : > { %v3157_v33 = vshll.u32 %v3117_v49, 8  ;;  %5347 = vcosq.f32 %v3405_v52  ;;  %v3145_v10 = vsel %vm3141_vm1, %v8535_v23, %v3128_v4  ;;  %v3147_v62 = vsel %vm3143_vm5, %v3131_v36, %v3146_v43 }
 0x515   : > { %v3156_v54 = vsel %vm3142_vm13, %v3153_v26, %v3155_v24  ;;  %5349 = vsinq.f32 %v3405_v52  ;;  %v4647_v3 = vadd.s32 4294967294, %v3281_v27  ;;  %v3300_v49 = vsel %vm3215_vm15, %v3299_v48, %v3275_v38 }
 0x516   : > { %v8602_v30 = vmul.u32.u64.low %v3157_v33, %v3156_v54  ;;  %v8603_v1 = vmul.u32.u64.high %v3157_v33, %v3156_v54, %v8602_v30  ;;  %5351 = vtanh.f32 %v9791_v46  ;;  %v3020_v23 = vsub.s32 32, %v8516_v59 }
 0x517   : > { %v8608_v22 = vmul.u32.u64.low %v3157_v33, %v3152_v58  ;;  %v8609_v55 = vmul.u32.u64.high %v3157_v33, %v3152_v58, %v8608_v22  ;;  %v8614_v4 = vand.u32 3, %v8532_v31  ;;  %vm4648_vm12 = vcmp.lt.s32.totalorder %v4647_v3, 0 }
 0x518   : > { %v3148_v36 = vsel %vm3142_vm13, %v3145_v10, %v3147_v62  ;;  %v8619_v9 = vshrl.u32 %v8487_v16, 5  ;;  %vm8623_vm6 = vcmp.le.f32.partialorder %v3213_v17, 0.7853982  ;;  %v3284_v51 = vsel %vm4648_vm12, 0, %v4647_v3 }
 0x519   : > { %v9548_v43 = vand.u32 2147483647, %v9800_v18  ;;  %v3269_v31 = vadd.s32 %v8477_v14, %v8496_v47  ;;  %v3285_v29 = vsub.s32 32, %v3284_v51  ;;  %v3289_v61 = vsub.s32 4294967266, %v3284_v51 }
 0x51a   : > { %v3302_v56 = vsel %vm8623_vm6, 0, %v3300_v49  ;;  %v8633_v16 = vadd.f32 %v5346_v11, %v9776_v41  ;;  %v3164_v28 = vmul.u32 %v3157_v33, %v3148_v36  ;;  %vm3166_vm9 = vc.u32 %v8603_v1, %v8608_v22 }
 0x51b   : > { %v3167_v17 = vadd.s32 1, %v8609_v55  ;;  %vm3416_vm3 = vcmp.eq.s32.totalorder %v8614_v4, 2  ;;  %v3286_v12 = vshll.u32 %v8561_v2, %v3284_v51  ;;  %v3287_v8 = vshrl.u32 %v3269_v31, %v3285_v29 }
 0x51c   : > { %v3290_v14 = vadd.s32 127, %v3289_v61  ;;  %v3023_v47 = vshrl.u32 %v9753_v40, %v3020_v23  ;;  %vm3413_vm7 = vcmp.eq.s32.totalorder %v8614_v4, 0  ;;  %v8642_v26 = vadd.s32 3, %v3302_v56 }
 0x51d   : > { %v3168_v11 = vsel %vm3166_vm9, %v3167_v17, %v8609_v55  ;;  %v8647_v35 = vand.u32 8388607, %v9548_v43  ;;  %v3022_v7 = vshll.u32 %v9583_v15, %v8516_v59  ;;  %vm3412_vm14 = vcmp.lt.s32.totalorder %v8614_v4, 2 }
 0x51e   : > { %v3288_v2 = vor.u32 %v3287_v8, %v3286_v12  ;;  %v3291_v48 = vshll.u32 %v3290_v14, 23  ;;  %v3169_v24 = vadd.s32 %v3168_v11, %v3164_v28  ;;  %v3026_v52 = vshrl.u32 %v9754_v34, %v3020_v23  ;;  %v9801_v12 = vld [vmem:[#allocation23_spill] sm:$0xff] }
 0x51f   : > { %vm3409_vm4 = vweird.f32 %v9785_v63  ;;  %v3021_v27 = vshrl.u32 %v9583_v15, %v3020_v23  ;;  %v3029_v58 = vshrl.u32 %v9567_v6, %v3020_v23  ;;  %v3031_v33 = vshll.u32 %v9567_v6, %v8516_v59 }
 0x520   : > { %v3032_v10 = vshrl.u32 %v9569_v5, %v3020_v23  ;;  %v3292_v62 = vor.u32 4788187, %v3291_v48  ;;  %v3170_v54 = vadd.s32 536870912, %v3169_v24  ;;  %v3024_v3 = vor.u32 %v3023_v47, %v3022_v7 }
 0x521   : > { %v3025_v30 = vshll.u32 %v9753_v40, %v8516_v59  ;;  %v3013_v49 = vor.u32 8388608, %v8647_v35  ;;  %v3028_v55 = vshll.u32 %v9754_v34, %v8516_v59  ;;  %v3035_v51 = vshrl.u32 %v9584_v53, %v3020_v23  ;;  %v5348_v31 = vpop.eup %5347 }
 0x522   : > { %v3033_v36 = vor.u32 %v3032_v10, %v3031_v33  ;;  %v3293_v29 = vand.u32 2147483647, %v3292_v62  ;;  %v3295_v61 = vcvt.s32.f32 %v3288_v2  ;;  %v3171_v56 = vshrl.u32 %v3170_v54, 30  ;;  %v5350_v17 = vpop.eup %5349 }
 0x523   : > { %v3027_v28 = vor.u32 %v3026_v52, %v3025_v30  ;;  %vm2704_vm11 = vcmp.gt.s32.totalorder %v9801_v12, 0  ;;  %v3417_v8 = vxor.u32 2147483648, %v5348_v31  ;;  %vm3111_vm0 = vcmp.lt.s32.totalorder %v9797_v19, 0  ;;  %v5352_v11 = vpop.eup %5351 }
 0x524   : > { %v3030_v14 = vor.u32 %v3029_v58, %v3028_v55  ;;  %v3034_v47 = vshll.u32 %v9569_v5, %v8516_v59  ;;  %vm3037_vm8 = vcmp.lt.s32.totalorder %v8619_v9, 1  ;;  %v3414_v35 = vxor.u32 2147483648, %v5350_v17 }
 0x525   : > { %v3296_v23 = vmul.f32 %v3295_v61, %v3293_v29  ;;  %v3172_v7 = vshll.u32 %v3171_v56, 30  ;;  %vm3040_vm1 = vcmp.lt.s32.totalorder %v8619_v9, 4  ;;  %v3418_v2 = vsel %vm3416_vm3, %v3417_v8, %v5350_v17 }
 0x526   : > { %v3036_v48 = vor.u32 %v3035_v51, %v3034_v47  ;;  %vm3038_vm2 = vcmp.lt.s32.totalorder %v8619_v9, 2  ;;  %v3046_v52 = vsel %vm3040_vm1, %v3033_v36, 920167782  ;;  %v3415_v59 = vsel %vm3413_vm7, %v5348_v31, %v3414_v35 }
 0x527   : > { %v3297_v58 = vxor.u32 2147483648, %v3296_v23  ;;  %v8678_v33 = vsub.s32 %v3169_v24, %v3172_v7  ;;  %vm3039_vm5 = vcmp.lt.s32.totalorder %v8619_v9, 3  ;;  %v3419_v10 = vsel %vm3412_vm14, %v3415_v59, %v3418_v2 }
 0x528   : > { %v3195_v62 = vsub.s32 4, %v3171_v56  ;;  %v3045_v54 = vsel %vm3037_vm8, %v3024_v3, %v3027_v28  ;;  %v3047_v30 = vsel %vm3039_vm5, %v3030_v14, %v3046_v52  ;;  %v3420_v55 = vsel %vm3409_vm4, nan, %v3419_v10 }
 0x529   : > { %v3298_v51 = vsel %vm3215_vm15, %v3297_v58, %v3296_v23  ;;  %v3175_v24 = vsub.s32 0, %v8678_v33  ;;  %v3049_v31 = vsel %vm3037_vm8, %v3027_v28, %v3030_v14  ;;  %v8697_v4 = vsel %vm274_vm10, %v8633_v16, %v3420_v55 }
 0x52a   : > { %v3301_v29 = vsel %vm8623_vm6, %v9791_v46, %v3298_v51  ;;  %v3042_v63 = vsel %vm3040_vm1, %v3030_v14, 2102212464  ;;  %v3050_v61 = vsel %vm3040_vm1, %v3036_v48, 1326507024  ;;  %4285 = vrot.lane.b32.xlu0 %v8697_v4, %s5531_s15  ;;  %v3048_v16 = vsel %vm3038_vm2, %v3045_v54, %v3047_v30 }
 0x52b   : > { %5353 = vcosq.f32 %v3301_v29  ;;  %v4642_v17 = vmin.u32 %v3175_v24, %v8678_v33  ;;  %v3051_v8 = vsel %vm3039_vm5, %v3033_v36, %v3050_v61  ;;  %v8714_v38 = vand.u32 3, %v8642_v26 }
 0x52c   : > { %5355 = vsinq.f32 %v3301_v29  ;;  %v3052_v14 = vsel %vm3038_vm2, %v3049_v31, %v3051_v8  ;;  %v3053_v47 = vshll.u32 %v3013_v49, 8  ;;  %v3196_v23 = vsel %vm3111_vm0, %v3195_v62, %v3171_v56 }
 0x52d   : > { %v3177_v35 = vclz %v4642_v17  ;;  %v3041_v7 = vsel %vm3037_vm8, %v3021_v27, %v3024_v3  ;;  %v3043_v2 = vsel %vm3039_vm5, %v3027_v28, %v3042_v63  ;;  %v8734_v49 = vsel %vm2704_vm11, %v9801_v12, 0  ;;  %v9802_v27 = vld [vmem:[#allocation17_spill] sm:$0xff] }
 0x52e   : > { %v8724_v48 = vmul.u32.u64.low %v3053_v47, %v3052_v14  ;;  %v8725_v36 = vmul.u32.u64.high %v3053_v47, %v3052_v14, %v8724_v48  ;;  %v8727_v52 = vmul.u32.u64.low %v3053_v47, %v3048_v16  ;;  %v8728_v26 = vmul.u32.u64.high %v3053_v47, %v3048_v16, %v8727_v52 }
 0x52f   : > { %v8737_v56 = vshrl.u32 %v9793_v60, 5  ;;  %v4643_v59 = vadd.s32 4294967294, %v3177_v35  ;;  %v9547_v3 = vand.u32 2147483647, %v9802_v27  ;;  %v2916_v28 = vsub.s32 32, %v8482_v21 }
 0x530   : > { %5357 = vtanh.f32 %v9797_v19  ;;  %vm8744_vm15 = vcmp.le.f32.partialorder %v3109_v45, 0.7853982  ;;  %v3044_v12 = vsel %vm3038_vm2, %v3041_v7, %v3043_v2  ;;  %v8751_v10 = vsub.s32 32, %v8499_v57 }
 0x531   : > { %v8754_v60 = vadd.f32 %v5352_v11, %v9776_v41  ;;  %vm4644_vm13 = vcmp.lt.s32.totalorder %v4643_v59, 0  ;;  %v3198_v62 = vsel %vm8744_vm15, 0, %v3196_v23  ;;  %vm3312_vm12 = vcmp.eq.s32.totalorder %v8714_v38, 2 }
 0x532   : > { %v3165_v45 = vadd.s32 %v8608_v22, %v8603_v1  ;;  %v3180_v54 = vsel %vm4644_vm13, 0, %v4643_v59  ;;  %vm3062_vm6 = vc.u32 %v8725_v36, %v8727_v52  ;;  %v3063_v9 = vadd.s32 1, %v8728_v26 }
 0x533   : > { %vm3309_vm9 = vcmp.eq.s32.totalorder %v8714_v38, 0  ;;  %v3181_v30 = vsub.s32 32, %v3180_v54  ;;  %v3185_v11 = vsub.s32 4294967266, %v3180_v54  ;;  %v3060_v55 = vmul.u32 %v3053_v47, %v3044_v12 }
 0x534   : > { %v8767_v51 = vand.u32 8388607, %v9547_v3  ;;  %vm3308_vm3 = vcmp.lt.s32.totalorder %v8714_v38, 2  ;;  %v8770_v24 = vadd.s32 3, %v3198_v62  ;;  %v3064_v1 = vsel %vm3062_vm6, %v3063_v9, %v8728_v26 }
 0x535   : > { %v2917_v22 = vshrl.u32 %v9583_v15, %v2916_v28  ;;  %v2919_v31 = vshrl.u32 %v9753_v40, %v2916_v28  ;;  %vm3305_vm7 = vweird.f32 %v9791_v46  ;;  %v3182_v29 = vshll.u32 %v8678_v33, %v3180_v54 }
 0x536   : > { %v3183_v63 = vshrl.u32 %v3165_v45, %v3181_v30  ;;  %v3186_v61 = vadd.s32 127, %v3185_v11  ;;  %v3065_v17 = vadd.s32 %v3064_v1, %v3060_v55  ;;  %v2918_v16 = vshll.u32 %v9583_v15, %v8482_v21 }
 0x537   : > { %v2921_v8 = vshll.u32 %v9753_v40, %v8482_v21  ;;  %v2925_v14 = vshrl.u32 %v9567_v6, %v2916_v28  ;;  %v2928_v47 = vshrl.u32 %v9569_v5, %v2916_v28  ;;  %v2909_v2 = vor.u32 8388608, %v8767_v51 }
 0x538   : > { %v3184_v35 = vor.u32 %v3183_v63, %v3182_v29  ;;  %v3187_v23 = vshll.u32 %v3186_v61, 23  ;;  %v3066_v7 = vadd.s32 536870912, %v3065_v17  ;;  %v5354_v48 = vpop.eup %5353  ;;  %v2922_v33 = vshrl.u32 %v9754_v34, %v2916_v28 }
 0x539   : > { %v2924_v26 = vshll.u32 %v9754_v34, %v8482_v21  ;;  %v2927_v59 = vshll.u32 %v9567_v6, %v8482_v21  ;;  %v2931_v12 = vshrl.u32 %v9584_v53, %v2916_v28  ;;  %v5356_v62 = vpop.eup %5355  ;;  %v3313_v45 = vxor.u32 2147483648, %v5354_v48 }
 0x53a   : > { %v3188_v54 = vor.u32 4788187, %v3187_v23  ;;  %vm3007_vm14 = vcmp.lt.s32.totalorder %v9800_v18, 0  ;;  %v3067_v9 = vshrl.u32 %v3066_v7, 30  ;;  %v2920_v30 = vor.u32 %v2919_v31, %v2918_v16 }
 0x53b   : > { %v3310_v11 = vxor.u32 2147483648, %v5356_v62  ;;  %v2926_v55 = vor.u32 %v2925_v14, %v2924_v26  ;;  %v2929_v51 = vor.u32 %v2928_v47, %v2927_v59  ;;  %v2930_v1 = vshll.u32 %v9569_v5, %v8482_v21 }
 0x53c   : > { %v3314_v29 = vsel %vm3312_vm12, %v3313_v45, %v5356_v62  ;;  %v3189_v63 = vand.u32 2147483647, %v3188_v54  ;;  %v3191_v61 = vcvt.s32.f32 %v3184_v35  ;;  %v3068_v3 = vshll.u32 %v3067_v9, 30 }
 0x53d   : > { %v3311_v28 = vsel %vm3309_vm9, %v5354_v48, %v3310_v11  ;;  %v2923_v23 = vor.u32 %v2922_v33, %v2921_v8  ;;  %v2932_v43 = vor.u32 %v2931_v12, %v2930_v1  ;;  %vm2933_vm4 = vcmp.lt.s32.totalorder %v8737_v56, 1  ;;  %v5358_v31 = vpop.eup %5357 }
 0x53e   : > { %v3315_v16 = vsel %vm3308_vm3, %v3311_v28, %v3314_v29  ;;  %v3192_v14 = vmul.f32 %v3191_v61, %v3189_v63  ;;  %v8800_v47 = vsub.s32 %v3065_v17, %v3068_v3  ;;  %vm2936_vm11 = vcmp.lt.s32.totalorder %v8737_v56, 4 }
 0x53f   : > { %v3316_v21 = vsel %vm3305_vm7, nan, %v3315_v16  ;;  %v3091_v35 = vsub.s32 4, %v3067_v9  ;;  %vm2935_vm8 = vcmp.lt.s32.totalorder %v8737_v56, 3  ;;  %v2942_v7 = vsel %vm2936_vm11, %v2929_v51, 920167782 }
 0x540   : > { %v8809_v8 = vsel %vm274_vm10, %v8754_v60, %v3316_v21  ;;  %v3193_v48 = vxor.u32 2147483648, %v3192_v14  ;;  %v3071_v38 = vsub.s32 0, %v8800_v47  ;;  %v2938_v33 = vsel %vm2936_vm11, %v2926_v55, 2102212464  ;;  %v9809_v21 = vld [vmem:[#allocation27_spill] sm:$0xff] }
 0x541   : > { %4283 = vrot.lane.b32.xlu1 %v8809_v8, %s5531_s15  ;;  %vm2934_vm1 = vcmp.lt.s32.totalorder %v8737_v56, 2  ;;  %v2941_v46 = vsel %vm2933_vm4, %v2920_v30, %v2923_v23  ;;  %v2943_v3 = vsel %vm2935_vm8, %v2926_v55, %v2942_v7  ;;  %v2946_v17 = vsel %vm2936_vm11, %v2932_v43, 1326507024 }
 0x542   : > { %v3194_v60 = vsel %vm3111_vm0, %v3193_v48, %v3192_v14  ;;  %v4638_v26 = vmin.u32 %v3071_v38, %v8800_v47  ;;  %v2937_v59 = vsel %vm2933_vm4, %v2917_v22, %v2920_v30  ;;  %v2945_v12 = vsel %vm2933_vm4, %v2923_v23, %v2926_v55 }
 0x543   : > { %v3197_v62 = vsel %vm8744_vm15, %v9797_v19, %v3194_v60  ;;  %v3092_v45 = vsel %vm3007_vm14, %v3091_v35, %v3067_v9  ;;  %v2939_v43 = vsel %vm2935_vm8, %v2923_v23, %v2938_v33  ;;  %v2947_v54 = vsel %vm2935_vm8, %v2929_v51, %v2946_v17  ;;  %v9808_v23 = vld [vmem:[#allocation12_spill] sm:$0xff] }
 0x544   : > { %5359 = vcosq.f32 %v3197_v62  ;;  %v3073_v11 = vclz %v4638_v26  ;;  %v2944_v22 = vsel %vm2934_vm1, %v2941_v46, %v2943_v3  ;;  %v2949_v30 = vshll.u32 %v2909_v2, 8 }
 0x545   : > { %5361 = vsinq.f32 %v3197_v62  ;;  %v8838_v55 = vand.u32 3, %v8770_v24  ;;  %v9805_v58 = vand.u32 2147483647, %v9800_v18  ;;  %v2948_v1 = vsel %vm2934_vm1, %v2945_v12, %v2947_v54 }
 0x546   : > { %v4639_v51 = vadd.s32 4294967294, %v3073_v11  ;;  %v8850_v63 = vmul.u32.u64.low %v2949_v30, %v2948_v1  ;;  %v8851_v61 = vmul.u32.u64.high %v2949_v30, %v2948_v1, %v8850_v63  ;;  %v2940_v24 = vsel %vm2934_vm1, %v2937_v59, %v2939_v43 }
 0x547   : > { %vm8842_vm0 = vcmp.le.f32.partialorder %v9805_v58, 0.7853982  ;;  %v8855_v2 = vmul.u32.u64.low %v2949_v30, %v2944_v22  ;;  %v8856_v28 = vmul.u32.u64.high %v2949_v30, %v2944_v22, %v8855_v2  ;;  %v2797_v16 = vand.u32 2147483647, %v9808_v23 }
 0x548   : > { %v3094_v29 = vsel %vm8842_vm0, 0, %v3092_v45  ;;  %v8861_v14 = vand.u32 31, %v8734_v49  ;;  %v8864_v35 = vadd.s32 1, %v9809_v21  ;;  %v8867_v7 = vshrl.u32 %v9794_v42, 5 }
 0x549   : > { %vm4640_vm2 = vcmp.lt.s32.totalorder %v4639_v51, 0  ;;  %5363 = vtanh.f32 %v9800_v18  ;;  %v8871_v56 = vadd.f32 %v5358_v31, %v9776_v41  ;;  %v3061_v48 = vadd.s32 %v8727_v52, %v8725_v36 }
 0x54a   : > { %v3076_v38 = vsel %vm4640_vm2, 0, %v4639_v51  ;;  %v8875_v3 = vadd.s32 3, %v3094_v29  ;;  %v2956_v17 = vmul.u32 %v2949_v30, %v2940_v24  ;;  %vm3208_vm5 = vcmp.eq.s32.totalorder %v8838_v55, 2 }
 0x54b   : > { %v3077_v33 = vsub.s32 32, %v3076_v38  ;;  %v3081_v46 = vsub.s32 4294967266, %v3076_v38  ;;  %vm2958_vm15 = vc.u32 %v8851_v61, %v8855_v2  ;;  %v2959_v42 = vadd.s32 1, %v8856_v28 }
 0x54c   : > { %v8883_v31 = vand.u32 8388607, %v2797_v16  ;;  %v2815_v36 = vshrl.u32 %v9753_v40, %v8751_v10  ;;  %vm3205_vm13 = vcmp.eq.s32.totalorder %v8838_v55, 0  ;;  %v3078_v52 = vshll.u32 %v8800_v47, %v3076_v38 }
 0x54d   : > { %v3079_v60 = vshrl.u32 %v3061_v48, %v3077_v33  ;;  %v3082_v26 = vadd.s32 127, %v3081_v46  ;;  %v2818_v59 = vshrl.u32 %v9754_v34, %v8751_v10  ;;  %vm3204_vm12 = vcmp.lt.s32.totalorder %v8838_v55, 2 }
 0x54e   : > { %v2960_v12 = vsel %vm2958_vm15, %v2959_v42, %v8856_v28  ;;  %v2821_v62 = vshrl.u32 %v9567_v6, %v8751_v10  ;;  %v2823_v45 = vshll.u32 %v9567_v6, %v8499_v57  ;;  %v2824_v43 = vshrl.u32 %v9569_v5, %v8751_v10 }
 0x54f   : > { %vm3201_vm6 = vweird.f32 %v9797_v19  ;;  %v3080_v47 = vor.u32 %v3079_v60, %v3078_v52  ;;  %v3083_v54 = vshll.u32 %v3082_v26, 23  ;;  %v2961_v11 = vadd.s32 %v2960_v12, %v2956_v17 }
 0x550   : > { %v2814_v22 = vshll.u32 %v9583_v15, %v8499_v57  ;;  %v2813_v30 = vshrl.u32 %v9583_v15, %v8751_v10  ;;  %v2817_v58 = vshll.u32 %v9753_v40, %v8499_v57  ;;  %v2820_v1 = vshll.u32 %v9754_v34, %v8499_v57 }
 0x551   : > { %v2825_v51 = vor.u32 %v2824_v43, %v2823_v45  ;;  %v3084_v29 = vor.u32 4788187, %v3083_v54  ;;  %v2962_v63 = vadd.s32 536870912, %v2961_v11  ;;  %v2805_v24 = vor.u32 8388608, %v8883_v31  ;;  %v5360_v21 = vpop.eup %5359 }
 0x552   : > { %v2816_v28 = vor.u32 %v2815_v36, %v2814_v22  ;;  %v3087_v48 = vcvt.s32.f32 %v3080_v47  ;;  %v2819_v38 = vor.u32 %v2818_v59, %v2817_v58  ;;  %v2822_v33 = vor.u32 %v2821_v62, %v2820_v1  ;;  %v5362_v17 = vpop.eup %5361 }
 0x553   : > { %v2827_v46 = vshrl.u32 %v9584_v53, %v8751_v10  ;;  %vm2600_vm9 = vcmp.gt.s32.totalorder %v8864_v35, 0  ;;  %v3209_v42 = vxor.u32 2147483648, %v5360_v21  ;;  %v3085_v52 = vand.u32 2147483647, %v3084_v29 }
 0x554   : > { %v2963_v60 = vshrl.u32 %v2962_v63, 30  ;;  %vm2832_vm3 = vcmp.lt.s32.totalorder %v8867_v7, 4  ;;  %v3206_v26 = vxor.u32 2147483648, %v5362_v17  ;;  %v2826_v31 = vshll.u32 %v9569_v5, %v8499_v57 }
 0x555   : > { %vm2829_vm7 = vcmp.lt.s32.totalorder %v8867_v7, 1  ;;  %v2838_v36 = vsel %vm2832_vm3, %v2825_v51, 920167782  ;;  %v3210_v10 = vsel %vm3208_vm5, %v3209_v42, %v5362_v17  ;;  %v3088_v59 = vmul.f32 %v3087_v48, %v3085_v52 }
 0x556   : > { %v2964_v12 = vshll.u32 %v2963_v60, 30  ;;  %vm2831_vm4 = vcmp.lt.s32.totalorder %v8867_v7, 3  ;;  %v3207_v62 = vsel %vm3205_vm13, %v5360_v21, %v3206_v26  ;;  %v2828_v45 = vor.u32 %v2827_v46, %v2826_v31  ;;  %v5364_v47 = vpop.eup %5363 }
 0x557   : > { %v2837_v43 = vsel %vm2829_vm7, %v2816_v28, %v2819_v38  ;;  %v2839_v57 = vsel %vm2831_vm4, %v2822_v33, %v2838_v36  ;;  %v3211_v54 = vsel %vm3204_vm12, %v3207_v62, %v3210_v10  ;;  %v3089_v22 = vxor.u32 2147483648, %v3088_v59 }
 0x558   : > { %v8929_v58 = vsub.s32 %v2961_v11, %v2964_v12  ;;  %vm2830_vm11 = vcmp.lt.s32.totalorder %v8867_v7, 2  ;;  %v3212_v1 = vsel %vm3201_vm6, nan, %v3211_v54  ;;  %v2833_v29 = vsel %vm2829_vm7, %v2813_v30, %v2816_v28 }
 0x559   : > { %v2834_v63 = vsel %vm2832_vm3, %v2822_v33, 2102212464  ;;  %v2841_v21 = vsel %vm2829_vm7, %v2819_v38, %v2822_v33  ;;  %v8943_v55 = vsel %vm274_vm10, %v8871_v56, %v3212_v1  ;;  %v3090_v11 = vsel %vm3007_vm14, %v3089_v22, %v3088_v59 }
 0x55a   : > { %v2967_v19 = vsub.s32 0, %v8929_v58  ;;  %v2840_v48 = vsel %vm2830_vm11, %v2837_v43, %v2839_v57  ;;  %4281 = vrot.lane.b32.xlu0 %v8943_v55, %s5531_s15  ;;  %v3093_v30 = vsel %vm8842_vm0, %v9800_v18, %v3090_v11  ;;  %v2987_v28 = vsub.s32 4, %v2963_v60 }
 0x55b   : > { %v2842_v56 = vsel %vm2832_vm3, %v2828_v45, 1326507024  ;;  %v2845_v33 = vshll.u32 %v2805_v24, 8  ;;  %5365 = vcosq.f32 %v3093_v30  ;;  %v2835_v17 = vsel %vm2831_vm4, %v2819_v38, %v2834_v63 }
 0x55c   : > { %v4634_v46 = vmin.u32 %v2967_v19, %v8929_v58  ;;  %v2843_v42 = vsel %vm2831_vm4, %v2825_v51, %v2842_v56  ;;  %5367 = vsinq.f32 %v3093_v30  ;;  %vm2903_vm14 = vcmp.lt.s32.totalorder %v9802_v27, 0 }
 0x55d   : > { %v2844_v52 = vsel %vm2830_vm11, %v2841_v21, %v2843_v42  ;;  %v8964_v9 = vmul.u32.u64.low %v2845_v33, %v2840_v48  ;;  %v8965_v26 = vmul.u32.u64.high %v2845_v33, %v2840_v48, %v8964_v9  ;;  %v8972_v31 = vsel %vm2600_vm9, %v8864_v35, 0  ;;  %v9813_v21 = vld [vmem:[#allocation20_spill] sm:$0xff] }
 0x55e   : > { %v2969_v24 = vclz %v4634_v46  ;;  %v2988_v38 = vsel %vm2903_vm14, %v2987_v28, %v2963_v60  ;;  %v8976_v51 = vmul.u32.u64.low %v2845_v33, %v2844_v52  ;;  %v8977_v36 = vmul.u32.u64.high %v2845_v33, %v2844_v52, %v8976_v51 }
 0x55f   : > { %5369 = vtanh.f32 %v9802_v27  ;;  %v8981_v10 = vand.u32 3, %v8875_v3  ;;  %v2836_v12 = vsel %vm2830_vm11, %v2833_v29, %v2835_v17  ;;  %v8986_v62 = vshrl.u32 %v8734_v49, 5 }
 0x560   : > { %v4635_v59 = vadd.s32 4294967294, %v2969_v24  ;;  %v8989_v35 = vsub.s32 32, %v8861_v14  ;;  %v9810_v60 = vand.u32 2147483647, %v9802_v27  ;;  %v2855_v43 = vadd.s32 1, %v8965_v26 }
 0x561   : > { %v8999_v3 = vand.u32 31, %v8972_v31  ;;  %v2577_v7 = vadd.f32 %v5364_v47, %v9776_v41  ;;  %v2957_v57 = vadd.s32 %v8855_v2, %v8851_v61  ;;  %v2852_v22 = vmul.u32 %v2845_v33, %v2836_v12 }
 0x562   : > { %vm8993_vm8 = vcmp.le.f32.partialorder %v9810_v60, 0.7853982  ;;  %vm4636_vm1 = vcmp.lt.s32.totalorder %v4635_v59, 0  ;;  %vm2854_vm0 = vc.u32 %v8977_v36, %v8964_v9  ;;  %vm3101_vm2 = vcmp.eq.s32.totalorder %v8981_v10, 0 }
 0x563   : > { %v2990_v49 = vsel %vm8993_vm8, 0, %v2988_v38  ;;  %v2972_v54 = vsel %vm4636_vm1, 0, %v4635_v59  ;;  %v2856_v63 = vsel %vm2854_vm0, %v2855_v43, %v8965_v26  ;;  %v2693_v47 = vand.u32 2147483647, %v9813_v21 }
 0x564   : > { %v2973_v1 = vsub.s32 32, %v2972_v54  ;;  %v2977_v29 = vsub.s32 4294967266, %v2972_v54  ;;  %vm3100_vm5 = vcmp.lt.s32.totalorder %v8981_v10, 2  ;;  %vm3104_vm15 = vcmp.eq.s32.totalorder %v8981_v10, 2 }
 0x565   : > { %v9013_v11 = vadd.s32 3, %v2990_v49  ;;  %v2857_v61 = vadd.s32 %v2856_v63, %v2852_v22  ;;  %v2711_v2 = vshrl.u32 %v9753_v40, %v8989_v35  ;;  %vm3097_vm13 = vweird.f32 %v9800_v18 }
 0x566   : > { %v2974_v19 = vshll.u32 %v8929_v58, %v2972_v54  ;;  %v2975_v48 = vshrl.u32 %v2957_v57, %v2973_v1  ;;  %v2978_v30 = vadd.s32 127, %v2977_v29  ;;  %v2714_v28 = vshrl.u32 %v9754_v34, %v8989_v35 }
 0x567   : > { %v2858_v56 = vadd.s32 536870912, %v2857_v61  ;;  %v2710_v33 = vshll.u32 %v9583_v15, %v8861_v14  ;;  %v2713_v46 = vshll.u32 %v9753_v40, %v8861_v14  ;;  %v2717_v17 = vshrl.u32 %v9567_v6, %v8989_v35 }
 0x568   : > { %v2976_v42 = vor.u32 %v2975_v48, %v2974_v19  ;;  %v2979_v52 = vshll.u32 %v2978_v30, 23  ;;  %v2700_v58 = vand.u32 8388607, %v2693_v47  ;;  %v2720_v26 = vshrl.u32 %v9569_v5, %v8989_v35  ;;  %v5366_v24 = vpop.eup %5365 }
 0x569   : > { %v9031_v38 = vshrl.u32 %v2858_v56, 30  ;;  %v2712_v51 = vor.u32 %v2711_v2, %v2710_v33  ;;  %v2716_v59 = vshll.u32 %v9754_v34, %v8861_v14  ;;  %v2723_v12 = vshrl.u32 %v9584_v53, %v8989_v35  ;;  %v5368_v60 = vpop.eup %5367 }
 0x56a   : > { %v3105_v43 = vxor.u32 2147483648, %v5366_v24  ;;  %v2980_v49 = vor.u32 4788187, %v2979_v52  ;;  %v2715_v57 = vor.u32 %v2714_v28, %v2713_v46  ;;  %v2719_v54 = vshll.u32 %v9567_v6, %v8861_v14 }
 0x56b   : > { %v3102_v22 = vxor.u32 2147483648, %v5368_v60  ;;  %v2860_v1 = vshll.u32 %v9031_v38, 30  ;;  %v2718_v29 = vor.u32 %v2717_v17, %v2716_v59  ;;  %v2722_v63 = vshll.u32 %v9569_v5, %v8861_v14 }
 0x56c   : > { %v3106_v2 = vsel %vm3104_vm15, %v3105_v43, %v5368_v60  ;;  %v2981_v19 = vand.u32 2147483647, %v2980_v49  ;;  %v2983_v48 = vcvt.s32.f32 %v2976_v42  ;;  %v2721_v30 = vor.u32 %v2720_v26, %v2719_v54  ;;  %v5370_v56 = vpop.eup %5369 }
 0x56d   : > { %v3103_v28 = vsel %vm3101_vm2, %v5366_v24, %v3102_v22  ;;  %v9046_v33 = vsub.s32 %v2857_v61, %v2860_v1  ;;  %v2701_v46 = vor.u32 8388608, %v2700_v58  ;;  %v2724_v52 = vor.u32 %v2723_v12, %v2722_v63 }
 0x56e   : > { %v3107_v17 = vsel %vm3100_vm5, %v3103_v28, %v3106_v2  ;;  %v2984_v59 = vmul.f32 %v2983_v48, %v2981_v19  ;;  %vm2725_vm12 = vcmp.lt.s32.totalorder %v8986_v62, 1  ;;  %vm2728_vm6 = vcmp.lt.s32.totalorder %v8986_v62, 4 }
 0x56f   : > { %v3108_v14 = vsel %vm3097_vm13, nan, %v3107_v17  ;;  %v2863_v42 = vsub.s32 0, %v9046_v33  ;;  %vm2727_vm9 = vcmp.lt.s32.totalorder %v8986_v62, 3  ;;  %v2730_v26 = vsel %vm2728_vm6, %v2718_v29, 2102212464 }
 0x570   : > { %v9058_v61 = vsel %vm274_vm10, %v2577_v7, %v3108_v14  ;;  %v2985_v58 = vxor.u32 2147483648, %v2984_v59  ;;  %v2733_v10 = vsel %vm2725_vm12, %v2712_v51, %v2715_v57  ;;  %v2734_v24 = vsel %vm2728_vm6, %v2721_v30, 920167782 }
 0x571   : > { %4279 = vrot.lane.b32.xlu1 %v9058_v61, %s5531_s15  ;;  %v4630_v18 = vmin.u32 %v2863_v42, %v9046_v33  ;;  %v2735_v12 = vsel %vm2727_vm9, %v2718_v29, %v2734_v24  ;;  %v2737_v60 = vsel %vm2725_vm12, %v2715_v57, %v2718_v29  ;;  %v2738_v43 = vsel %vm2728_vm6, %v2724_v52, 1326507024 }
 0x572   : > { %v2986_v7 = vsel %vm2903_vm14, %v2985_v58, %v2984_v59  ;;  %v2709_v49 = vshrl.u32 %v9583_v15, %v8989_v35  ;;  %vm2726_vm3 = vcmp.lt.s32.totalorder %v8986_v62, 2  ;;  %v2739_v54 = vsel %vm2727_vm9, %v2721_v30, %v2738_v43 }
 0x573   : > { %v2989_v22 = vsel %vm8993_vm8, %v9802_v27, %v2986_v7  ;;  %v2865_v1 = vclz %v4630_v18  ;;  %v2736_v29 = vsel %vm2726_vm3, %v2733_v10, %v2735_v12  ;;  %v2741_v63 = vshll.u32 %v2701_v46, 8 }
 0x574   : > { %5371 = vcosq.f32 %v2989_v22  ;;  %v2729_v2 = vsel %vm2725_vm12, %v2709_v49, %v2712_v51  ;;  %v2731_v35 = vsel %vm2727_vm9, %v2715_v57, %v2730_v26  ;;  %v2740_v19 = vsel %vm2726_vm3, %v2737_v60, %v2739_v54  ;;  %v9814_v26 = vld [vmem:[#allocation18_spill] sm:$0xff] }
 0x575   : > { %5373 = vsinq.f32 %v2989_v22  ;;  %v4631_v48 = vadd.s32 4294967294, %v2865_v1  ;;  %v9087_v30 = vmul.u32.u64.low %v2741_v63, %v2740_v19  ;;  %v9088_v45 = vmul.u32.u64.high %v2741_v63, %v2740_v19, %v9087_v30 }
 0x576   : > { %v9090_v28 = vmul.u32.u64.low %v2741_v63, %v2736_v29  ;;  %v9091_v52 = vmul.u32.u64.high %v2741_v63, %v2736_v29, %v9090_v28  ;;  %v9095_v46 = vand.u32 3, %v9013_v11  ;;  %v2604_v51 = vsub.s32 32, %v8999_v3 }
 0x577   : > { %vm4632_vm7 = vcmp.lt.s32.totalorder %v4631_v48, 0  ;;  %5375 = vtanh.f32 %v9808_v23  ;;  %v2732_v17 = vsel %vm2726_vm3, %v2729_v2, %v2731_v35  ;;  %v2853_v59 = vadd.s32 %v8964_v9, %v8977_v36 }
 0x578   : > { %v2868_v57 = vsel %vm4632_vm7, 0, %v4631_v48  ;;  %v2589_v58 = vand.u32 2147483647, %v9814_v26  ;;  %v9105_v10 = vshrl.u32 %v8972_v31, 5  ;;  %v9108_v11 = vadd.f32 %v5370_v56, %v9776_v41 }
 0x579   : > { %v2869_v14 = vsub.s32 32, %v2868_v57  ;;  %v2873_v42 = vsub.s32 4294967266, %v2868_v57  ;;  %vm2750_vm4 = vc.u32 %v9088_v45, %v9090_v28  ;;  %v2751_v24 = vadd.s32 1, %v9091_v52 }
 0x57a   : > { %vm3000_vm11 = vcmp.eq.s32.totalorder %v9095_v46, 2  ;;  %v2870_v62 = vshll.u32 %v9046_v33, %v2868_v57  ;;  %v2748_v18 = vmul.u32 %v2741_v63, %v2732_v17  ;;  %vm2997_vm14 = vcmp.eq.s32.totalorder %v9095_v46, 0 }
 0x57b   : > { %v2871_v9 = vshrl.u32 %v2853_v59, %v2869_v14  ;;  %v2874_v36 = vadd.s32 127, %v2873_v42  ;;  %v2883_v31 = vsub.s32 4, %v9031_v38  ;;  %v2752_v12 = vsel %vm2750_vm4, %v2751_v24, %v9091_v52 }
 0x57c   : > { %v2606_v56 = vshll.u32 %v9583_v15, %v8999_v3  ;;  %v2607_v60 = vshrl.u32 %v9753_v40, %v2604_v51  ;;  %vm2996_vm8 = vcmp.lt.s32.totalorder %v9095_v46, 2  ;;  %v2753_v49 = vadd.s32 %v2752_v12, %v2748_v18 }
 0x57d   : > { %v2872_v43 = vor.u32 %v2871_v9, %v2870_v62  ;;  %v2875_v7 = vshll.u32 %v2874_v36, 23  ;;  %v2596_v33 = vand.u32 8388607, %v2589_v58  ;;  %vm2993_vm1 = vweird.f32 %v9802_v27 }
 0x57e   : > { %vm2799_vm0 = vcmp.lt.s32.totalorder %v9808_v23, 0  ;;  %v2610_v54 = vshrl.u32 %v9754_v34, %v2604_v51  ;;  %v2613_v22 = vshrl.u32 %v9567_v6, %v2604_v51  ;;  %v2615_v1 = vshll.u32 %v9567_v6, %v8999_v3 }
 0x57f   : > { %v2616_v29 = vshrl.u32 %v9569_v5, %v2604_v51  ;;  %vm9133_vm2 = vcmp.le.f32.partialorder %v2797_v16, 0.7853982  ;;  %v2876_v2 = vor.u32 4788187, %v2875_v7  ;;  %v2754_v35 = vadd.s32 536870912, %v2753_v49 }
 0x580   : > { %v2605_v19 = vshrl.u32 %v9583_v15, %v2604_v51  ;;  %v2609_v48 = vshll.u32 %v9753_v40, %v8999_v3  ;;  %v2608_v30 = vor.u32 %v2607_v60, %v2606_v56  ;;  %v2612_v52 = vshll.u32 %v9754_v34, %v8999_v3 }
 0x581   : > { %v2617_v6 = vor.u32 %v2616_v29, %v2615_v1  ;;  %v2619_v57 = vshrl.u32 %v9584_v53, %v2604_v51  ;;  %v5372_v17 = vpop.eup %5371  ;;  %v2877_v59 = vand.u32 2147483647, %v2876_v2  ;;  %v2879_v16 = vcvt.s32.f32 %v2872_v43 }
 0x582   : > { %v9143_v14 = vshrl.u32 %v2754_v35, 30  ;;  %v2597_v42 = vor.u32 8388608, %v2596_v33  ;;  %v5374_v24 = vpop.eup %5373  ;;  %v3001_v62 = vxor.u32 2147483648, %v5372_v17  ;;  %v2611_v9 = vor.u32 %v2610_v54, %v2609_v48 }
 0x583   : > { %v2614_v15 = vor.u32 %v2613_v22, %v2612_v52  ;;  %v2618_v40 = vshll.u32 %v9569_v5, %v8999_v3  ;;  %v2998_v36 = vxor.u32 2147483648, %v5374_v24  ;;  %v2880_v18 = vmul.f32 %v2879_v16, %v2877_v59 }
 0x584   : > { %v2756_v34 = vshll.u32 %v9143_v14, 30  ;;  %vm2624_vm5 = vcmp.lt.s32.totalorder %v9105_v10, 4  ;;  %v3002_v53 = vsel %vm3000_vm11, %v3001_v62, %v5374_v24  ;;  %vm2621_vm15 = vcmp.lt.s32.totalorder %v9105_v10, 1  ;;  %v9154_v56 = vpop.eup %5375 }
 0x585   : > { %v2620_v51 = vor.u32 %v2619_v57, %v2618_v40  ;;  %v2630_v12 = vsel %vm2624_vm5, %v2617_v6, 920167782  ;;  %v2999_v5 = vsel %vm2997_vm14, %v5372_v17, %v2998_v36  ;;  %v2881_v3 = vxor.u32 2147483648, %v2880_v18 }
 0x586   : > { %v2757_v60 = vsub.s32 %v2753_v49, %v2756_v34  ;;  %vm2623_vm13 = vcmp.lt.s32.totalorder %v9105_v10, 3  ;;  %v3003_v43 = vsel %vm2996_vm8, %v2999_v5, %v3002_v53  ;;  %vm2622_vm12 = vcmp.lt.s32.totalorder %v9105_v10, 2 }
 0x587   : > { %v2629_v7 = vsel %vm2621_vm15, %v2608_v30, %v2611_v9  ;;  %v2631_v33 = vsel %vm2623_vm13, %v2614_v15, %v2630_v12  ;;  %v3004_v54 = vsel %vm2993_vm1, nan, %v3003_v43  ;;  %v2882_v22 = vsel %vm2799_vm0, %v2881_v3, %v2880_v18 }
 0x588   : > { %v2759_v49 = vsub.s32 0, %v2757_v60  ;;  %v2633_v1 = vsel %vm2621_vm15, %v2611_v9, %v2614_v15  ;;  %v9175_v46 = vsel %vm274_vm10, %v9108_v11, %v3004_v54  ;;  %v2885_v29 = vsel %vm9133_vm2, %v9808_v23, %v2882_v22 }
 0x589   : > { %v2626_v27 = vsel %vm2624_vm5, %v2614_v15, 2102212464  ;;  %v2634_v2 = vsel %vm2624_vm5, %v2620_v51, 1326507024  ;;  %4277 = vrot.lane.b32.xlu0 %v9175_v46, %s5531_s15  ;;  %5377 = vcosq.f32 %v2885_v29  ;;  %v2632_v48 = vsel %vm2622_vm12, %v2629_v7, %v2631_v33 }
 0x58a   : > { %v4626_v35 = vmin.u32 %v2759_v49, %v2757_v60  ;;  %v2635_v11 = vsel %vm2623_vm13, %v2617_v6, %v2634_v2  ;;  %v2884_v52 = vsel %vm2799_vm0, %v2883_v31, %v9031_v38  ;;  %5379 = vsinq.f32 %v2885_v29 }
 0x58b   : > { %v2636_v57 = vsel %vm2622_vm12, %v2633_v1, %v2635_v11  ;;  %v2637_v17 = vshll.u32 %v2597_v42, 8  ;;  %v2625_v16 = vsel %vm2621_vm15, %v2605_v19, %v2608_v30  ;;  %v2627_v24 = vsel %vm2623_vm13, %v2611_v9, %v2626_v27 }
 0x58c   : > { %v2761_v59 = vclz %v4626_v35  ;;  %v2886_v38 = vsel %vm9133_vm2, 0, %v2884_v52  ;;  %v2628_v42 = vsel %vm2622_vm12, %v2625_v16, %v2627_v24  ;;  %v2749_v9 = vadd.s32 %v9090_v28, %v9088_v45 }
 0x58d   : > { %v9201_v62 = vmul.u32.u64.low %v2637_v17, %v2636_v57  ;;  %v9202_v6 = vmul.u32.u64.high %v2637_v17, %v2636_v57, %v9201_v62  ;;  %v9204_v15 = vmul.u32.u64.low %v2637_v17, %v2632_v48  ;;  %v9205_v40 = vmul.u32.u64.high %v2637_v17, %v2632_v48, %v9204_v15 }
 0x58e   : > { %v4627_v31 = vadd.s32 4294967294, %v2761_v59  ;;  %v2890_v36 = vadd.s32 3, %v2886_v38  ;;  %v2644_v53 = vmul.u32 %v2637_v17, %v2628_v42  ;;  %v2575_v35 = vadd.f32 %v9154_v56, %v9776_v41 }
 0x58f   : > { %vm2646_vm9 = vc.u32 %v9202_v6, %v9204_v15  ;;  %v2647_v30 = vadd.s32 1, %v9205_v40  ;;  %vm2889_vm11 = vweird.f32 %v9808_v23  ;;  %vm2695_vm14 = vcmp.lt.s32.totalorder %v9813_v21, 0 }
 0x590   : > { %vm4628_vm6 = vcmp.lt.s32.totalorder %v4627_v31, 0  ;;  %v2891_v3 = vand.u32 3, %v2890_v36  ;;  %v2779_v56 = vsub.s32 4, %v9143_v14  ;;  %vm9234_vm8 = vcmp.le.f32.partialorder %v2693_v47, 0.7853982 }
 0x591   : > { %v2764_v19 = vsel %vm4628_vm6, 0, %v4627_v31  ;;  %v2648_v63 = vsel %vm2646_vm9, %v2647_v30, %v9205_v40  ;;  %v2645_v30 = vadd.s32 %v9204_v15, %v9202_v6  ;;  %vm2785_vm15 = vweird.f32 %v9813_v21 }
 0x592   : > { %v2765_v18 = vsub.s32 32, %v2764_v19  ;;  %v2769_v34 = vsub.s32 4294967266, %v2764_v19  ;;  %v2766_v51 = vshll.u32 %v2757_v60, %v2764_v19  ;;  %v2649_v5 = vadd.s32 %v2648_v63, %v2644_v53 }
 0x593   : > { %vm2893_vm3 = vcmp.eq.s32.totalorder %v2891_v3, 0  ;;  %vm2896_vm7 = vcmp.eq.s32.totalorder %v2891_v3, 2  ;;  %vm2892_vm4 = vcmp.lt.s32.totalorder %v2891_v3, 2  ;;  %v2780_v42 = vsel %vm2695_vm14, %v2779_v56, %v9143_v14 }
 0x594   : > { %v2767_v12 = vshrl.u32 %v2749_v9, %v2765_v18  ;;  %v2770_v10 = vadd.s32 127, %v2769_v34  ;;  %v2650_v33 = vadd.s32 536870912, %v2649_v5  ;;  %v2782_v47 = vsel %vm9234_vm8, 0, %v2780_v42 }
 0x595   : > { %v2786_v34 = vadd.s32 3, %v2782_v47  ;;  %vm2591_vm13 = vcmp.lt.s32.totalorder %v9814_v26, 0  ;;  %vm2590_vm12 = vcmp.le.f32.partialorder %v2589_v58, 0.7853982 }
 0x596   : > { %v2768_v43 = vor.u32 %v2767_v12, %v2766_v51  ;;  %v2771_v7 = vshll.u32 %v2770_v10, 23  ;;  %v5378_v54 = vpop.eup %5377  ;;  %v9218_v29 = vshrl.u32 %v2650_v33, 30  ;;  %v4302_v10 = vpop.permute.xlu0 %4301 }
 0x597   : > { %v5380_v22 = vpop.eup %5379  ;;  %v2897_v49 = vxor.u32 2147483648, %v5378_v54 }
 0x598   : > { %v2772_v1 = vor.u32 4788187, %v2771_v7  ;;  %v2894_v45 = vxor.u32 2147483648, %v5380_v22  ;;  %v2775_v2 = vcvt.s32.f32 %v2768_v43  ;;  %v2652_v60 = vshll.u32 %v9218_v29, 30 }
 0x599   : > { %v2898_v28 = vsel %vm2896_vm7, %v2897_v49, %v5380_v22  ;;  %vm2681_vm7 = vweird.f32 %v9814_v26 }
 0x59a   : > { %v2773_v27 = vand.u32 2147483647, %v2772_v1  ;;  %v2895_v48 = vsel %vm2893_vm3, %v5378_v54, %v2894_v45  ;;  %v2653_v57 = vsub.s32 %v2649_v5, %v2652_v60  ;;  %v2787_v5 = vand.u32 3, %v2786_v34  ;;  %v4298_v45 = vpop.permute.xlu0 %4297 }
 0x59b   : > { %v2899_v11 = vsel %vm2892_vm4, %v2895_v48, %v2898_v28  ;;  %v2675_v48 = vsub.s32 4, %v9218_v29  ;;  %v9268_v58 = vmul.f32 %v4298_v45, %v7958_v37 }
 0x59c   : > { %v2776_v52 = vmul.f32 %v2775_v2, %v2773_v27  ;;  %v2900_v17 = vsel %vm2889_vm11, nan, %v2899_v11  ;;  %v2655_v24 = vsub.s32 0, %v2653_v57  ;;  %vm2792_vm0 = vcmp.eq.s32.totalorder %v2787_v5, 2 }
 0x59d   : > { %v9226_v59 = vsel %vm274_vm10, %v2575_v35, %v2900_v17  ;;  %vm2789_vm2 = vcmp.eq.s32.totalorder %v2787_v5, 0  ;;  %vm2788_vm5 = vcmp.lt.s32.totalorder %v2787_v5, 2 }
 0x59e   : > { %v2777_v16 = vxor.u32 2147483648, %v2776_v52  ;;  %4275 = vrot.lane.b32.xlu1 %v9226_v59, %s5531_s15  ;;  %v4622_v40 = vmin.u32 %v2655_v24, %v2653_v57  ;;  %v4294_v17 = vpop.permute.xlu0 %4293 }
 0x5a0   : > { %v2778_v62 = vsel %vm2695_vm14, %v2777_v16, %v2776_v52  ;;  %v2657_v31 = vclz %v4622_v40  ;;  %v2676_v16 = vsel %vm2591_vm13, %v2675_v48, %v9218_v29 }
 0x5a1   : > { %v2781_v38 = vsel %vm9234_vm8, %v9813_v21, %v2778_v62  ;;  %v2678_v24 = vsel %vm2590_vm12, 0, %v2676_v16  ;;  %v4300_v62 = vpop.permute.xlu1 %4299 }
 0x5a2   : > { %5381 = vcosq.f32 %v2781_v38  ;;  %v4623_v36 = vadd.s32 4294967294, %v2657_v31  ;;  %v4290_v56 = vpop.permute.xlu0 %4289  ;;  %v2682_v23 = vadd.s32 3, %v2678_v24 }
 0x5a3   : > { %5383 = vsinq.f32 %v2781_v38  ;;  %v9278_v40 = vmul.f32 %v4290_v56, %v8456_v20 }
 0x5a4   : > { %5385 = vtanh.f32 %v9813_v21  ;;  %vm4624_vm1 = vcmp.lt.s32.totalorder %v4623_v36, 0  ;;  %v2683_v29 = vand.u32 3, %v2682_v23 }
 0x5a5   : > { %v2660_v19 = vsel %vm4624_vm1, 0, %v4623_v36 }
 0x5a6   : > { %v2661_v9 = vsub.s32 32, %v2660_v19  ;;  %v2665_v18 = vsub.s32 4294967266, %v2660_v19  ;;  %v2662_v53 = vshll.u32 %v2653_v57, %v2660_v19  ;;  %v9261_v57 = vmul.f32 %v4302_v10, %v7825_v44  ;;  %v4286_v38 = vpop.permute.xlu0 %4285 }
 0x5a7   : > { %v9273_v44 = vmul.f32 %v4294_v17, %v8210_v13  ;;  %vm2688_vm6 = vcmp.eq.s32.totalorder %v2683_v29, 2  ;;  %v9283_v13 = vmul.f32 %v4286_v38, %v8697_v4  ;;  %vm2685_vm9 = vcmp.eq.s32.totalorder %v2683_v29, 0 }
 0x5a8   : > { %v2663_v63 = vshrl.u32 %v2645_v30, %v2661_v9  ;;  %v2666_v51 = vadd.s32 127, %v2665_v18  ;;  %v4296_v30 = vpop.permute.xlu1 %4295  ;;  %vm2684_vm3 = vcmp.lt.s32.totalorder %v2683_v29, 2  ;;  %v4317_v4 = vmul.f32 %v4300_v62, %v7907_v0 }
 0x5aa   : > { %v2664_v12 = vor.u32 %v2663_v63, %v2662_v53  ;;  %v2667_v14 = vshll.u32 %v2666_v51, 23 }
 0x5ac   : > { %v2668_v3 = vor.u32 4788187, %v2667_v14  ;;  %v2671_v22 = vcvt.s32.f32 %v2664_v12  ;;  %v4292_v63 = vpop.permute.xlu1 %4291 }
 0x5ad   : > { %v4313_v32 = vmul.f32 %v4292_v63, %v8322_v39 }
 0x5ae   : > { %v2669_v54 = vand.u32 2147483647, %v2668_v3 }
 0x5af   : > { %v5382_v43 = vpop.eup %5381 }
 0x5b0   : > { %v5384_v7 = vpop.eup %5383  ;;  %v2793_v33 = vxor.u32 2147483648, %v5382_v43  ;;  %v2672_v15 = vmul.f32 %v2671_v22, %v2669_v54 }
 0x5b1   : > { %v5386_v49 = vpop.eup %5385  ;;  %v2790_v1 = vxor.u32 2147483648, %v5384_v7 }
 0x5b2   : > { %v2794_v6 = vsel %vm2792_vm0, %v2793_v33, %v5384_v7  ;;  %v2574_v27 = vadd.f32 %v5386_v49, %v9776_v41  ;;  %v2673_v60 = vxor.u32 2147483648, %v2672_v15  ;;  %v9819_v7 = vmov 0.0  }
 0x5b3   : > { %v2791_v28 = vsel %vm2789_vm2, %v5382_v43, %v2790_v1  ;;  %v5533_v33 = vmov 0  }
 0x5b4   : > { %v2795_v2 = vsel %vm2788_vm5, %v2791_v28, %v2794_v6  ;;  %v2674_v52 = vsel %vm2591_vm13, %v2673_v60, %v2672_v15  ;;  %5200 = vset.pattern.permute.xlu0 %v5533_v33 }
 0x5b5   : > { %v2796_v35 = vsel %vm2785_vm15, nan, %v2795_v2  ;;  %v2677_v21 = vsel %vm2590_vm12, %v9814_v26, %v2674_v52 }
 0x5b6   : > { %v9253_v11 = vsel %vm274_vm10, %v2574_v27, %v2796_v35  ;;  %5387 = vcosq.f32 %v2677_v21 }
 0x5b7   : > { %4273 = vrot.lane.b32.xlu0 %v9253_v11, %s5531_s15  ;;  %5389 = vsinq.f32 %v2677_v21 }
 0x5b8   : > { %5391 = vtanh.f32 %v9814_v26  ;;  %v4288_v26 = vpop.permute.xlu1 %4287 }
 0x5b9   : > { %v4311_v0 = vmul.f32 %v4288_v26, %v8574_v25 }
 0x5bb   : > { %4349 = vrot.lane.b32.xlu0 %v9261_v57, %s5530_s10 }
 0x5bc   : > { %v4284_v14 = vpop.permute.xlu1 %4283 }
 0x5bf   : > { %4345 = vrot.lane.b32.xlu0 %v9268_v58, %s5530_s10 }
 0x5c3   : > { %4341 = vrot.lane.b32.xlu0 %v9273_v44, %s5530_s10  ;;  %v5388_v37 = vpop.eup %5387 }
 0x5c4   : > { %v5390_v31 = vpop.eup %5389  ;;  %v2689_v42 = vxor.u32 2147483648, %v5388_v37 }
 0x5c5   : > { %v5392_v36 = vpop.eup %5391  ;;  %v2686_v47 = vxor.u32 2147483648, %v5390_v31 }
 0x5c6   : > { %v2690_v19 = vsel %vm2688_vm6, %v2689_v42, %v5390_v31  ;;  %v2573_v20 = vadd.f32 %v5392_v36, %v9776_v41  ;;  %v4315_v41 = vmul.f32 %v4296_v30, %v8085_v50 }
 0x5c7   : > { %4337 = vrot.lane.b32.xlu0 %v9278_v40, %s5530_s10  ;;  %v2687_v9 = vsel %vm2685_vm9, %v5388_v37, %v2686_v47  ;;  %v4367_v47 = vld [vmem:[%s9405_s3] sm:$0x7] }
 0x5c8   : > { %v2691_v18 = vsel %vm2684_vm3, %v2687_v9, %v2690_v19 }
 0x5c9   : > { %v2692_v34 = vsel %vm2681_vm7, nan, %v2691_v18 }
 0x5ca   : > { %v4255_v53 = vsel %vm274_vm10, %v2573_v20, %v2692_v34  ;;  %vm5532_vm10 = vmmov 0  }
 0x5cb   : > { %4333 = vrot.lane.b32.xlu0 %v9283_v13, %s5530_s10  ;;  %4271 = vrot.lane.b32.xlu1 %v4255_v53, %s5531_s15  ;;  %s5453_s15 = scalar_lea.vmem %s5452_s22, 128 }
 0x5cc   : > { %v4282_v51 = vpop.permute.xlu0 %4281  ;;  %5003 = vmatprep.mubr.msk.f32.mxu1 %vm5532_vm10, %v9819_v7  ;;  %p5455_p7 = scmp.lt.s32.totalorder %s5453_s15, %s5447_s11 }
 0x5cd   : > { %v9294_v12 = vmul.f32 %v4282_v51, %v8943_v55  ;;  %v4309_v55 = vmul.f32 %v4284_v14, %v8809_v8 }
 0x5ce   : > { %p5456_p3 = por %p5455_p7, %p5454_p0 }
 0x5cf   : > { %4347 = vrot.lane.b32.xlu1 %v4317_v4, %s5530_s10  ;;  %4329 = vrot.lane.b32.xlu0 %v9294_v12, %s5530_s10 }
 0x5d0   : > { %p5457_p8 = pnand %p5456_p3, %p5450_p1 }
 0x5d3   : > { %4343 = vrot.lane.b32.xlu1 %v4315_v41, %s5530_s10 }
 0x5d7   : > { %4339 = vrot.lane.b32.xlu1 %v4313_v32, %s5530_s10 }
 0x5db   : > { %4335 = vrot.lane.b32.xlu1 %v4311_v0, %s5530_s10 }
 0x5df   : > { %4331 = vrot.lane.b32.xlu1 %v4309_v55, %s5530_s10 }
 0x5e3   : > { %v4280_v50 = vpop.permute.xlu1 %4279 }
 0x5e4   : > { %v9308_v10 = vmul.f32 %v4280_v50, %v9058_v61 }
 0x5e6   : > { %4327 = vrot.lane.b32.xlu1 %v9308_v10, %s5530_s10 }
 0x5fb   : > { %v4278_v5 = vpop.permute.xlu0 %4277 }
 0x5fc   : > { %v9313_v39 = vmul.f32 %v4278_v5, %v9175_v46 }
 0x5fe   : > { %4325 = vrot.lane.b32.xlu0 %v9313_v39, %s5530_s10 }
 0x610   : > { %v4276_v25 = vpop.permute.xlu1 %4275 }
 0x611   : > { %v9318_v3 = vmul.f32 %v4276_v25, %v9226_v59  ;;  %v4368_v59 = vld [vmem:[%s9406_s4] sm:$0x7] }
 0x613   : > { %4323 = vrot.lane.b32.xlu1 %v9318_v3, %s5530_s10 }
 0x629   : > { %v4274_v8 = vpop.permute.xlu0 %4273 }
 0x62a   : > { %v9323_v61 = vmul.f32 %v4274_v8, %v9253_v11 }
 0x62c   : > { %4321 = vrot.lane.b32.xlu0 %v9323_v61, %s5530_s10 }
 0x62d   : > { %v4350_v43 = vpop.permute.xlu0 %4349 }
 0x62e   : > { %v4366_v46 = vmul.f32 %v4350_v43, %v9261_v57 }
 0x630   : > { %4972 = vmatpush3.xpose.msra.mxu1 %v4366_v46  ;;  %4371 = vperm.xlu0 %5200, %v4368_v59  }
 0x631   : > { %4973 = vmatprep.subr.mxu1 %v9819_v7  ;;  %v4346_v6 = vpop.permute.xlu0 %4345 }
 0x632   : > { %v4364_v15 = vmul.f32 %v4346_v6, %v9268_v58 }
 0x635   : > { %v4342_v27 = vpop.permute.xlu0 %4341 }
 0x636   : > { %v4362_v2 = vmul.f32 %v4342_v27, %v9273_v44 }
 0x639   : > { %v4338_v48 = vpop.permute.xlu0 %4337 }
 0x63a   : > { %v4360_v11 = vmul.f32 %v4338_v48, %v9278_v40 }
 0x63d   : > { %v4272_v54 = vpop.permute.xlu1 %4271  ;;  %v4334_v57 = vpop.permute.xlu0 %4333 }
 0x63e   : > { %v4303_v22 = vmul.f32 %v4272_v54, %v4255_v53  ;;  %v4358_v17 = vmul.f32 %v4334_v57, %v9283_v13 }
 0x640   : > { %4319 = vrot.lane.b32.xlu1 %v4303_v22, %s5530_s10  ;;  %s4446_s10 = scalar_lea.sflag [#allocation4], %s5685_s16 }
 0x641   : > { %v4348_v49 = vpop.permute.xlu1 %4347  ;;  %v4330_v24 = vpop.permute.xlu0 %4329 }
 0x642   : > { %v4365_v1 = vmul.f32 %v4348_v49, %v4317_v4  ;;  %v4356_v56 = vmul.f32 %v4330_v24, %v9294_v12 }
 0x644   : > { %4974 = vmatpush3.xpose.msra.mxu1 %v4365_v1 }
 0x645   : > { %4975 = vmatprep.subr.mxu1 %v9819_v7  ;;  %v4344_v45 = vpop.permute.xlu1 %4343 }
 0x646   : > { %v4363_v28 = vmul.f32 %v4344_v45, %v4315_v41 }
 0x648   : > { %4976 = vmatpush3.xpose.msra.mxu1 %v4364_v15 }
 0x649   : > { %4977 = vmatprep.subr.mxu1 %v9819_v7  ;;  %v4340_v60 = vpop.permute.xlu1 %4339 }
 0x64a   : > { %v4361_v35 = vmul.f32 %v4340_v60, %v4313_v32 }
 0x64c   : > { %4978 = vmatpush3.xpose.msra.mxu1 %v4363_v28 }
 0x64d   : > { %4979 = vmatprep.subr.mxu1 %v9819_v7  ;;  %v4336_v52 = vpop.permute.xlu1 %4335 }
 0x64e   : > { %v4359_v21 = vmul.f32 %v4336_v52, %v4311_v0 }
 0x650   : > { %4980 = vmatpush3.xpose.msra.mxu1 %v4362_v2 }
 0x651   : > { %4981 = vmatprep.subr.mxu1 %v9819_v7  ;;  %v4332_v16 = vpop.permute.xlu1 %4331 }
 0x652   : > { %v4357_v58 = vmul.f32 %v4332_v16, %v4309_v55 }
 0x654   : > { %4982 = vmatpush3.xpose.msra.mxu1 %v4361_v35 }
 0x655   : > { %4983 = vmatprep.subr.mxu1 %v9819_v7 }
 0x658   : > { %4984 = vmatpush3.xpose.msra.mxu1 %v4360_v11  ;;  %v4328_v23 = vpop.permute.xlu1 %4327 }
 0x659   : > { %4985 = vmatprep.subr.mxu1 %v9819_v7  ;;  %v4355_v44 = vmul.f32 %v4328_v23, %v9308_v10 }
 0x65c   : > { %4986 = vmatpush3.xpose.msra.mxu1 %v4359_v21 }
 0x65d   : > { %4987 = vmatprep.subr.mxu1 %v9819_v7 }
 0x660   : > { %4988 = vmatpush3.xpose.msra.mxu1 %v4358_v17 }
 0x661   : > { %4989 = vmatprep.subr.mxu1 %v9819_v7 }
 0x664   : > { %4990 = vmatpush3.xpose.msra.mxu1 %v4357_v58 }
 0x665   : > { %4991 = vmatprep.subr.mxu1 %v9819_v7 }
 0x668   : > { %4992 = vmatpush3.xpose.msra.mxu1 %v4356_v56 }
 0x669   : > { %4993 = vmatprep.subr.mxu1 %v9819_v7 }
 0x66c   : > { %4994 = vmatpush3.xpose.msra.mxu1 %v4355_v44 }
 0x66d   : > { %4995 = vmatprep.subr.mxu1 %v9819_v7 }
 0x670   : > { %v4326_v62 = vpop.permute.xlu0 %4325 }
 0x671   : > { %v4354_v29 = vmul.f32 %v4326_v62, %v9313_v39 }
 0x673   : > { %4996 = vmatpush3.xpose.msra.mxu1 %v4354_v29 }
 0x674   : > { %4997 = vmatprep.subr.mxu1 %v9819_v7 }
 0x685   : > { %v4324_v40 = vpop.permute.xlu1 %4323 }
 0x686   : > { %v4353_v38 = vmul.f32 %v4324_v40, %v9318_v3 }
 0x688   : > { %4998 = vmatpush3.xpose.msra.mxu1 %v4353_v38 }
 0x689   : > { %4999 = vmatprep.subr.mxu1 %v9819_v7 }
 0x69e   : > { %v4322_v37 = vpop.permute.xlu0 %4321 }
 0x69f   : > { %v4352_v31 = vmul.f32 %v4322_v37, %v9323_v61 }
 0x6a1   : > { %5000 = vmatpush3.xpose.msra.mxu1 %v4352_v31 }
 0x6a2   : > { %5001 = vmatprep.subr.mxu1 %v9819_v7 }
 0x6ab   : > { %v4372_v13 = vpop.permute.xlu0 %4371 }
 0x6b2   : > { %v4320_v42 = vpop.permute.xlu1 %4319 }
 0x6b3   : > { %v4351_v36 = vmul.f32 %v4320_v42, %v4303_v22 }
 0x6b5   : > { %5002 = vmatpush3.xpose.msra.mxu1 %v4351_v36 }
 0x6b8   : > { %5004 = vmatmul.mubr.f32.vlgmr.msra.gmra.mxu1 %v4367_v47 }
 0x778   : > { %v4440_v19 = vpop.f32.mrf.mxu1 }
 0x779   : > { %v4441_v30 = vadd.f32 %v4440_v19, %v4372_v13 }
 0x77a   : > { %v5005_v9 = vpop.f32.mrf.mxu1 }
 0x77b   : > { %4444 = vst [vmem:[%s263_s8] sm:$0x7] %v4441_v30 }
 0x77c   : > { %5460 = shalt.err (!%p5457_p8)
}
 0x77d   : > { %s5461_s17 = scalar_lea.hbm %s9365_s28, 64  ;;  %s5465_s26 = scalar_lea.hbm %s9407_s5, 128 }
 0x77e   : > { %p5462_p9 = scmp.ne.s32.totalorder %s9365_s28, %s5461_s17  ;;  %p5466_p12 = scmp.lt.s32.totalorder %s9365_s28, %s9407_s5 }
 0x77f   : > { %p5467_p2 = scmp.lt.s32.totalorder %s5465_s26, %s5461_s17 }
 0x780   : > { %p5463_p6 = pnand %p5462_p9, %p9820_p13 }
 0x781   : > { %p5468_p10 = por %p5467_p2, %p5466_p12 }
 0x782   : > { %p5464_p11 = pneg %p5463_p6 }
 0x784   : > { %p5469_p4 = pnand %p5468_p10, %p5464_p11 }
 0x786   : > { %5472 = shalt.err (!%p5469_p4)
}
 0x787   : > { %5139 = dma.vmem_to_hbm [thread:$0]  (%p9820_p13), %s4460_s12, 64, %s9365_s28, %s4446_s10  }
 0x788 PF: > { %s4471_s25 = sand.u32 1, %s5503_s18   ;;  %p9821_p5 = scmp.ne.s32.totalorder %s9552_s6, 0 }
 0x789   : > { %p9822_p1 = scmp.ge.s32.totalorder %s5515_s21, 2  ;;  %s4472_s8 = scalar_lea.sflag [#allocation4], %s4471_s25 }
 0x78b   : > { %p5146_p0 = pnand %p9822_p1, %p9821_p5 }
 0x78d   : > { %p5147_p7 = pneg %p5146_p0 }
 0x78f   : > { %5498 = dma.done.wait (%p5147_p7), %s4472_s8, 64  }
 0x790   : > { %5500 = vsyncadd (%p5147_p7), %s4472_s8, 4294967232  ;;  %p19_p3 = scmp.ge.s32.totalorder %s5590_s24, 4   ;;  %s9823_s18 = smov %s5507_s19 }
 0x791   : > { %s9824_s19 = smov %s5511_s20  ;;  %s9825_s20 = smov %s5602_s27 }
 0x792   : > { %s9826_s21 = smov %s5590_s24  ;;  %21 = sbr.rel (!%p19_p3) target bundleno = 6 (0x6), region = 89 }
 0x797   :  { %4477 = vsyncpa [#allocation3], 1 }
 0x798   :  { %4479 = vsyncpa [#allocation3 + $0x1], 1 }
 0x799   :  { %4480 = vsyncpa [#allocation6], 1 }
 0x79a   :  { %4481 = vsyncpa [#allocation4], 1 }
 0x79b   :  { %4483 = vsyncpa [#allocation4 + $0x1], 1 }

</bundles_post_ra>
